<compile_context>
chip_gen: v7x
topology: tpu7x:2x2x1
jax: 0.10.0
libtpu: 0.0.40
codegen_flags: <defaults>
</compile_context>

<pallas_src>
import math

import jax
import jax.numpy as jnp
from jax import lax
from jax.experimental import pallas as pl
from jax.experimental.pallas import tpu as pltpu  # noqa: F401  (TPU backend assumed)

B = 2           # batch
S_TGT = 8       # target (decoder) sequence length
S_SRC = 8       # source (encoder) sequence length
D = 32          # d_model ("features")
H = 4           # attention heads
DK = D // H     # per-head dim
DFF = 64        # feed-forward hidden dim
L = 2           # number of decoder layers
EPS = 1e-6      # LayerNormalisation eps
NEG = -1e9      # masked_fill value
SCALE = 1.0 / math.sqrt(DK)
M = B * S_TGT   # folded query rows
N = B * S_SRC   # folded key rows


# ---------------------------------------------------------------------------
# in-kernel math helpers
# ---------------------------------------------------------------------------
def _ln(v, alpha, beta):
    # alpha * (x - mean) / (std + eps) + bias ; unbiased std (N-1) — exact math
    mean = jnp.mean(v, axis=-1, keepdims=True)
    var = jnp.sum((v - mean) ** 2, axis=-1, keepdims=True) * (1.0 / (D - 1))
    return alpha * (v - mean) / (jnp.sqrt(var) + EPS) + beta


def _attend(q, k, v, wo, bias):
    """Multi-head attention core on batch-folded activations.
    q:(M,D) k,v:(N,D) wo:(D,D) bias:(H*M,N) additive mask (0 / -1e9),
    already tiled per head along the row axis."""
    m = q.shape[0]
    # per-head scores, stacked along sublanes -> one (H*M, N) block
    s = jnp.concatenate(
        [lax.dot_general(q[:, h * DK:(h + 1) * DK], k[:, h * DK:(h + 1) * DK],
                         dimension_numbers=(((1,), (1,)), ((), ())),
                         preferred_element_type=jnp.float32)
         for h in range(H)], axis=0) * SCALE
    s = s + bias
    s = s - jnp.max(s, axis=-1, keepdims=True)
    p = jnp.exp(s)
    p = p / jnp.sum(p, axis=-1, keepdims=True)          # exact softmax
    # per-head context, concatenated along lanes -> (M, D) == concat(heads)
    ctx = jnp.concatenate(
        [jnp.dot(p[h * m:(h + 1) * m, :], v[:, h * DK:(h + 1) * DK],
                 preferred_element_type=jnp.float32)
         for h in range(H)], axis=-1)
    # single fused output projection (== sum of per-head projections)
    return jnp.dot(ctx, wo, preferred_element_type=jnp.float32)


# ---------------------------------------------------------------------------
# Pallas kernel: one grid-less invocation, everything resident in VMEM.
# ---------------------------------------------------------------------------
def decoder_kernel(x_ref, enc_ref, sbias_ref, cbias_ref,
                   w_qkv_s_ref, w_q_c_ref, w_kv_c_ref, w_o_ref,
                   w1_ref, w2_ref, b1_ref, b2_ref, ln_a_ref, ln_b_ref,
                   out_ref):
    f32 = jnp.float32
    x = x_ref[...].astype(f32)        # (M, D)  batch-folded decoder input
    enc = enc_ref[...].astype(f32)    # (N, D)  batch-folded encoder output
    sbias = sbias_ref[...]            # (H*M, M) self-attn additive mask
    cbias = cbias_ref[...]            # (H*M, N) cross-attn additive mask

    for l in range(L):
        # residual 1: masked self-attention (pre-norm, fused QKV projection)
        xn = _ln(x, ln_a_ref[3 * l + 0], ln_b_ref[3 * l + 0])
        qkv = jnp.dot(xn, w_qkv_s_ref[l], preferred_element_type=f32)   # (M, 3D)
        x = x + _attend(qkv[:, 0:D], qkv[:, D:2 * D], qkv[:, 2 * D:3 * D],
                        w_o_ref[l], sbias)

        # residual 2: cross-attention over encoder output (fused KV projection)
        xn = _ln(x, ln_a_ref[3 * l + 1], ln_b_ref[3 * l + 1])
        q = jnp.dot(xn, w_q_c_ref[l], preferred_element_type=f32)       # (M, D)
        kv = jnp.dot(enc, w_kv_c_ref[l], preferred_element_type=f32)    # (N, 2D)
        x = x + _attend(q, kv[:, 0:D], kv[:, D:2 * D], w_o_ref[L + l], cbias)

        # residual 3: feed-forward  Linear -> ReLU -> Linear
        xn = _ln(x, ln_a_ref[3 * l + 2], ln_b_ref[3 * l + 2])
        h1 = jnp.maximum(
            jnp.dot(xn, w1_ref[l], preferred_element_type=f32) + b1_ref[l], 0.0)
        x = x + jnp.dot(h1, w2_ref[l], preferred_element_type=f32) + b2_ref[l]

    # final LayerNormalisation
    out_ref[...] = _ln(x, ln_a_ref[3 * L], ln_b_ref[3 * L]).astype(out_ref.dtype)


# ---------------------------------------------------------------------------
# wrapper: lane-dense parameter packing, mask folding, pallas_call
# ---------------------------------------------------------------------------
def _pack_params(p):
    w_qkv_s = jnp.concatenate([p["wq_s"], p["wk_s"], p["wv_s"]], axis=-1)  # (L,D,3D)
    w_q_c = p["wq_c"]                                                      # (L,D,D)
    w_kv_c = jnp.concatenate([p["wk_c"], p["wv_c"]], axis=-1)              # (L,D,2D)
    w_o = jnp.concatenate([p["wo_s"], p["wo_c"]], axis=0)                  # (2L,D,D)
    ln_a = jnp.concatenate([p["ln_a"].reshape(3 * L, D), p["fin_a"]],
                           axis=0)[:, None, :]                             # (3L+1,1,D)
    ln_b = jnp.concatenate([p["ln_b"].reshape(3 * L, D), p["fin_b"]],
                           axis=0)[:, None, :]                             # (3L+1,1,D)
    return (w_qkv_s, w_q_c, w_kv_c, w_o,
            p["w1"], p["w2"], p["b1"], p["b2"], ln_a, ln_b)


def _fold_bias(mask_b):
    """(B, R, C) 0/1 mask -> (B*R, B*C) additive bias, block-diagonal so that
    folded batch items cannot attend each other."""
    Bv, R, C = mask_b.shape
    same = jnp.eye(Bv, dtype=bool)[:, None, :, None]                  # (B,1,B,1)
    ok = (mask_b[:, :, None, :] != 0) & same                          # (B,R,B,C)
    return jnp.where(ok, 0.0, NEG).astype(jnp.float32).reshape(Bv * R, Bv * C)


def decoder_forward(x, encoder_output, src_mask, tgt_mask, params):
    """x:(B,S_TGT,D), encoder_output:(B,S_SRC,D),
       src_mask:(B,1,1,S_SRC), tgt_mask:(B,1,S_TGT,S_TGT)."""
    tgt_m = jnp.broadcast_to(tgt_mask, (B, 1, S_TGT, S_TGT))[:, 0]    # (B,St,St)
    src_m = jnp.broadcast_to(src_mask, (B, 1, S_TGT, S_SRC))[:, 0]    # (B,St,Ss)

    # additive biases, pre-tiled per head along the row axis
    sbias = jnp.tile(_fold_bias(tgt_m), (H, 1))                       # (H*M, M)
    cbias = jnp.tile(_fold_bias(src_m), (H, 1))                       # (H*M, N)

    packed = _pack_params(params)
    x2 = x.reshape(M, D)
    enc2 = encoder_output.reshape(N, D)

    # grid-less call: every operand is a whole-array (default) BlockSpec block
    # resident in VMEM; total footprint ~110 KiB.
    out = pl.pallas_call(
        decoder_kernel,
        out_shape=jax.ShapeDtypeStruct((M, D), x.dtype),
    )(x2, enc2, sbias, cbias, *packed)
    return out.reshape(B, S_TGT, D)


# ---------------------------------------------------------------------------
# pure-JAX reference (PyTorch-faithful math: per-head loop, masked_fill)
# ---------------------------------------------------------------------------
def _layer_norm_ref(v, alpha, beta):
    mean = jnp.mean(v, axis=-1, keepdims=True)
    var = jnp.sum((v - mean) ** 2, axis=-1, keepdims=True) / (D - 1)
    return alpha * (v - mean) / (jnp.sqrt(var) + EPS) + beta


def _mha_ref(q_in, kv_in, wq, wk, wv, wo, mask):
    q = q_in @ wq
    k = kv_in @ wk
    v = kv_in @ wv
    out = jnp.zeros((q_in.shape[0], D), jnp.float32)
    for h in range(H):
        sl = slice(h * DK, (h + 1) * DK)
        scores = (q[:, sl] @ k[:, sl].T) * SCALE
        scores = jnp.where(mask == 0, NEG, scores)
        p = jax.nn.softmax(scores, axis=-1)
        out = out + (p @ v[:, sl]) @ wo[sl, :]
    return out


def _decoder_ref_body(x, enc, tgt_mask, src_mask, p):
    for l in range(L):
        xn = _layer_norm_ref(x, p["ln_a"][l, 0], p["ln_b"][l, 0])
        x = x + _mha_ref(xn, xn, p["wq_s"][l], p["wk_s"][l], p["wv_s"][l],
                         p["wo_s"][l], tgt_mask)
        xn = _layer_norm_ref(x, p["ln_a"][l, 1], p["ln_b"][l, 1])
        x = x + _mha_ref(xn, enc, p["wq_c"][l], p["wk_c"][l], p["wv_c"][l],
                         p["wo_c"][l], src_mask)
        xn = _layer_norm_ref(x, p["ln_a"][l, 2], p["ln_b"][l, 2])
        h1 = jnp.maximum(xn @ p["w1"][l] + p["b1"][l], 0.0)
        x = x + h1 @ p["w2"][l] + p["b2"][l]
    return _layer_norm_ref(x, p["fin_a"][0], p["fin_b"][0])


def decoder_reference(x, encoder_output, src_mask, tgt_mask, params):
    tgt_m = jnp.broadcast_to(tgt_mask, (B, 1, S_TGT, S_TGT))[:, 0]
    src_m = jnp.broadcast_to(src_mask, (B, 1, S_TGT, S_SRC))[:, 0]
    with jax.default_matmul_precision("highest"):   # accurate f32 reference
        outs = [_decoder_ref_body(x[b], encoder_output[b], tgt_m[b], src_m[b],
                                  params) for b in range(B)]
    return jnp.stack(outs).astype(x.dtype)


# ---------------------------------------------------------------------------
# deterministic parameter init (synthetic — shapes follow the module __init__)
# ---------------------------------------------------------------------------
def init_params(key):
    ks = jax.random.split(key, 12)
    w = lambda k, shape: 0.1 * jax.random.normal(k, shape, jnp.float32)
    return dict(
        wq_s=w(ks[0], (L, D, D)), wk_s=w(ks[1], (L, D, D)),
        wv_s=w(ks[2], (L, D, D)), wo_s=w(ks[3], (L, D, D)),
        wq_c=w(ks[4], (L, D, D)), wk_c=w(ks[5], (L, D, D)),
        wv_c=w(ks[6], (L, D, D)), wo_c=w(ks[7], (L, D, D)),
        w1=w(ks[8], (L, D, DFF)), b1=w(ks[9], (L, 1, DFF)),
        w2=w(ks[10], (L, DFF, D)), b2=w(ks[11], (L, 1, D)),
        ln_a=jnp.ones((L, 3, D), jnp.float32),   # per-layer residual norms (alpha)
        ln_b=jnp.zeros((L, 3, D), jnp.float32),  # per-layer residual norms (bias)
        fin_a=jnp.ones((1, D), jnp.float32),     # final LayerNormalisation alpha
        fin_b=jnp.zeros((1, D), jnp.float32),    # final LayerNormalisation bias
    )


if __name__ == "__main__":
    key = jax.random.PRNGKey(0)
    k_x, k_e, k_p = jax.random.split(key, 3)

    x = jax.random.normal(k_x, (B, S_TGT, D), jnp.float32)
    encoder_output = jax.random.normal(k_e, (B, S_SRC, D), jnp.float32)
    src_mask = jnp.ones((B, 1, 1, S_SRC), jnp.float32)                 # no padding
    causal = jnp.tril(jnp.ones((S_TGT, S_TGT), jnp.float32))
    tgt_mask = jnp.broadcast_to(causal, (B, 1, S_TGT, S_TGT))          # causal

    params = init_params(k_p)

    out = jax.block_until_ready(
        decoder_forward(x, encoder_output, src_mask, tgt_mask, params))
    assert out.shape == (B, S_TGT, D)

    ref = jax.block_until_ready(
        decoder_reference(x, encoder_output, src_mask, tgt_mask, params))

    # Kernel elementwise math is exact (no approx reciprocals). The remaining
    # difference vs the highest-precision reference comes only from the TPU's
    # default f32-matmul precision (bf16 MXU passes) in whichever engine runs
    # the kernel's dots; worst case ~1e-2, while real bugs are O(0.1+).
    err = float(jnp.max(jnp.abs(out - ref)))
    assert err < 2.5e-2, f"mismatch vs pure-JAX reference: max abs err = {err}"

    print("KERNEL_OK")
</pallas_src>

<mosaic_0001>
module attributes {stable_mosaic.version = 11 : i64} {
  func.func @decoder_kernel(%arg0: memref<16x32xf32, #tpu.memory_space<vmem>>, %arg1: memref<16x32xf32, #tpu.memory_space<vmem>>, %arg2: memref<64x16xf32, #tpu.memory_space<vmem>>, %arg3: memref<64x16xf32, #tpu.memory_space<vmem>>, %arg4: memref<2x32x96xf32, #tpu.memory_space<vmem>>, %arg5: memref<2x32x32xf32, #tpu.memory_space<vmem>>, %arg6: memref<2x32x64xf32, #tpu.memory_space<vmem>>, %arg7: memref<4x32x32xf32, #tpu.memory_space<vmem>>, %arg8: memref<2x32x64xf32, #tpu.memory_space<vmem>>, %arg9: memref<2x64x32xf32, #tpu.memory_space<vmem>>, %arg10: memref<2x1x64xf32, #tpu.memory_space<vmem>>, %arg11: memref<2x1x32xf32, #tpu.memory_space<vmem>>, %arg12: memref<7x1x32xf32, #tpu.memory_space<vmem>>, %arg13: memref<7x1x32xf32, #tpu.memory_space<vmem>>, %arg14: memref<16x32xf32, #tpu.memory_space<vmem>>) attributes {dimension_semantics = [], scalar_prefetch = 0 : i64, scratch_operands = 0 : i64, tpu.core_type = #tpu.core_type<tc>} {
    %c0 = arith.constant 0 : index
    %c0_0 = arith.constant 0 : index
    %0 = vector.load %arg0[%c0, %c0_0] : memref<16x32xf32, #tpu.memory_space<vmem>>, vector<16x32xf32>
    %c0_1 = arith.constant 0 : index
    %c0_2 = arith.constant 0 : index
    %1 = vector.load %arg1[%c0_1, %c0_2] : memref<16x32xf32, #tpu.memory_space<vmem>>, vector<16x32xf32>
    %c0_3 = arith.constant 0 : index
    %c0_4 = arith.constant 0 : index
    %2 = vector.load %arg2[%c0_3, %c0_4] : memref<64x16xf32, #tpu.memory_space<vmem>>, vector<64x16xf32>
    %c0_5 = arith.constant 0 : index
    %c0_6 = arith.constant 0 : index
    %3 = vector.load %arg3[%c0_5, %c0_6] : memref<64x16xf32, #tpu.memory_space<vmem>>, vector<64x16xf32>
    %c0_7 = arith.constant 0 : index
    %c0_8 = arith.constant 0 : index
    %c0_9 = arith.constant 0 : index
    %4 = vector.load %arg12[%c0_7, %c0_8, %c0_9] : memref<7x1x32xf32, #tpu.memory_space<vmem>>, vector<1x1x32xf32>
    %5 = vector.shape_cast %4 : vector<1x1x32xf32> to vector<1x32xf32>
    %c0_10 = arith.constant 0 : index
    %c0_11 = arith.constant 0 : index
    %c0_12 = arith.constant 0 : index
    %6 = vector.load %arg13[%c0_10, %c0_11, %c0_12] : memref<7x1x32xf32, #tpu.memory_space<vmem>>, vector<1x1x32xf32>
    %7 = vector.shape_cast %6 : vector<1x1x32xf32> to vector<1x32xf32>
    %cst = arith.constant dense<0.000000e+00> : vector<16xf32>
    %8 = vector.multi_reduction <add>, %0, %cst [1] : vector<16x32xf32> to vector<16xf32>
    %9 = vector.shape_cast %8 : vector<16xf32> to vector<16x1xf32>
    %cst_13 = arith.constant 3.200000e+01 : f32
    %10 = vector.broadcast %cst_13 : f32 to vector<16x1xf32>
    %11 = arith.divf %9, %10 : vector<16x1xf32>
    %12 = vector.broadcast %11 : vector<16x1xf32> to vector<16x32xf32>
    %13 = arith.subf %0, %12 : vector<16x32xf32>
    %14 = arith.mulf %13, %13 : vector<16x32xf32>
    %cst_14 = arith.constant dense<0.000000e+00> : vector<16xf32>
    %15 = vector.multi_reduction <add>, %14, %cst_14 [1] : vector<16x32xf32> to vector<16xf32>
    %16 = vector.shape_cast %15 : vector<16xf32> to vector<16x1xf32>
    %cst_15 = arith.constant 0.0322580636 : f32
    %17 = vector.broadcast %cst_15 : f32 to vector<16x1xf32>
    %18 = arith.mulf %16, %17 : vector<16x1xf32>
    %19 = vector.broadcast %11 : vector<16x1xf32> to vector<16x32xf32>
    %20 = arith.subf %0, %19 : vector<16x32xf32>
    %21 = vector.broadcast %5 : vector<1x32xf32> to vector<16x32xf32>
    %22 = arith.mulf %21, %20 : vector<16x32xf32>
    %23 = math.sqrt %18 : vector<16x1xf32>
    %cst_16 = arith.constant 9.99999997E-7 : f32
    %24 = vector.broadcast %cst_16 : f32 to vector<16x1xf32>
    %25 = arith.addf %23, %24 : vector<16x1xf32>
    %26 = vector.broadcast %25 : vector<16x1xf32> to vector<16x32xf32>
    %27 = arith.divf %22, %26 : vector<16x32xf32>
    %28 = vector.broadcast %7 : vector<1x32xf32> to vector<16x32xf32>
    %29 = arith.addf %27, %28 : vector<16x32xf32>
    %c0_17 = arith.constant 0 : index
    %c0_18 = arith.constant 0 : index
    %c0_19 = arith.constant 0 : index
    %30 = vector.load %arg4[%c0_17, %c0_18, %c0_19] : memref<2x32x96xf32, #tpu.memory_space<vmem>>, vector<1x32x96xf32>
    %31 = vector.shape_cast %30 : vector<1x32x96xf32> to vector<32x96xf32>
    %cst_20 = arith.constant dense<0.000000e+00> : vector<16x96xf32>
    %32 = tpu.matmul %29, %31, %cst_20 {dimension_numbers = #tpu.dot_dimension_numbers<[1], [0], [0], [1], [0, 0, 1, 1], [], []>} : vector<16x32xf32>, vector<32x96xf32>, vector<16x96xf32> -> vector<16x96xf32>
    %33 = vector.extract_strided_slice %32 {offsets = [0, 0], sizes = [16, 32], strides = [1, 1]} : vector<16x96xf32> to vector<16x32xf32>
    %34 = vector.extract_strided_slice %32 {offsets = [0, 32], sizes = [16, 32], strides = [1, 1]} : vector<16x96xf32> to vector<16x32xf32>
    %35 = vector.extract_strided_slice %32 {offsets = [0, 64], sizes = [16, 32], strides = [1, 1]} : vector<16x96xf32> to vector<16x32xf32>
    %c0_21 = arith.constant 0 : index
    %c0_22 = arith.constant 0 : index
    %c0_23 = arith.constant 0 : index
    %36 = vector.load %arg7[%c0_21, %c0_22, %c0_23] : memref<4x32x32xf32, #tpu.memory_space<vmem>>, vector<1x32x32xf32>
    %37 = vector.shape_cast %36 : vector<1x32x32xf32> to vector<32x32xf32>
    %38 = vector.extract_strided_slice %33 {offsets = [0, 0], sizes = [16, 8], strides = [1, 1]} : vector<16x32xf32> to vector<16x8xf32>
    %39 = vector.extract_strided_slice %34 {offsets = [0, 0], sizes = [16, 8], strides = [1, 1]} : vector<16x32xf32> to vector<16x8xf32>
    %cst_24 = arith.constant dense<0.000000e+00> : vector<16x16xf32>
    %40 = tpu.matmul %38, %39, %cst_24 {dimension_numbers = #tpu.dot_dimension_numbers<[1], [1], [0], [0], [0, 0, 1, 0], [], []>} : vector<16x8xf32>, vector<16x8xf32>, vector<16x16xf32> -> vector<16x16xf32>
    %41 = vector.extract_strided_slice %33 {offsets = [0, 8], sizes = [16, 8], strides = [1, 1]} : vector<16x32xf32> to vector<16x8xf32>
    %42 = vector.extract_strided_slice %34 {offsets = [0, 8], sizes = [16, 8], strides = [1, 1]} : vector<16x32xf32> to vector<16x8xf32>
    %cst_25 = arith.constant dense<0.000000e+00> : vector<16x16xf32>
    %43 = tpu.matmul %41, %42, %cst_25 {dimension_numbers = #tpu.dot_dimension_numbers<[1], [1], [0], [0], [0, 0, 1, 0], [], []>} : vector<16x8xf32>, vector<16x8xf32>, vector<16x16xf32> -> vector<16x16xf32>
    %44 = vector.extract_strided_slice %33 {offsets = [0, 16], sizes = [16, 8], strides = [1, 1]} : vector<16x32xf32> to vector<16x8xf32>
    %45 = vector.extract_strided_slice %34 {offsets = [0, 16], sizes = [16, 8], strides = [1, 1]} : vector<16x32xf32> to vector<16x8xf32>
    %cst_26 = arith.constant dense<0.000000e+00> : vector<16x16xf32>
    %46 = tpu.matmul %44, %45, %cst_26 {dimension_numbers = #tpu.dot_dimension_numbers<[1], [1], [0], [0], [0, 0, 1, 0], [], []>} : vector<16x8xf32>, vector<16x8xf32>, vector<16x16xf32> -> vector<16x16xf32>
    %47 = vector.extract_strided_slice %33 {offsets = [0, 24], sizes = [16, 8], strides = [1, 1]} : vector<16x32xf32> to vector<16x8xf32>
    %48 = vector.extract_strided_slice %34 {offsets = [0, 24], sizes = [16, 8], strides = [1, 1]} : vector<16x32xf32> to vector<16x8xf32>
    %cst_27 = arith.constant dense<0.000000e+00> : vector<16x16xf32>
    %49 = tpu.matmul %47, %48, %cst_27 {dimension_numbers = #tpu.dot_dimension_numbers<[1], [1], [0], [0], [0, 0, 1, 0], [], []>} : vector<16x8xf32>, vector<16x8xf32>, vector<16x16xf32> -> vector<16x16xf32>
    %50 = tpu.concatenate %40, %43, %46, %49 in 0 : vector<16x16xf32>, vector<16x16xf32>, vector<16x16xf32>, vector<16x16xf32> -> vector<64x16xf32>
    %cst_28 = arith.constant 0.353553385 : f32
    %51 = vector.broadcast %cst_28 : f32 to vector<64x16xf32>
    %52 = arith.mulf %50, %51 : vector<64x16xf32>
    %53 = arith.addf %52, %2 : vector<64x16xf32>
    %cst_29 = arith.constant dense<0xFF800000> : vector<64xf32>
    %54 = vector.multi_reduction <maximumf>, %53, %cst_29 [1] : vector<64x16xf32> to vector<64xf32>
    %55 = vector.shape_cast %54 : vector<64xf32> to vector<64x1xf32>
    %56 = vector.broadcast %55 : vector<64x1xf32> to vector<64x16xf32>
    %57 = arith.subf %53, %56 : vector<64x16xf32>
    %58 = math.exp %57 : vector<64x16xf32>
    %cst_30 = arith.constant dense<0.000000e+00> : vector<64xf32>
    %59 = vector.multi_reduction <add>, %58, %cst_30 [1] : vector<64x16xf32> to vector<64xf32>
    %60 = vector.shape_cast %59 : vector<64xf32> to vector<64x1xf32>
    %61 = vector.broadcast %60 : vector<64x1xf32> to vector<64x16xf32>
    %62 = arith.divf %58, %61 : vector<64x16xf32>
    %63 = vector.extract_strided_slice %62 {offsets = [0, 0], sizes = [16, 16], strides = [1, 1]} : vector<64x16xf32> to vector<16x16xf32>
    %64 = vector.extract_strided_slice %35 {offsets = [0, 0], sizes = [16, 8], strides = [1, 1]} : vector<16x32xf32> to vector<16x8xf32>
    %cst_31 = arith.constant dense<0.000000e+00> : vector<16x8xf32>
    %65 = tpu.matmul %63, %64, %cst_31 {dimension_numbers = #tpu.dot_dimension_numbers<[1], [0], [0], [1], [0, 0, 1, 1], [], []>} : vector<16x16xf32>, vector<16x8xf32>, vector<16x8xf32> -> vector<16x8xf32>
    %66 = vector.extract_strided_slice %62 {offsets = [16, 0], sizes = [16, 16], strides = [1, 1]} : vector<64x16xf32> to vector<16x16xf32>
    %67 = vector.extract_strided_slice %35 {offsets = [0, 8], sizes = [16, 8], strides = [1, 1]} : vector<16x32xf32> to vector<16x8xf32>
    %cst_32 = arith.constant dense<0.000000e+00> : vector<16x8xf32>
    %68 = tpu.matmul %66, %67, %cst_32 {dimension_numbers = #tpu.dot_dimension_numbers<[1], [0], [0], [1], [0, 0, 1, 1], [], []>} : vector<16x16xf32>, vector<16x8xf32>, vector<16x8xf32> -> vector<16x8xf32>
    %69 = vector.extract_strided_slice %62 {offsets = [32, 0], sizes = [16, 16], strides = [1, 1]} : vector<64x16xf32> to vector<16x16xf32>
    %70 = vector.extract_strided_slice %35 {offsets = [0, 16], sizes = [16, 8], strides = [1, 1]} : vector<16x32xf32> to vector<16x8xf32>
    %cst_33 = arith.constant dense<0.000000e+00> : vector<16x8xf32>
    %71 = tpu.matmul %69, %70, %cst_33 {dimension_numbers = #tpu.dot_dimension_numbers<[1], [0], [0], [1], [0, 0, 1, 1], [], []>} : vector<16x16xf32>, vector<16x8xf32>, vector<16x8xf32> -> vector<16x8xf32>
    %72 = vector.extract_strided_slice %62 {offsets = [48, 0], sizes = [16, 16], strides = [1, 1]} : vector<64x16xf32> to vector<16x16xf32>
    %73 = vector.extract_strided_slice %35 {offsets = [0, 24], sizes = [16, 8], strides = [1, 1]} : vector<16x32xf32> to vector<16x8xf32>
    %cst_34 = arith.constant dense<0.000000e+00> : vector<16x8xf32>
    %74 = tpu.matmul %72, %73, %cst_34 {dimension_numbers = #tpu.dot_dimension_numbers<[1], [0], [0], [1], [0, 0, 1, 1], [], []>} : vector<16x16xf32>, vector<16x8xf32>, vector<16x8xf32> -> vector<16x8xf32>
    %75 = tpu.concatenate %65, %68, %71, %74 in 1 : vector<16x8xf32>, vector<16x8xf32>, vector<16x8xf32>, vector<16x8xf32> -> vector<16x32xf32>
    %cst_35 = arith.constant dense<0.000000e+00> : vector<16x32xf32>
    %76 = tpu.matmul %75, %37, %cst_35 {dimension_numbers = #tpu.dot_dimension_numbers<[1], [0], [0], [1], [0, 0, 1, 1], [], []>} : vector<16x32xf32>, vector<32x32xf32>, vector<16x32xf32> -> vector<16x32xf32>
    %77 = arith.addf %0, %76 : vector<16x32xf32>
    %c1 = arith.constant 1 : index
    %c0_36 = arith.constant 0 : index
    %c0_37 = arith.constant 0 : index
    %78 = vector.load %arg12[%c1, %c0_36, %c0_37] : memref<7x1x32xf32, #tpu.memory_space<vmem>>, vector<1x1x32xf32>
    %79 = vector.shape_cast %78 : vector<1x1x32xf32> to vector<1x32xf32>
    %c1_38 = arith.constant 1 : index
    %c0_39 = arith.constant 0 : index
    %c0_40 = arith.constant 0 : index
    %80 = vector.load %arg13[%c1_38, %c0_39, %c0_40] : memref<7x1x32xf32, #tpu.memory_space<vmem>>, vector<1x1x32xf32>
    %81 = vector.shape_cast %80 : vector<1x1x32xf32> to vector<1x32xf32>
    %cst_41 = arith.constant dense<0.000000e+00> : vector<16xf32>
    %82 = vector.multi_reduction <add>, %77, %cst_41 [1] : vector<16x32xf32> to vector<16xf32>
    %83 = vector.shape_cast %82 : vector<16xf32> to vector<16x1xf32>
    %cst_42 = arith.constant 3.200000e+01 : f32
    %84 = vector.broadcast %cst_42 : f32 to vector<16x1xf32>
    %85 = arith.divf %83, %84 : vector<16x1xf32>
    %86 = vector.broadcast %85 : vector<16x1xf32> to vector<16x32xf32>
    %87 = arith.subf %77, %86 : vector<16x32xf32>
    %88 = arith.mulf %87, %87 : vector<16x32xf32>
    %cst_43 = arith.constant dense<0.000000e+00> : vector<16xf32>
    %89 = vector.multi_reduction <add>, %88, %cst_43 [1] : vector<16x32xf32> to vector<16xf32>
    %90 = vector.shape_cast %89 : vector<16xf32> to vector<16x1xf32>
    %cst_44 = arith.constant 0.0322580636 : f32
    %91 = vector.broadcast %cst_44 : f32 to vector<16x1xf32>
    %92 = arith.mulf %90, %91 : vector<16x1xf32>
    %93 = vector.broadcast %85 : vector<16x1xf32> to vector<16x32xf32>
    %94 = arith.subf %77, %93 : vector<16x32xf32>
    %95 = vector.broadcast %79 : vector<1x32xf32> to vector<16x32xf32>
    %96 = arith.mulf %95, %94 : vector<16x32xf32>
    %97 = math.sqrt %92 : vector<16x1xf32>
    %cst_45 = arith.constant 9.99999997E-7 : f32
    %98 = vector.broadcast %cst_45 : f32 to vector<16x1xf32>
    %99 = arith.addf %97, %98 : vector<16x1xf32>
    %100 = vector.broadcast %99 : vector<16x1xf32> to vector<16x32xf32>
    %101 = arith.divf %96, %100 : vector<16x32xf32>
    %102 = vector.broadcast %81 : vector<1x32xf32> to vector<16x32xf32>
    %103 = arith.addf %101, %102 : vector<16x32xf32>
    %c0_46 = arith.constant 0 : index
    %c0_47 = arith.constant 0 : index
    %c0_48 = arith.constant 0 : index
    %104 = vector.load %arg5[%c0_46, %c0_47, %c0_48] : memref<2x32x32xf32, #tpu.memory_space<vmem>>, vector<1x32x32xf32>
    %105 = vector.shape_cast %104 : vector<1x32x32xf32> to vector<32x32xf32>
    %cst_49 = arith.constant dense<0.000000e+00> : vector<16x32xf32>
    %106 = tpu.matmul %103, %105, %cst_49 {dimension_numbers = #tpu.dot_dimension_numbers<[1], [0], [0], [1], [0, 0, 1, 1], [], []>} : vector<16x32xf32>, vector<32x32xf32>, vector<16x32xf32> -> vector<16x32xf32>
    %c0_50 = arith.constant 0 : index
    %c0_51 = arith.constant 0 : index
    %c0_52 = arith.constant 0 : index
    %107 = vector.load %arg6[%c0_50, %c0_51, %c0_52] : memref<2x32x64xf32, #tpu.memory_space<vmem>>, vector<1x32x64xf32>
    %108 = vector.shape_cast %107 : vector<1x32x64xf32> to vector<32x64xf32>
    %cst_53 = arith.constant dense<0.000000e+00> : vector<16x64xf32>
    %109 = tpu.matmul %1, %108, %cst_53 {dimension_numbers = #tpu.dot_dimension_numbers<[1], [0], [0], [1], [0, 0, 1, 1], [], []>} : vector<16x32xf32>, vector<32x64xf32>, vector<16x64xf32> -> vector<16x64xf32>
    %110 = vector.extract_strided_slice %109 {offsets = [0, 0], sizes = [16, 32], strides = [1, 1]} : vector<16x64xf32> to vector<16x32xf32>
    %111 = vector.extract_strided_slice %109 {offsets = [0, 32], sizes = [16, 32], strides = [1, 1]} : vector<16x64xf32> to vector<16x32xf32>
    %c2 = arith.constant 2 : index
    %c0_54 = arith.constant 0 : index
    %c0_55 = arith.constant 0 : index
    %112 = vector.load %arg7[%c2, %c0_54, %c0_55] : memref<4x32x32xf32, #tpu.memory_space<vmem>>, vector<1x32x32xf32>
    %113 = vector.shape_cast %112 : vector<1x32x32xf32> to vector<32x32xf32>
    %114 = vector.extract_strided_slice %106 {offsets = [0, 0], sizes = [16, 8], strides = [1, 1]} : vector<16x32xf32> to vector<16x8xf32>
    %115 = vector.extract_strided_slice %110 {offsets = [0, 0], sizes = [16, 8], strides = [1, 1]} : vector<16x32xf32> to vector<16x8xf32>
    %cst_56 = arith.constant dense<0.000000e+00> : vector<16x16xf32>
    %116 = tpu.matmul %114, %115, %cst_56 {dimension_numbers = #tpu.dot_dimension_numbers<[1], [1], [0], [0], [0, 0, 1, 0], [], []>} : vector<16x8xf32>, vector<16x8xf32>, vector<16x16xf32> -> vector<16x16xf32>
    %117 = vector.extract_strided_slice %106 {offsets = [0, 8], sizes = [16, 8], strides = [1, 1]} : vector<16x32xf32> to vector<16x8xf32>
    %118 = vector.extract_strided_slice %110 {offsets = [0, 8], sizes = [16, 8], strides = [1, 1]} : vector<16x32xf32> to vector<16x8xf32>
    %cst_57 = arith.constant dense<0.000000e+00> : vector<16x16xf32>
    %119 = tpu.matmul %117, %118, %cst_57 {dimension_numbers = #tpu.dot_dimension_numbers<[1], [1], [0], [0], [0, 0, 1, 0], [], []>} : vector<16x8xf32>, vector<16x8xf32>, vector<16x16xf32> -> vector<16x16xf32>
    %120 = vector.extract_strided_slice %106 {offsets = [0, 16], sizes = [16, 8], strides = [1, 1]} : vector<16x32xf32> to vector<16x8xf32>
    %121 = vector.extract_strided_slice %110 {offsets = [0, 16], sizes = [16, 8], strides = [1, 1]} : vector<16x32xf32> to vector<16x8xf32>
    %cst_58 = arith.constant dense<0.000000e+00> : vector<16x16xf32>
    %122 = tpu.matmul %120, %121, %cst_58 {dimension_numbers = #tpu.dot_dimension_numbers<[1], [1], [0], [0], [0, 0, 1, 0], [], []>} : vector<16x8xf32>, vector<16x8xf32>, vector<16x16xf32> -> vector<16x16xf32>
    %123 = vector.extract_strided_slice %106 {offsets = [0, 24], sizes = [16, 8], strides = [1, 1]} : vector<16x32xf32> to vector<16x8xf32>
    %124 = vector.extract_strided_slice %110 {offsets = [0, 24], sizes = [16, 8], strides = [1, 1]} : vector<16x32xf32> to vector<16x8xf32>
    %cst_59 = arith.constant dense<0.000000e+00> : vector<16x16xf32>
    %125 = tpu.matmul %123, %124, %cst_59 {dimension_numbers = #tpu.dot_dimension_numbers<[1], [1], [0], [0], [0, 0, 1, 0], [], []>} : vector<16x8xf32>, vector<16x8xf32>, vector<16x16xf32> -> vector<16x16xf32>
    %126 = tpu.concatenate %116, %119, %122, %125 in 0 : vector<16x16xf32>, vector<16x16xf32>, vector<16x16xf32>, vector<16x16xf32> -> vector<64x16xf32>
    %cst_60 = arith.constant 0.353553385 : f32
    %127 = vector.broadcast %cst_60 : f32 to vector<64x16xf32>
    %128 = arith.mulf %126, %127 : vector<64x16xf32>
    %129 = arith.addf %128, %3 : vector<64x16xf32>
    %cst_61 = arith.constant dense<0xFF800000> : vector<64xf32>
    %130 = vector.multi_reduction <maximumf>, %129, %cst_61 [1] : vector<64x16xf32> to vector<64xf32>
    %131 = vector.shape_cast %130 : vector<64xf32> to vector<64x1xf32>
    %132 = vector.broadcast %131 : vector<64x1xf32> to vector<64x16xf32>
    %133 = arith.subf %129, %132 : vector<64x16xf32>
    %134 = math.exp %133 : vector<64x16xf32>
    %cst_62 = arith.constant dense<0.000000e+00> : vector<64xf32>
    %135 = vector.multi_reduction <add>, %134, %cst_62 [1] : vector<64x16xf32> to vector<64xf32>
    %136 = vector.shape_cast %135 : vector<64xf32> to vector<64x1xf32>
    %137 = vector.broadcast %136 : vector<64x1xf32> to vector<64x16xf32>
    %138 = arith.divf %134, %137 : vector<64x16xf32>
    %139 = vector.extract_strided_slice %138 {offsets = [0, 0], sizes = [16, 16], strides = [1, 1]} : vector<64x16xf32> to vector<16x16xf32>
    %140 = vector.extract_strided_slice %111 {offsets = [0, 0], sizes = [16, 8], strides = [1, 1]} : vector<16x32xf32> to vector<16x8xf32>
    %cst_63 = arith.constant dense<0.000000e+00> : vector<16x8xf32>
    %141 = tpu.matmul %139, %140, %cst_63 {dimension_numbers = #tpu.dot_dimension_numbers<[1], [0], [0], [1], [0, 0, 1, 1], [], []>} : vector<16x16xf32>, vector<16x8xf32>, vector<16x8xf32> -> vector<16x8xf32>
    %142 = vector.extract_strided_slice %138 {offsets = [16, 0], sizes = [16, 16], strides = [1, 1]} : vector<64x16xf32> to vector<16x16xf32>
    %143 = vector.extract_strided_slice %111 {offsets = [0, 8], sizes = [16, 8], strides = [1, 1]} : vector<16x32xf32> to vector<16x8xf32>
    %cst_64 = arith.constant dense<0.000000e+00> : vector<16x8xf32>
    %144 = tpu.matmul %142, %143, %cst_64 {dimension_numbers = #tpu.dot_dimension_numbers<[1], [0], [0], [1], [0, 0, 1, 1], [], []>} : vector<16x16xf32>, vector<16x8xf32>, vector<16x8xf32> -> vector<16x8xf32>
    %145 = vector.extract_strided_slice %138 {offsets = [32, 0], sizes = [16, 16], strides = [1, 1]} : vector<64x16xf32> to vector<16x16xf32>
    %146 = vector.extract_strided_slice %111 {offsets = [0, 16], sizes = [16, 8], strides = [1, 1]} : vector<16x32xf32> to vector<16x8xf32>
    %cst_65 = arith.constant dense<0.000000e+00> : vector<16x8xf32>
    %147 = tpu.matmul %145, %146, %cst_65 {dimension_numbers = #tpu.dot_dimension_numbers<[1], [0], [0], [1], [0, 0, 1, 1], [], []>} : vector<16x16xf32>, vector<16x8xf32>, vector<16x8xf32> -> vector<16x8xf32>
    %148 = vector.extract_strided_slice %138 {offsets = [48, 0], sizes = [16, 16], strides = [1, 1]} : vector<64x16xf32> to vector<16x16xf32>
    %149 = vector.extract_strided_slice %111 {offsets = [0, 24], sizes = [16, 8], strides = [1, 1]} : vector<16x32xf32> to vector<16x8xf32>
    %cst_66 = arith.constant dense<0.000000e+00> : vector<16x8xf32>
    %150 = tpu.matmul %148, %149, %cst_66 {dimension_numbers = #tpu.dot_dimension_numbers<[1], [0], [0], [1], [0, 0, 1, 1], [], []>} : vector<16x16xf32>, vector<16x8xf32>, vector<16x8xf32> -> vector<16x8xf32>
    %151 = tpu.concatenate %141, %144, %147, %150 in 1 : vector<16x8xf32>, vector<16x8xf32>, vector<16x8xf32>, vector<16x8xf32> -> vector<16x32xf32>
    %cst_67 = arith.constant dense<0.000000e+00> : vector<16x32xf32>
    %152 = tpu.matmul %151, %113, %cst_67 {dimension_numbers = #tpu.dot_dimension_numbers<[1], [0], [0], [1], [0, 0, 1, 1], [], []>} : vector<16x32xf32>, vector<32x32xf32>, vector<16x32xf32> -> vector<16x32xf32>
    %153 = arith.addf %77, %152 : vector<16x32xf32>
    %c2_68 = arith.constant 2 : index
    %c0_69 = arith.constant 0 : index
    %c0_70 = arith.constant 0 : index
    %154 = vector.load %arg12[%c2_68, %c0_69, %c0_70] : memref<7x1x32xf32, #tpu.memory_space<vmem>>, vector<1x1x32xf32>
    %155 = vector.shape_cast %154 : vector<1x1x32xf32> to vector<1x32xf32>
    %c2_71 = arith.constant 2 : index
    %c0_72 = arith.constant 0 : index
    %c0_73 = arith.constant 0 : index
    %156 = vector.load %arg13[%c2_71, %c0_72, %c0_73] : memref<7x1x32xf32, #tpu.memory_space<vmem>>, vector<1x1x32xf32>
    %157 = vector.shape_cast %156 : vector<1x1x32xf32> to vector<1x32xf32>
    %cst_74 = arith.constant dense<0.000000e+00> : vector<16xf32>
    %158 = vector.multi_reduction <add>, %153, %cst_74 [1] : vector<16x32xf32> to vector<16xf32>
    %159 = vector.shape_cast %158 : vector<16xf32> to vector<16x1xf32>
    %cst_75 = arith.constant 3.200000e+01 : f32
    %160 = vector.broadcast %cst_75 : f32 to vector<16x1xf32>
    %161 = arith.divf %159, %160 : vector<16x1xf32>
    %162 = vector.broadcast %161 : vector<16x1xf32> to vector<16x32xf32>
    %163 = arith.subf %153, %162 : vector<16x32xf32>
    %164 = arith.mulf %163, %163 : vector<16x32xf32>
    %cst_76 = arith.constant dense<0.000000e+00> : vector<16xf32>
    %165 = vector.multi_reduction <add>, %164, %cst_76 [1] : vector<16x32xf32> to vector<16xf32>
    %166 = vector.shape_cast %165 : vector<16xf32> to vector<16x1xf32>
    %cst_77 = arith.constant 0.0322580636 : f32
    %167 = vector.broadcast %cst_77 : f32 to vector<16x1xf32>
    %168 = arith.mulf %166, %167 : vector<16x1xf32>
    %169 = vector.broadcast %161 : vector<16x1xf32> to vector<16x32xf32>
    %170 = arith.subf %153, %169 : vector<16x32xf32>
    %171 = vector.broadcast %155 : vector<1x32xf32> to vector<16x32xf32>
    %172 = arith.mulf %171, %170 : vector<16x32xf32>
    %173 = math.sqrt %168 : vector<16x1xf32>
    %cst_78 = arith.constant 9.99999997E-7 : f32
    %174 = vector.broadcast %cst_78 : f32 to vector<16x1xf32>
    %175 = arith.addf %173, %174 : vector<16x1xf32>
    %176 = vector.broadcast %175 : vector<16x1xf32> to vector<16x32xf32>
    %177 = arith.divf %172, %176 : vector<16x32xf32>
    %178 = vector.broadcast %157 : vector<1x32xf32> to vector<16x32xf32>
    %179 = arith.addf %177, %178 : vector<16x32xf32>
    %c0_79 = arith.constant 0 : index
    %c0_80 = arith.constant 0 : index
    %c0_81 = arith.constant 0 : index
    %180 = vector.load %arg8[%c0_79, %c0_80, %c0_81] : memref<2x32x64xf32, #tpu.memory_space<vmem>>, vector<1x32x64xf32>
    %181 = vector.shape_cast %180 : vector<1x32x64xf32> to vector<32x64xf32>
    %cst_82 = arith.constant dense<0.000000e+00> : vector<16x64xf32>
    %182 = tpu.matmul %179, %181, %cst_82 {dimension_numbers = #tpu.dot_dimension_numbers<[1], [0], [0], [1], [0, 0, 1, 1], [], []>} : vector<16x32xf32>, vector<32x64xf32>, vector<16x64xf32> -> vector<16x64xf32>
    %c0_83 = arith.constant 0 : index
    %c0_84 = arith.constant 0 : index
    %c0_85 = arith.constant 0 : index
    %183 = vector.load %arg10[%c0_83, %c0_84, %c0_85] : memref<2x1x64xf32, #tpu.memory_space<vmem>>, vector<1x1x64xf32>
    %184 = vector.shape_cast %183 : vector<1x1x64xf32> to vector<1x64xf32>
    %185 = vector.broadcast %184 : vector<1x64xf32> to vector<16x64xf32>
    %186 = arith.addf %182, %185 : vector<16x64xf32>
    %cst_86 = arith.constant 0.000000e+00 : f32
    %187 = vector.broadcast %cst_86 : f32 to vector<16x64xf32>
    %188 = arith.maximumf %186, %187 : vector<16x64xf32>
    %c0_87 = arith.constant 0 : index
    %c0_88 = arith.constant 0 : index
    %c0_89 = arith.constant 0 : index
    %189 = vector.load %arg9[%c0_87, %c0_88, %c0_89] : memref<2x64x32xf32, #tpu.memory_space<vmem>>, vector<1x64x32xf32>
    %190 = vector.shape_cast %189 : vector<1x64x32xf32> to vector<64x32xf32>
    %cst_90 = arith.constant dense<0.000000e+00> : vector<16x32xf32>
    %191 = tpu.matmul %188, %190, %cst_90 {dimension_numbers = #tpu.dot_dimension_numbers<[1], [0], [0], [1], [0, 0, 1, 1], [], []>} : vector<16x64xf32>, vector<64x32xf32>, vector<16x32xf32> -> vector<16x32xf32>
    %192 = arith.addf %153, %191 : vector<16x32xf32>
    %c0_91 = arith.constant 0 : index
    %c0_92 = arith.constant 0 : index
    %c0_93 = arith.constant 0 : index
    %193 = vector.load %arg11[%c0_91, %c0_92, %c0_93] : memref<2x1x32xf32, #tpu.memory_space<vmem>>, vector<1x1x32xf32>
    %194 = vector.shape_cast %193 : vector<1x1x32xf32> to vector<1x32xf32>
    %195 = vector.broadcast %194 : vector<1x32xf32> to vector<16x32xf32>
    %196 = arith.addf %192, %195 : vector<16x32xf32>
    %c3 = arith.constant 3 : index
    %c0_94 = arith.constant 0 : index
    %c0_95 = arith.constant 0 : index
    %197 = vector.load %arg12[%c3, %c0_94, %c0_95] : memref<7x1x32xf32, #tpu.memory_space<vmem>>, vector<1x1x32xf32>
    %198 = vector.shape_cast %197 : vector<1x1x32xf32> to vector<1x32xf32>
    %c3_96 = arith.constant 3 : index
    %c0_97 = arith.constant 0 : index
    %c0_98 = arith.constant 0 : index
    %199 = vector.load %arg13[%c3_96, %c0_97, %c0_98] : memref<7x1x32xf32, #tpu.memory_space<vmem>>, vector<1x1x32xf32>
    %200 = vector.shape_cast %199 : vector<1x1x32xf32> to vector<1x32xf32>
    %cst_99 = arith.constant dense<0.000000e+00> : vector<16xf32>
    %201 = vector.multi_reduction <add>, %196, %cst_99 [1] : vector<16x32xf32> to vector<16xf32>
    %202 = vector.shape_cast %201 : vector<16xf32> to vector<16x1xf32>
    %cst_100 = arith.constant 3.200000e+01 : f32
    %203 = vector.broadcast %cst_100 : f32 to vector<16x1xf32>
    %204 = arith.divf %202, %203 : vector<16x1xf32>
    %205 = vector.broadcast %204 : vector<16x1xf32> to vector<16x32xf32>
    %206 = arith.subf %196, %205 : vector<16x32xf32>
    %207 = arith.mulf %206, %206 : vector<16x32xf32>
    %cst_101 = arith.constant dense<0.000000e+00> : vector<16xf32>
    %208 = vector.multi_reduction <add>, %207, %cst_101 [1] : vector<16x32xf32> to vector<16xf32>
    %209 = vector.shape_cast %208 : vector<16xf32> to vector<16x1xf32>
    %cst_102 = arith.constant 0.0322580636 : f32
    %210 = vector.broadcast %cst_102 : f32 to vector<16x1xf32>
    %211 = arith.mulf %209, %210 : vector<16x1xf32>
    %212 = vector.broadcast %204 : vector<16x1xf32> to vector<16x32xf32>
    %213 = arith.subf %196, %212 : vector<16x32xf32>
    %214 = vector.broadcast %198 : vector<1x32xf32> to vector<16x32xf32>
    %215 = arith.mulf %214, %213 : vector<16x32xf32>
    %216 = math.sqrt %211 : vector<16x1xf32>
    %cst_103 = arith.constant 9.99999997E-7 : f32
    %217 = vector.broadcast %cst_103 : f32 to vector<16x1xf32>
    %218 = arith.addf %216, %217 : vector<16x1xf32>
    %219 = vector.broadcast %218 : vector<16x1xf32> to vector<16x32xf32>
    %220 = arith.divf %215, %219 : vector<16x32xf32>
    %221 = vector.broadcast %200 : vector<1x32xf32> to vector<16x32xf32>
    %222 = arith.addf %220, %221 : vector<16x32xf32>
    %c1_104 = arith.constant 1 : index
    %c0_105 = arith.constant 0 : index
    %c0_106 = arith.constant 0 : index
    %223 = vector.load %arg4[%c1_104, %c0_105, %c0_106] : memref<2x32x96xf32, #tpu.memory_space<vmem>>, vector<1x32x96xf32>
    %224 = vector.shape_cast %223 : vector<1x32x96xf32> to vector<32x96xf32>
    %cst_107 = arith.constant dense<0.000000e+00> : vector<16x96xf32>
    %225 = tpu.matmul %222, %224, %cst_107 {dimension_numbers = #tpu.dot_dimension_numbers<[1], [0], [0], [1], [0, 0, 1, 1], [], []>} : vector<16x32xf32>, vector<32x96xf32>, vector<16x96xf32> -> vector<16x96xf32>
    %226 = vector.extract_strided_slice %225 {offsets = [0, 0], sizes = [16, 32], strides = [1, 1]} : vector<16x96xf32> to vector<16x32xf32>
    %227 = vector.extract_strided_slice %225 {offsets = [0, 32], sizes = [16, 32], strides = [1, 1]} : vector<16x96xf32> to vector<16x32xf32>
    %228 = vector.extract_strided_slice %225 {offsets = [0, 64], sizes = [16, 32], strides = [1, 1]} : vector<16x96xf32> to vector<16x32xf32>
    %c1_108 = arith.constant 1 : index
    %c0_109 = arith.constant 0 : index
    %c0_110 = arith.constant 0 : index
    %229 = vector.load %arg7[%c1_108, %c0_109, %c0_110] : memref<4x32x32xf32, #tpu.memory_space<vmem>>, vector<1x32x32xf32>
    %230 = vector.shape_cast %229 : vector<1x32x32xf32> to vector<32x32xf32>
    %231 = vector.extract_strided_slice %226 {offsets = [0, 0], sizes = [16, 8], strides = [1, 1]} : vector<16x32xf32> to vector<16x8xf32>
    %232 = vector.extract_strided_slice %227 {offsets = [0, 0], sizes = [16, 8], strides = [1, 1]} : vector<16x32xf32> to vector<16x8xf32>
    %cst_111 = arith.constant dense<0.000000e+00> : vector<16x16xf32>
    %233 = tpu.matmul %231, %232, %cst_111 {dimension_numbers = #tpu.dot_dimension_numbers<[1], [1], [0], [0], [0, 0, 1, 0], [], []>} : vector<16x8xf32>, vector<16x8xf32>, vector<16x16xf32> -> vector<16x16xf32>
    %234 = vector.extract_strided_slice %226 {offsets = [0, 8], sizes = [16, 8], strides = [1, 1]} : vector<16x32xf32> to vector<16x8xf32>
    %235 = vector.extract_strided_slice %227 {offsets = [0, 8], sizes = [16, 8], strides = [1, 1]} : vector<16x32xf32> to vector<16x8xf32>
    %cst_112 = arith.constant dense<0.000000e+00> : vector<16x16xf32>
    %236 = tpu.matmul %234, %235, %cst_112 {dimension_numbers = #tpu.dot_dimension_numbers<[1], [1], [0], [0], [0, 0, 1, 0], [], []>} : vector<16x8xf32>, vector<16x8xf32>, vector<16x16xf32> -> vector<16x16xf32>
    %237 = vector.extract_strided_slice %226 {offsets = [0, 16], sizes = [16, 8], strides = [1, 1]} : vector<16x32xf32> to vector<16x8xf32>
    %238 = vector.extract_strided_slice %227 {offsets = [0, 16], sizes = [16, 8], strides = [1, 1]} : vector<16x32xf32> to vector<16x8xf32>
    %cst_113 = arith.constant dense<0.000000e+00> : vector<16x16xf32>
    %239 = tpu.matmul %237, %238, %cst_113 {dimension_numbers = #tpu.dot_dimension_numbers<[1], [1], [0], [0], [0, 0, 1, 0], [], []>} : vector<16x8xf32>, vector<16x8xf32>, vector<16x16xf32> -> vector<16x16xf32>
    %240 = vector.extract_strided_slice %226 {offsets = [0, 24], sizes = [16, 8], strides = [1, 1]} : vector<16x32xf32> to vector<16x8xf32>
    %241 = vector.extract_strided_slice %227 {offsets = [0, 24], sizes = [16, 8], strides = [1, 1]} : vector<16x32xf32> to vector<16x8xf32>
    %cst_114 = arith.constant dense<0.000000e+00> : vector<16x16xf32>
    %242 = tpu.matmul %240, %241, %cst_114 {dimension_numbers = #tpu.dot_dimension_numbers<[1], [1], [0], [0], [0, 0, 1, 0], [], []>} : vector<16x8xf32>, vector<16x8xf32>, vector<16x16xf32> -> vector<16x16xf32>
    %243 = tpu.concatenate %233, %236, %239, %242 in 0 : vector<16x16xf32>, vector<16x16xf32>, vector<16x16xf32>, vector<16x16xf32> -> vector<64x16xf32>
    %cst_115 = arith.constant 0.353553385 : f32
    %244 = vector.broadcast %cst_115 : f32 to vector<64x16xf32>
    %245 = arith.mulf %243, %244 : vector<64x16xf32>
    %246 = arith.addf %245, %2 : vector<64x16xf32>
    %cst_116 = arith.constant dense<0xFF800000> : vector<64xf32>
    %247 = vector.multi_reduction <maximumf>, %246, %cst_116 [1] : vector<64x16xf32> to vector<64xf32>
    %248 = vector.shape_cast %247 : vector<64xf32> to vector<64x1xf32>
    %249 = vector.broadcast %248 : vector<64x1xf32> to vector<64x16xf32>
    %250 = arith.subf %246, %249 : vector<64x16xf32>
    %251 = math.exp %250 : vector<64x16xf32>
    %cst_117 = arith.constant dense<0.000000e+00> : vector<64xf32>
    %252 = vector.multi_reduction <add>, %251, %cst_117 [1] : vector<64x16xf32> to vector<64xf32>
    %253 = vector.shape_cast %252 : vector<64xf32> to vector<64x1xf32>
    %254 = vector.broadcast %253 : vector<64x1xf32> to vector<64x16xf32>
    %255 = arith.divf %251, %254 : vector<64x16xf32>
    %256 = vector.extract_strided_slice %255 {offsets = [0, 0], sizes = [16, 16], strides = [1, 1]} : vector<64x16xf32> to vector<16x16xf32>
    %257 = vector.extract_strided_slice %228 {offsets = [0, 0], sizes = [16, 8], strides = [1, 1]} : vector<16x32xf32> to vector<16x8xf32>
    %cst_118 = arith.constant dense<0.000000e+00> : vector<16x8xf32>
    %258 = tpu.matmul %256, %257, %cst_118 {dimension_numbers = #tpu.dot_dimension_numbers<[1], [0], [0], [1], [0, 0, 1, 1], [], []>} : vector<16x16xf32>, vector<16x8xf32>, vector<16x8xf32> -> vector<16x8xf32>
    %259 = vector.extract_strided_slice %255 {offsets = [16, 0], sizes = [16, 16], strides = [1, 1]} : vector<64x16xf32> to vector<16x16xf32>
    %260 = vector.extract_strided_slice %228 {offsets = [0, 8], sizes = [16, 8], strides = [1, 1]} : vector<16x32xf32> to vector<16x8xf32>
    %cst_119 = arith.constant dense<0.000000e+00> : vector<16x8xf32>
    %261 = tpu.matmul %259, %260, %cst_119 {dimension_numbers = #tpu.dot_dimension_numbers<[1], [0], [0], [1], [0, 0, 1, 1], [], []>} : vector<16x16xf32>, vector<16x8xf32>, vector<16x8xf32> -> vector<16x8xf32>
    %262 = vector.extract_strided_slice %255 {offsets = [32, 0], sizes = [16, 16], strides = [1, 1]} : vector<64x16xf32> to vector<16x16xf32>
    %263 = vector.extract_strided_slice %228 {offsets = [0, 16], sizes = [16, 8], strides = [1, 1]} : vector<16x32xf32> to vector<16x8xf32>
    %cst_120 = arith.constant dense<0.000000e+00> : vector<16x8xf32>
    %264 = tpu.matmul %262, %263, %cst_120 {dimension_numbers = #tpu.dot_dimension_numbers<[1], [0], [0], [1], [0, 0, 1, 1], [], []>} : vector<16x16xf32>, vector<16x8xf32>, vector<16x8xf32> -> vector<16x8xf32>
    %265 = vector.extract_strided_slice %255 {offsets = [48, 0], sizes = [16, 16], strides = [1, 1]} : vector<64x16xf32> to vector<16x16xf32>
    %266 = vector.extract_strided_slice %228 {offsets = [0, 24], sizes = [16, 8], strides = [1, 1]} : vector<16x32xf32> to vector<16x8xf32>
    %cst_121 = arith.constant dense<0.000000e+00> : vector<16x8xf32>
    %267 = tpu.matmul %265, %266, %cst_121 {dimension_numbers = #tpu.dot_dimension_numbers<[1], [0], [0], [1], [0, 0, 1, 1], [], []>} : vector<16x16xf32>, vector<16x8xf32>, vector<16x8xf32> -> vector<16x8xf32>
    %268 = tpu.concatenate %258, %261, %264, %267 in 1 : vector<16x8xf32>, vector<16x8xf32>, vector<16x8xf32>, vector<16x8xf32> -> vector<16x32xf32>
    %cst_122 = arith.constant dense<0.000000e+00> : vector<16x32xf32>
    %269 = tpu.matmul %268, %230, %cst_122 {dimension_numbers = #tpu.dot_dimension_numbers<[1], [0], [0], [1], [0, 0, 1, 1], [], []>} : vector<16x32xf32>, vector<32x32xf32>, vector<16x32xf32> -> vector<16x32xf32>
    %270 = arith.addf %196, %269 : vector<16x32xf32>
    %c4 = arith.constant 4 : index
    %c0_123 = arith.constant 0 : index
    %c0_124 = arith.constant 0 : index
    %271 = vector.load %arg12[%c4, %c0_123, %c0_124] : memref<7x1x32xf32, #tpu.memory_space<vmem>>, vector<1x1x32xf32>
    %272 = vector.shape_cast %271 : vector<1x1x32xf32> to vector<1x32xf32>
    %c4_125 = arith.constant 4 : index
    %c0_126 = arith.constant 0 : index
    %c0_127 = arith.constant 0 : index
    %273 = vector.load %arg13[%c4_125, %c0_126, %c0_127] : memref<7x1x32xf32, #tpu.memory_space<vmem>>, vector<1x1x32xf32>
    %274 = vector.shape_cast %273 : vector<1x1x32xf32> to vector<1x32xf32>
    %cst_128 = arith.constant dense<0.000000e+00> : vector<16xf32>
    %275 = vector.multi_reduction <add>, %270, %cst_128 [1] : vector<16x32xf32> to vector<16xf32>
    %276 = vector.shape_cast %275 : vector<16xf32> to vector<16x1xf32>
    %cst_129 = arith.constant 3.200000e+01 : f32
    %277 = vector.broadcast %cst_129 : f32 to vector<16x1xf32>
    %278 = arith.divf %276, %277 : vector<16x1xf32>
    %279 = vector.broadcast %278 : vector<16x1xf32> to vector<16x32xf32>
    %280 = arith.subf %270, %279 : vector<16x32xf32>
    %281 = arith.mulf %280, %280 : vector<16x32xf32>
    %cst_130 = arith.constant dense<0.000000e+00> : vector<16xf32>
    %282 = vector.multi_reduction <add>, %281, %cst_130 [1] : vector<16x32xf32> to vector<16xf32>
    %283 = vector.shape_cast %282 : vector<16xf32> to vector<16x1xf32>
    %cst_131 = arith.constant 0.0322580636 : f32
    %284 = vector.broadcast %cst_131 : f32 to vector<16x1xf32>
    %285 = arith.mulf %283, %284 : vector<16x1xf32>
    %286 = vector.broadcast %278 : vector<16x1xf32> to vector<16x32xf32>
    %287 = arith.subf %270, %286 : vector<16x32xf32>
    %288 = vector.broadcast %272 : vector<1x32xf32> to vector<16x32xf32>
    %289 = arith.mulf %288, %287 : vector<16x32xf32>
    %290 = math.sqrt %285 : vector<16x1xf32>
    %cst_132 = arith.constant 9.99999997E-7 : f32
    %291 = vector.broadcast %cst_132 : f32 to vector<16x1xf32>
    %292 = arith.addf %290, %291 : vector<16x1xf32>
    %293 = vector.broadcast %292 : vector<16x1xf32> to vector<16x32xf32>
    %294 = arith.divf %289, %293 : vector<16x32xf32>
    %295 = vector.broadcast %274 : vector<1x32xf32> to vector<16x32xf32>
    %296 = arith.addf %294, %295 : vector<16x32xf32>
    %c1_133 = arith.constant 1 : index
    %c0_134 = arith.constant 0 : index
    %c0_135 = arith.constant 0 : index
    %297 = vector.load %arg5[%c1_133, %c0_134, %c0_135] : memref<2x32x32xf32, #tpu.memory_space<vmem>>, vector<1x32x32xf32>
    %298 = vector.shape_cast %297 : vector<1x32x32xf32> to vector<32x32xf32>
    %cst_136 = arith.constant dense<0.000000e+00> : vector<16x32xf32>
    %299 = tpu.matmul %296, %298, %cst_136 {dimension_numbers = #tpu.dot_dimension_numbers<[1], [0], [0], [1], [0, 0, 1, 1], [], []>} : vector<16x32xf32>, vector<32x32xf32>, vector<16x32xf32> -> vector<16x32xf32>
    %c1_137 = arith.constant 1 : index
    %c0_138 = arith.constant 0 : index
    %c0_139 = arith.constant 0 : index
    %300 = vector.load %arg6[%c1_137, %c0_138, %c0_139] : memref<2x32x64xf32, #tpu.memory_space<vmem>>, vector<1x32x64xf32>
    %301 = vector.shape_cast %300 : vector<1x32x64xf32> to vector<32x64xf32>
    %cst_140 = arith.constant dense<0.000000e+00> : vector<16x64xf32>
    %302 = tpu.matmul %1, %301, %cst_140 {dimension_numbers = #tpu.dot_dimension_numbers<[1], [0], [0], [1], [0, 0, 1, 1], [], []>} : vector<16x32xf32>, vector<32x64xf32>, vector<16x64xf32> -> vector<16x64xf32>
    %303 = vector.extract_strided_slice %302 {offsets = [0, 0], sizes = [16, 32], strides = [1, 1]} : vector<16x64xf32> to vector<16x32xf32>
    %304 = vector.extract_strided_slice %302 {offsets = [0, 32], sizes = [16, 32], strides = [1, 1]} : vector<16x64xf32> to vector<16x32xf32>
    %c3_141 = arith.constant 3 : index
    %c0_142 = arith.constant 0 : index
    %c0_143 = arith.constant 0 : index
    %305 = vector.load %arg7[%c3_141, %c0_142, %c0_143] : memref<4x32x32xf32, #tpu.memory_space<vmem>>, vector<1x32x32xf32>
    %306 = vector.shape_cast %305 : vector<1x32x32xf32> to vector<32x32xf32>
    %307 = vector.extract_strided_slice %299 {offsets = [0, 0], sizes = [16, 8], strides = [1, 1]} : vector<16x32xf32> to vector<16x8xf32>
    %308 = vector.extract_strided_slice %303 {offsets = [0, 0], sizes = [16, 8], strides = [1, 1]} : vector<16x32xf32> to vector<16x8xf32>
    %cst_144 = arith.constant dense<0.000000e+00> : vector<16x16xf32>
    %309 = tpu.matmul %307, %308, %cst_144 {dimension_numbers = #tpu.dot_dimension_numbers<[1], [1], [0], [0], [0, 0, 1, 0], [], []>} : vector<16x8xf32>, vector<16x8xf32>, vector<16x16xf32> -> vector<16x16xf32>
    %310 = vector.extract_strided_slice %299 {offsets = [0, 8], sizes = [16, 8], strides = [1, 1]} : vector<16x32xf32> to vector<16x8xf32>
    %311 = vector.extract_strided_slice %303 {offsets = [0, 8], sizes = [16, 8], strides = [1, 1]} : vector<16x32xf32> to vector<16x8xf32>
    %cst_145 = arith.constant dense<0.000000e+00> : vector<16x16xf32>
    %312 = tpu.matmul %310, %311, %cst_145 {dimension_numbers = #tpu.dot_dimension_numbers<[1], [1], [0], [0], [0, 0, 1, 0], [], []>} : vector<16x8xf32>, vector<16x8xf32>, vector<16x16xf32> -> vector<16x16xf32>
    %313 = vector.extract_strided_slice %299 {offsets = [0, 16], sizes = [16, 8], strides = [1, 1]} : vector<16x32xf32> to vector<16x8xf32>
    %314 = vector.extract_strided_slice %303 {offsets = [0, 16], sizes = [16, 8], strides = [1, 1]} : vector<16x32xf32> to vector<16x8xf32>
    %cst_146 = arith.constant dense<0.000000e+00> : vector<16x16xf32>
    %315 = tpu.matmul %313, %314, %cst_146 {dimension_numbers = #tpu.dot_dimension_numbers<[1], [1], [0], [0], [0, 0, 1, 0], [], []>} : vector<16x8xf32>, vector<16x8xf32>, vector<16x16xf32> -> vector<16x16xf32>
    %316 = vector.extract_strided_slice %299 {offsets = [0, 24], sizes = [16, 8], strides = [1, 1]} : vector<16x32xf32> to vector<16x8xf32>
    %317 = vector.extract_strided_slice %303 {offsets = [0, 24], sizes = [16, 8], strides = [1, 1]} : vector<16x32xf32> to vector<16x8xf32>
    %cst_147 = arith.constant dense<0.000000e+00> : vector<16x16xf32>
    %318 = tpu.matmul %316, %317, %cst_147 {dimension_numbers = #tpu.dot_dimension_numbers<[1], [1], [0], [0], [0, 0, 1, 0], [], []>} : vector<16x8xf32>, vector<16x8xf32>, vector<16x16xf32> -> vector<16x16xf32>
    %319 = tpu.concatenate %309, %312, %315, %318 in 0 : vector<16x16xf32>, vector<16x16xf32>, vector<16x16xf32>, vector<16x16xf32> -> vector<64x16xf32>
    %cst_148 = arith.constant 0.353553385 : f32
    %320 = vector.broadcast %cst_148 : f32 to vector<64x16xf32>
    %321 = arith.mulf %319, %320 : vector<64x16xf32>
    %322 = arith.addf %321, %3 : vector<64x16xf32>
    %cst_149 = arith.constant dense<0xFF800000> : vector<64xf32>
    %323 = vector.multi_reduction <maximumf>, %322, %cst_149 [1] : vector<64x16xf32> to vector<64xf32>
    %324 = vector.shape_cast %323 : vector<64xf32> to vector<64x1xf32>
    %325 = vector.broadcast %324 : vector<64x1xf32> to vector<64x16xf32>
    %326 = arith.subf %322, %325 : vector<64x16xf32>
    %327 = math.exp %326 : vector<64x16xf32>
    %cst_150 = arith.constant dense<0.000000e+00> : vector<64xf32>
    %328 = vector.multi_reduction <add>, %327, %cst_150 [1] : vector<64x16xf32> to vector<64xf32>
    %329 = vector.shape_cast %328 : vector<64xf32> to vector<64x1xf32>
    %330 = vector.broadcast %329 : vector<64x1xf32> to vector<64x16xf32>
    %331 = arith.divf %327, %330 : vector<64x16xf32>
    %332 = vector.extract_strided_slice %331 {offsets = [0, 0], sizes = [16, 16], strides = [1, 1]} : vector<64x16xf32> to vector<16x16xf32>
    %333 = vector.extract_strided_slice %304 {offsets = [0, 0], sizes = [16, 8], strides = [1, 1]} : vector<16x32xf32> to vector<16x8xf32>
    %cst_151 = arith.constant dense<0.000000e+00> : vector<16x8xf32>
    %334 = tpu.matmul %332, %333, %cst_151 {dimension_numbers = #tpu.dot_dimension_numbers<[1], [0], [0], [1], [0, 0, 1, 1], [], []>} : vector<16x16xf32>, vector<16x8xf32>, vector<16x8xf32> -> vector<16x8xf32>
    %335 = vector.extract_strided_slice %331 {offsets = [16, 0], sizes = [16, 16], strides = [1, 1]} : vector<64x16xf32> to vector<16x16xf32>
    %336 = vector.extract_strided_slice %304 {offsets = [0, 8], sizes = [16, 8], strides = [1, 1]} : vector<16x32xf32> to vector<16x8xf32>
    %cst_152 = arith.constant dense<0.000000e+00> : vector<16x8xf32>
    %337 = tpu.matmul %335, %336, %cst_152 {dimension_numbers = #tpu.dot_dimension_numbers<[1], [0], [0], [1], [0, 0, 1, 1], [], []>} : vector<16x16xf32>, vector<16x8xf32>, vector<16x8xf32> -> vector<16x8xf32>
    %338 = vector.extract_strided_slice %331 {offsets = [32, 0], sizes = [16, 16], strides = [1, 1]} : vector<64x16xf32> to vector<16x16xf32>
    %339 = vector.extract_strided_slice %304 {offsets = [0, 16], sizes = [16, 8], strides = [1, 1]} : vector<16x32xf32> to vector<16x8xf32>
    %cst_153 = arith.constant dense<0.000000e+00> : vector<16x8xf32>
    %340 = tpu.matmul %338, %339, %cst_153 {dimension_numbers = #tpu.dot_dimension_numbers<[1], [0], [0], [1], [0, 0, 1, 1], [], []>} : vector<16x16xf32>, vector<16x8xf32>, vector<16x8xf32> -> vector<16x8xf32>
    %341 = vector.extract_strided_slice %331 {offsets = [48, 0], sizes = [16, 16], strides = [1, 1]} : vector<64x16xf32> to vector<16x16xf32>
    %342 = vector.extract_strided_slice %304 {offsets = [0, 24], sizes = [16, 8], strides = [1, 1]} : vector<16x32xf32> to vector<16x8xf32>
    %cst_154 = arith.constant dense<0.000000e+00> : vector<16x8xf32>
    %343 = tpu.matmul %341, %342, %cst_154 {dimension_numbers = #tpu.dot_dimension_numbers<[1], [0], [0], [1], [0, 0, 1, 1], [], []>} : vector<16x16xf32>, vector<16x8xf32>, vector<16x8xf32> -> vector<16x8xf32>
    %344 = tpu.concatenate %334, %337, %340, %343 in 1 : vector<16x8xf32>, vector<16x8xf32>, vector<16x8xf32>, vector<16x8xf32> -> vector<16x32xf32>
    %cst_155 = arith.constant dense<0.000000e+00> : vector<16x32xf32>
    %345 = tpu.matmul %344, %306, %cst_155 {dimension_numbers = #tpu.dot_dimension_numbers<[1], [0], [0], [1], [0, 0, 1, 1], [], []>} : vector<16x32xf32>, vector<32x32xf32>, vector<16x32xf32> -> vector<16x32xf32>
    %346 = arith.addf %270, %345 : vector<16x32xf32>
    %c5 = arith.constant 5 : index
    %c0_156 = arith.constant 0 : index
    %c0_157 = arith.constant 0 : index
    %347 = vector.load %arg12[%c5, %c0_156, %c0_157] : memref<7x1x32xf32, #tpu.memory_space<vmem>>, vector<1x1x32xf32>
    %348 = vector.shape_cast %347 : vector<1x1x32xf32> to vector<1x32xf32>
    %c5_158 = arith.constant 5 : index
    %c0_159 = arith.constant 0 : index
    %c0_160 = arith.constant 0 : index
    %349 = vector.load %arg13[%c5_158, %c0_159, %c0_160] : memref<7x1x32xf32, #tpu.memory_space<vmem>>, vector<1x1x32xf32>
    %350 = vector.shape_cast %349 : vector<1x1x32xf32> to vector<1x32xf32>
    %cst_161 = arith.constant dense<0.000000e+00> : vector<16xf32>
    %351 = vector.multi_reduction <add>, %346, %cst_161 [1] : vector<16x32xf32> to vector<16xf32>
    %352 = vector.shape_cast %351 : vector<16xf32> to vector<16x1xf32>
    %cst_162 = arith.constant 3.200000e+01 : f32
    %353 = vector.broadcast %cst_162 : f32 to vector<16x1xf32>
    %354 = arith.divf %352, %353 : vector<16x1xf32>
    %355 = vector.broadcast %354 : vector<16x1xf32> to vector<16x32xf32>
    %356 = arith.subf %346, %355 : vector<16x32xf32>
    %357 = arith.mulf %356, %356 : vector<16x32xf32>
    %cst_163 = arith.constant dense<0.000000e+00> : vector<16xf32>
    %358 = vector.multi_reduction <add>, %357, %cst_163 [1] : vector<16x32xf32> to vector<16xf32>
    %359 = vector.shape_cast %358 : vector<16xf32> to vector<16x1xf32>
    %cst_164 = arith.constant 0.0322580636 : f32
    %360 = vector.broadcast %cst_164 : f32 to vector<16x1xf32>
    %361 = arith.mulf %359, %360 : vector<16x1xf32>
    %362 = vector.broadcast %354 : vector<16x1xf32> to vector<16x32xf32>
    %363 = arith.subf %346, %362 : vector<16x32xf32>
    %364 = vector.broadcast %348 : vector<1x32xf32> to vector<16x32xf32>
    %365 = arith.mulf %364, %363 : vector<16x32xf32>
    %366 = math.sqrt %361 : vector<16x1xf32>
    %cst_165 = arith.constant 9.99999997E-7 : f32
    %367 = vector.broadcast %cst_165 : f32 to vector<16x1xf32>
    %368 = arith.addf %366, %367 : vector<16x1xf32>
    %369 = vector.broadcast %368 : vector<16x1xf32> to vector<16x32xf32>
    %370 = arith.divf %365, %369 : vector<16x32xf32>
    %371 = vector.broadcast %350 : vector<1x32xf32> to vector<16x32xf32>
    %372 = arith.addf %370, %371 : vector<16x32xf32>
    %c1_166 = arith.constant 1 : index
    %c0_167 = arith.constant 0 : index
    %c0_168 = arith.constant 0 : index
    %373 = vector.load %arg8[%c1_166, %c0_167, %c0_168] : memref<2x32x64xf32, #tpu.memory_space<vmem>>, vector<1x32x64xf32>
    %374 = vector.shape_cast %373 : vector<1x32x64xf32> to vector<32x64xf32>
    %cst_169 = arith.constant dense<0.000000e+00> : vector<16x64xf32>
    %375 = tpu.matmul %372, %374, %cst_169 {dimension_numbers = #tpu.dot_dimension_numbers<[1], [0], [0], [1], [0, 0, 1, 1], [], []>} : vector<16x32xf32>, vector<32x64xf32>, vector<16x64xf32> -> vector<16x64xf32>
    %c1_170 = arith.constant 1 : index
    %c0_171 = arith.constant 0 : index
    %c0_172 = arith.constant 0 : index
    %376 = vector.load %arg10[%c1_170, %c0_171, %c0_172] : memref<2x1x64xf32, #tpu.memory_space<vmem>>, vector<1x1x64xf32>
    %377 = vector.shape_cast %376 : vector<1x1x64xf32> to vector<1x64xf32>
    %378 = vector.broadcast %377 : vector<1x64xf32> to vector<16x64xf32>
    %379 = arith.addf %375, %378 : vector<16x64xf32>
    %cst_173 = arith.constant 0.000000e+00 : f32
    %380 = vector.broadcast %cst_173 : f32 to vector<16x64xf32>
    %381 = arith.maximumf %379, %380 : vector<16x64xf32>
    %c1_174 = arith.constant 1 : index
    %c0_175 = arith.constant 0 : index
    %c0_176 = arith.constant 0 : index
    %382 = vector.load %arg9[%c1_174, %c0_175, %c0_176] : memref<2x64x32xf32, #tpu.memory_space<vmem>>, vector<1x64x32xf32>
    %383 = vector.shape_cast %382 : vector<1x64x32xf32> to vector<64x32xf32>
    %cst_177 = arith.constant dense<0.000000e+00> : vector<16x32xf32>
    %384 = tpu.matmul %381, %383, %cst_177 {dimension_numbers = #tpu.dot_dimension_numbers<[1], [0], [0], [1], [0, 0, 1, 1], [], []>} : vector<16x64xf32>, vector<64x32xf32>, vector<16x32xf32> -> vector<16x32xf32>
    %385 = arith.addf %346, %384 : vector<16x32xf32>
    %c1_178 = arith.constant 1 : index
    %c0_179 = arith.constant 0 : index
    %c0_180 = arith.constant 0 : index
    %386 = vector.load %arg11[%c1_178, %c0_179, %c0_180] : memref<2x1x32xf32, #tpu.memory_space<vmem>>, vector<1x1x32xf32>
    %387 = vector.shape_cast %386 : vector<1x1x32xf32> to vector<1x32xf32>
    %388 = vector.broadcast %387 : vector<1x32xf32> to vector<16x32xf32>
    %389 = arith.addf %385, %388 : vector<16x32xf32>
    %c6 = arith.constant 6 : index
    %c0_181 = arith.constant 0 : index
    %c0_182 = arith.constant 0 : index
    %390 = vector.load %arg12[%c6, %c0_181, %c0_182] : memref<7x1x32xf32, #tpu.memory_space<vmem>>, vector<1x1x32xf32>
    %391 = vector.shape_cast %390 : vector<1x1x32xf32> to vector<1x32xf32>
    %c6_183 = arith.constant 6 : index
    %c0_184 = arith.constant 0 : index
    %c0_185 = arith.constant 0 : index
    %392 = vector.load %arg13[%c6_183, %c0_184, %c0_185] : memref<7x1x32xf32, #tpu.memory_space<vmem>>, vector<1x1x32xf32>
    %393 = vector.shape_cast %392 : vector<1x1x32xf32> to vector<1x32xf32>
    %cst_186 = arith.constant dense<0.000000e+00> : vector<16xf32>
    %394 = vector.multi_reduction <add>, %389, %cst_186 [1] : vector<16x32xf32> to vector<16xf32>
    %395 = vector.shape_cast %394 : vector<16xf32> to vector<16x1xf32>
    %cst_187 = arith.constant 3.200000e+01 : f32
    %396 = vector.broadcast %cst_187 : f32 to vector<16x1xf32>
    %397 = arith.divf %395, %396 : vector<16x1xf32>
    %398 = vector.broadcast %397 : vector<16x1xf32> to vector<16x32xf32>
    %399 = arith.subf %389, %398 : vector<16x32xf32>
    %400 = arith.mulf %399, %399 : vector<16x32xf32>
    %cst_188 = arith.constant dense<0.000000e+00> : vector<16xf32>
    %401 = vector.multi_reduction <add>, %400, %cst_188 [1] : vector<16x32xf32> to vector<16xf32>
    %402 = vector.shape_cast %401 : vector<16xf32> to vector<16x1xf32>
    %cst_189 = arith.constant 0.0322580636 : f32
    %403 = vector.broadcast %cst_189 : f32 to vector<16x1xf32>
    %404 = arith.mulf %402, %403 : vector<16x1xf32>
    %405 = vector.broadcast %397 : vector<16x1xf32> to vector<16x32xf32>
    %406 = arith.subf %389, %405 : vector<16x32xf32>
    %407 = vector.broadcast %391 : vector<1x32xf32> to vector<16x32xf32>
    %408 = arith.mulf %407, %406 : vector<16x32xf32>
    %409 = math.sqrt %404 : vector<16x1xf32>
    %cst_190 = arith.constant 9.99999997E-7 : f32
    %410 = vector.broadcast %cst_190 : f32 to vector<16x1xf32>
    %411 = arith.addf %409, %410 : vector<16x1xf32>
    %412 = vector.broadcast %411 : vector<16x1xf32> to vector<16x32xf32>
    %413 = arith.divf %408, %412 : vector<16x32xf32>
    %414 = vector.broadcast %393 : vector<1x32xf32> to vector<16x32xf32>
    %415 = arith.addf %413, %414 : vector<16x32xf32>
    %c0_191 = arith.constant 0 : index
    %c0_192 = arith.constant 0 : index
    %416 = vector.load %arg14[%c0_191, %c0_192] : memref<16x32xf32, #tpu.memory_space<vmem>>, vector<16x32xf32>
    tpu.vector_store %arg14[%c0_191, %c0_192], %415 {strides = array<i32>} : memref<16x32xf32, #tpu.memory_space<vmem>>, vector<16x32xf32>,
    return
  }
}

</mosaic_0001>

<bundles_post_ra>
// kernel: tpu_custom_call.1
= control target key start
LH: loop header
LB: loop body
LE: loop exit
PB: predicated region body
PF: predicated region fallthrough
CT: control target
= control target key end

     0   :  { %19 = vsyncpa [#allocation3], 0  ;;  %s7723_s0 = inlined_call_operand.vmem [shape: f32[16,32], index: 0, kind: input, shape index: {}]   ;;  %s7724_s1 = inlined_call_operand.hbm [shape: f32[16,32], index: 1, kind: input, shape index: {}]   ;;  %s7725_s2 = inlined_call_operand.vmem [shape: f32[64,16], index: 2, kind: input, shape index: {}]   ;;  %s7726_s3 = inlined_call_operand.vmem [shape: f32[64,16], index: 3, kind: input, shape index: {}]   ;;  %s7727_s4 = inlined_call_operand.vmem [shape: f32[2,32,96], index: 4, kind: input, shape index: {}]   ;;  %s7728_s5 = inlined_call_operand.vmem [shape: f32[2,32,32], index: 5, kind: input, shape index: {}]   ;;  %s7729_s6 = inlined_call_operand.hbm [shape: f32[2,32,64], index: 6, kind: input, shape index: {}]   ;;  %s7730_s7 = inlined_call_operand.vmem [shape: f32[4,32,32], index: 7, kind: input, shape index: {}]   ;;  %s7731_s8 = inlined_call_operand.hbm [shape: f32[2,32,64], index: 8, kind: input, shape index: {}]   ;;  %s7732_s9 = inlined_call_operand.vmem [shape: f32[2,64,32], index: 9, kind: input, shape index: {}]   ;;  %s7733_s10 = inlined_call_operand.vmem [shape: f32[2,1,64], index: 10, kind: input, shape index: {}]   ;;  %s7734_s11 = inlined_call_operand.vmem [shape: f32[2,1,32], index: 11, kind: input, shape index: {}]   ;;  %s7735_s12 = inlined_call_operand.vmem [shape: f32[7,1,32], index: 12, kind: input, shape index: {}]   ;;  %s7736_s13 = inlined_call_operand.vmem [shape: f32[7,1,32], index: 13, kind: input, shape index: {}]   ;;  %s7737_s14 = inlined_call_operand.hbm [shape: f32[16,32], index: 14, kind: output, shape index: {}]  }
   0x1   :  { %20 = vsyncpa [#allocation6], 0 }
   0x2   :  { %21 = vsyncpa [#allocation4], 0  ;;  %s6726_s29 = smov [#allocation5]   ;;  %s6727_s15 = smov [#allocation2]  }
   0x3   :  { %s49_s30 = sshll.u32 %s6726_s29, 4  ;;  %s29_s16 = sshll.u32 %s6727_s15, 4  ;;  %s50_s30 = int_to_ptr.vmem [resolvable:$true] %s49_s30  ;;  %s6820_s16 = int_to_ptr.vmem [resolvable:$true] %s29_s16 }
   0x4   :  { %s6632_s19 = scalar_lea.hbm %s7729_s6, 1024 }
   0x5   :  { %p6633_p0 = scmp.ne.s32.totalorder %s7729_s6, %s6632_s19  ;;  %p6636_p1 = scmp.lt.u32.totalorder %s6632_s19, %s7729_s6 }
   0x7   :  { %p6638_p2 = pnand %p6636_p1, %p6633_p0 }
   0x9   :  { %6641 = shalt.err (!%p6638_p2)
}
   0xa   :  { %s6642_s24 = scalar_lea.vmem %s50_s30, 1024  ;;  %p6647_p4 = scmp.lt.s32.totalorder %s50_s30, %s50_s30 }
   0xb   :  { %p6643_p3 = scmp.ne.s32.totalorder %s50_s30, %s6642_s24  ;;  %p6648_p5 = scmp.lt.s32.totalorder %s6642_s24, %s6642_s24 }
   0xd   :  { %p6649_p6 = por %p6648_p5, %p6647_p4 }
   0xf   :  { %p6650_p7 = pnand %p6649_p6, %p6643_p3 }
  0x11   :  { %6653 = shalt.err (!%p6650_p7)
}
  0x12   :  { %s7738_s25 = smov 128   ;;  %s6729_s26 = smov 8  }
  0x13   :  { %55 = dma.hbm_to_vmem [thread:$0]  %s7729_s6, 1024, %s50_s30, [#allocation6], %s7738_s25, %s7738_s25, %s6729_s26  }
  0x14   :  { %s6654_s17 = scalar_lea.hbm %s7724_s1, 256 }
  0x15   :  { %p6655_p8 = scmp.ne.s32.totalorder %s7724_s1, %s6654_s17  ;;  %p6658_p9 = scmp.lt.u32.totalorder %s6654_s17, %s7724_s1 }
  0x17   :  { %p6660_p10 = pnand %p6658_p9, %p6655_p8 }
  0x19   :  { %6663 = shalt.err (!%p6660_p10)
}
  0x1a   :  { %s6664_s22 = scalar_lea.vmem %s6820_s16, 256  ;;  %p6669_p12 = scmp.lt.s32.totalorder %s6820_s16, %s6820_s16 }
  0x1b   :  { %p6665_p11 = scmp.ne.s32.totalorder %s6820_s16, %s6664_s22  ;;  %p6670_p13 = scmp.lt.s32.totalorder %s6664_s22, %s6664_s22 }
  0x1d   :  { %p6671_p0 = por %p6670_p13, %p6669_p12 }
  0x1f   :  { %p6672_p1 = pnand %p6671_p0, %p6665_p11 }
  0x21   :  { %6675 = shalt.err (!%p6672_p1)
}
  0x22   :  { %35 = dma.hbm_to_vmem [thread:$0]  %s7724_s1, 256, %s6820_s16, [#allocation3], %s7738_s25, %s7738_s25, %s6729_s26  }
  0x23   :  { %s6730_s23 = smov [#allocation7]   ;;  %s6676_s29 = scalar_lea.hbm %s7731_s8, 1024 }
  0x24   :  { %s63_s24 = sshll.u32 %s6730_s23, 4  ;;  %p6677_p2 = scmp.ne.s32.totalorder %s7731_s8, %s6676_s29  ;;  %s64_s24 = int_to_ptr.vmem [resolvable:$true] %s63_s24 }
  0x25   :  { %p6680_p3 = scmp.lt.u32.totalorder %s6676_s29, %s7731_s8 }
  0x27   :  { %p6682_p4 = pnand %p6680_p3, %p6677_p2 }
  0x29   :  { %6685 = shalt.err (!%p6682_p4)
}
  0x2a   :  { %s6686_s20 = scalar_lea.vmem %s64_s24, 1024  ;;  %p6691_p6 = scmp.lt.s32.totalorder %s64_s24, %s64_s24 }
  0x2b   :  { %p6687_p5 = scmp.ne.s32.totalorder %s64_s24, %s6686_s20  ;;  %p6692_p7 = scmp.lt.s32.totalorder %s6686_s20, %s6686_s20 }
  0x2d   :  { %p6693_p8 = por %p6692_p7, %p6691_p6 }
  0x2f   :  { %p6694_p9 = pnand %p6693_p8, %p6687_p5 }
  0x31   :  { %6697 = shalt.err (!%p6694_p9)
}
  0x32   :  { %69 = dma.hbm_to_vmem [thread:$0]  %s7731_s8, 1024, %s64_s24, [#allocation6], %s7738_s25, %s7738_s25, %s6729_s26  }
  0x33   :  { %6720 = dma.done.wait [#allocation3], 256  }
  0x34   :  { %6721 = vsyncadd [#allocation3], 4294967040 }
  0x35   :  { %6722 = dma.done.wait [#allocation6], 2048  }
  0x36   :  { %6723 = vsyncadd [#allocation6], 4294965248  ;;  %vm111_vm0 = vcmask 261120   ;;  %v6875_v0 = vld [vmem:[%s7723_s0] sm:$0xff]  ;;  %v6880_v1 = vld [vmem:[%s7723_s0 + $0x8] sm:$0xff]  ;;  %vm264_vm5 = vcmask 64512  }
  0x37   :  { %v112_v2 = vsel %vm111_vm0, %v6875_v0, 0.0  ;;  %v115_v3 = vsel %vm111_vm0, %v6880_v1, 0.0  ;;  %v169_v14 = vld [vmem:[%s7727_s4] sm:$0xff]  ;;  %v170_v15 = vld [vmem:[%s7727_s4 + $0x8] sm:$0xff]  ;;  %v171_v16 = vld [vmem:[%s7727_s4 + $0x10] sm:$0xff]  ;;  %s6731_s1 = smov 88  }
  0x38   :  { %113 = vadd.xlane.f32.xlu0 %v112_v2  ;;  %v5973_v17 = vpack.c.bf16 %v170_v15, %v169_v14  ;;  %v172_v18 = vld [vmem:[%s7727_s4 + $0x18] sm:$0xff]  ;;  %v5175_v36 = vld [vmem:[%s7735_s12] ss:$0 sm:$0xff]  ;;  %s6732_s16 = smov 96   ;;  %s6733_s21 = smov 80   ;;  %vm6929_vm6 = vmpackc.low %vm264_vm5, %vm264_vm5  ;;  %vm637_vm7 = vcmask 130048  }
  0x39   :  { %v5977_v19 = vpack.c.bf16 %v172_v18, %v171_v16  ;;  %v5176_v39 = vld [vmem:[%s7736_s13] ss:$0 sm:$0xff]  ;;  %s6734_s22 = smov 120   ;;  %s6735_s6 = smov 72   ;;  %v96_v15 = vld [vmem:[%s7725_s2 + $0x18] sm:$0xff]  ;;  %vm1102_vm8 = vcmask 195584  }
  0x3a   :  { %5974 = vmatprep.subr.bf16.mxu1 %v5973_v17  ;;  %s6736_s30 = smov 112   ;;  %s6737_s0 = smov 104   ;;  %v6625_v55 = vld [vmem:[%s7726_s3] sm:$0xff] }
  0x3b   :  { %5976 = vmatpush3.bf16.msra.mxu1 %v5973_v17  ;;  %s7740_s29 = smov 56   ;;  %s6739_s15 = smov 48  }
  0x3c   :  { %116 = vadd.xlane.f32.xlu0 %v115_v3  ;;  %5978 = vmatprep.subr.bf16.mxu1 %v5977_v19  ;;  %s7739_s17 = smov 40   ;;  %s6741_s18 = smov 64  }
  0x3d   :  { %s7743_s19 = smov 16   ;;  %s7741_s25 = smov 24  }
  0x3f   :  { %5980 = vmatpush3.bf16.msra.mxu1 %v5977_v19 }
  0xc5   :  { %v114_v4 = vpop.xlane.xlu0 %113 }
  0xc6   :  { %v119_v5 = vmul.f32 0.03125, %v114_v4 }
  0xc8   :  { %v121_v6 = vsub.f32 %v6875_v0, %v119_v5 }
  0xc9   :  { %v117_v7 = vpop.xlane.xlu0 %116 }
  0xca   :  { %v120_v8 = vmul.f32 0.03125, %v117_v7  ;;  %v123_v9 = vmul.f32 %v121_v6, %v121_v6  ;;  %v139_v37 = vmul.f32 %v5175_v36, %v121_v6 }
  0xcc   :  { %v122_v10 = vsub.f32 %v6880_v1, %v120_v8  ;;  %v125_v11 = vsel %vm111_vm0, %v123_v9, 0.0 }
  0xcd   :  { %126 = vadd.xlane.f32.xlu1 %v125_v11  ;;  %v94_v11 = vld [vmem:[%s7725_s2 + $0x8] sm:$0xff] }
  0xce   :  { %v124_v12 = vmul.f32 %v122_v10, %v122_v10  ;;  %v140_v41 = vmul.f32 %v5175_v36, %v122_v10 }
  0xd0   :  { %v128_v13 = vsel %vm111_vm0, %v124_v12, 0.0 }
  0xd1   :  { %129 = vadd.xlane.f32.xlu1 %v128_v13 }
 0x15a   :  { %v127_v20 = vpop.xlane.xlu1 %126 }
 0x15b   :  { %v131_v21 = vmul.f32 0.032258064, %v127_v20  ;;  %v93_v20 = vld [vmem:[%s7725_s2] sm:$0xff] }
 0x15d   :  { %6430 = vrsqrt.f32 %v131_v21  ;;  %vm143_vm1 = vcmp.eq.f32.partialorder %v131_v21, inf  ;;  %v146_v26 = vand.u32 2147483648, %v131_v21  ;;  %vm145_vm2 = vcmp.eq.f32.partialorder %v131_v21, 0.0 }
 0x15e   :  { %v130_v22 = vpop.xlane.xlu1 %129 }
 0x15f   :  { %v132_v23 = vmul.f32 0.032258064, %v130_v22 }
 0x161   :  { %6432 = vrsqrt.f32 %v132_v23  ;;  %vm150_vm3 = vcmp.eq.f32.partialorder %v132_v23, inf  ;;  %v153_v32 = vand.u32 2147483648, %v132_v23  ;;  %vm152_vm4 = vcmp.eq.f32.partialorder %v132_v23, 0.0 }
 0x167   :  { %v6431_v24 = vpop.eup %6430 }
 0x168   :  { %v142_v25 = vmul.f32 %v6431_v24, %v131_v21 }
 0x16a   :  { %v144_v27 = vsel %vm143_vm1, %v131_v21, %v142_v25 }
 0x16b   :  { %v6433_v28 = vpop.eup %6432  ;;  %v147_v29 = vsel %vm145_vm2, %v146_v26, %v144_v27  ;;  %v95_v26 = vld [vmem:[%s7725_s2 + $0x10] sm:$0xff]  ;;  %vm2510_vm2 = vcmask 523264  }
 0x16c   :  { %v149_v30 = vmul.f32 %v6433_v28, %v132_v23  ;;  %v155_v31 = vadd.f32 1e-06, %v147_v29  ;;  %v98_v28 = vld [vmem:[%s7725_s2 + $0x28] sm:$0xff] }
 0x16e   :  { %v151_v33 = vsel %vm150_vm3, %v132_v23, %v149_v30  ;;  %6434 = vrcp.f32 %v155_v31 }
 0x16f   :  { %v154_v34 = vsel %vm152_vm4, %v153_v32, %v151_v33  ;;  %v100_v32 = vld [vmem:[%s7725_s2 + $0x38] sm:$0xff] }
 0x170   :  { %v156_v35 = vadd.f32 1e-06, %v154_v34 }
 0x172   :  { %6436 = vrcp.f32 %v156_v35 }
 0x178   :  { %v6435_v38 = vpop.eup %6434 }
 0x179   :  { %v158_v40 = vmul.f32 %v6435_v38, %v139_v37 }
 0x17b   :  { %v167_v42 = vadd.f32 %v5176_v39, %v158_v40 }
 0x17c   :  { %v6437_v43 = vpop.eup %6436 }
 0x17d   :  { %v160_v44 = vmul.f32 %v6437_v43, %v140_v41  ;;  %5587 = vmatprep.mubr.msk.f32.mxu1 %vm111_vm0, %v167_v42 }
 0x17f   :  { %v168_v45 = vadd.f32 %v5176_v39, %v160_v44  ;;  %v97_v39 = vld [vmem:[%s7725_s2 + $0x20] sm:$0xff] }
 0x181   :  { %5588 = vmatmul.mubr.msk.f32.vlgmr.msra.gmra.mrb[0].mxu1 %vm111_vm0, %v168_v45  ;;  %v99_v45 = vld [vmem:[%s7725_s2 + $0x30] sm:$0xff] }
 0x254   :  { %v5589_v46 = vpop.f32.mrb[0].mxu1 }
 0x255   :  { %v245_v47 = vpop.f32.mrb[1].mxu1 }
 0x256   :  { %5594 = vmatprep.mubr.msk.f32.mxu1 %vm264_vm5, %v245_v47  ;;  %v6911_v48 = vpack.i.bf16 %v5589_v46, %v245_v47 }
 0x258   :  { %6286 = vrot.lane.b32.xlu1 %v6911_v48, %s6731_s1  ;;  %6281 = vrot.lane.b32.xlu0 %v6911_v48, %s6732_s16 }
 0x25c   :  { %6291 = vrot.lane.b32.xlu1 %v6911_v48, %s6733_s21  ;;  %348 = vrot.lane.b32.xlu0 %v245_v47, %s6734_s22 }
 0x260   :  { %6296 = vrot.lane.b32.xlu1 %v6911_v48, %s6735_s6  ;;  %439 = vrot.lane.b32.xlu0 %v245_v47, %s6736_s30 }
 0x264   :  { %350 = vrot.lane.b32.xlu1 %v5589_v46, %s6734_s22  ;;  %530 = vrot.lane.b32.xlu0 %v245_v47, %s6737_s0 }
 0x268   :  { %441 = vrot.lane.b32.xlu1 %v5589_v46, %s6736_s30 }
 0x26c   :  { %532 = vrot.lane.b32.xlu1 %v5589_v46, %s6737_s0 }
 0x2ca   :  { %v6287_v49 = vpop.permute.xlu1 %6286  ;;  %v6282_v50 = vpop.permute.xlu0 %6281 }
 0x2cb   :  { %v6284_v51 = vunpack.i.h.bf16 %v6282_v50  ;;  %v6283_v52 = vunpack.i.l.bf16 %v6282_v50  ;;  %v6289_v53 = vunpack.i.h.bf16 %v6287_v49  ;;  %v6288_v54 = vunpack.i.l.bf16 %v6287_v49 }
 0x2cd   :  { %v5981_v56 = vpack.c.bf16 %v6284_v51, %v6283_v52  ;;  %v5987_v57 = vpack.c.bf16 %v6289_v53, %v6288_v54 }
 0x2ce   :  { %v6292_v58 = vpop.permute.xlu1 %6291  ;;  %v349_v59 = vpop.permute.xlu0 %348 }
 0x2cf   :  { %v6294_v60 = vunpack.i.h.bf16 %v6292_v58  ;;  %v6293_v61 = vunpack.i.l.bf16 %v6292_v58  ;;  %5983 = vmatprep.subr.msk.bf16.mxu1 %vm6929_vm6, %v5981_v56  ;;  %5989 = vmatprep.subr.msk.bf16.mxu0 %vm6929_vm6, %v5987_v57 }
 0x2d0   :  { %5601 = vmatprep.mubr.msk.f32.mxu0 %vm264_vm5, %v349_v59  ;;  %5986 = vmatpush3.bf16.xpose.msk.msra.mxu1 %vm6929_vm6, %v5981_v56 }
 0x2d1   :  { %v5993_v62 = vpack.c.bf16 %v6294_v60, %v6293_v61  ;;  %5992 = vmatpush3.bf16.xpose.msk.msra.mxu0 %vm6929_vm6, %v5987_v57 }
 0x2d2   :  { %v6297_v63 = vpop.permute.xlu1 %6296  ;;  %v440_v2 = vpop.permute.xlu0 %439 }
 0x2d3   :  { %v6299_v3 = vunpack.i.h.bf16 %v6297_v63  ;;  %v6298_v4 = vunpack.i.l.bf16 %v6297_v63  ;;  %5995 = vmatprep.subr.msk.bf16.mxu1 %vm6929_vm6, %v5993_v62 }
 0x2d5   :  { %v5999_v5 = vpack.c.bf16 %v6299_v3, %v6298_v4 }
 0x2d6   :  { %v351_v6 = vpop.permute.xlu1 %350  ;;  %v531_v7 = vpop.permute.xlu0 %530 }
 0x2d7   :  { %5595 = vmatmul.mubr.msk.f32.vlgmr.msra.gmra.mrb[2].mxu1 %vm264_vm5, %v5589_v46  ;;  %6001 = vmatprep.subr.msk.bf16.mxu0 %vm6929_vm6, %v5999_v5 }
 0x2d8   :  { %5602 = vmatmul.mubr.msk.f32.vlgmr.msra.gmra.mrb[0].mxu0 %vm264_vm5, %v351_v6  ;;  %5998 = vmatpush3.bf16.xpose.msk.msra.mxu1 %vm6929_vm6, %v5993_v62 }
 0x2d9   :  { %5608 = vmatprep.mubr.msk.f32.mxu1 %vm264_vm5, %v440_v2  ;;  %6004 = vmatpush3.bf16.xpose.msk.msra.mxu0 %vm6929_vm6, %v5999_v5 }
 0x2da   :  { %5615 = vmatprep.mubr.msk.f32.mxu0 %vm264_vm5, %v531_v7  ;;  %v442_v8 = vpop.permute.xlu1 %441 }
 0x2de   :  { %v533_v9 = vpop.permute.xlu1 %532 }
 0x2df   :  { %5609 = vmatmul.mubr.msk.f32.vlgmr.msra.gmra.mrb[4].mxu1 %vm264_vm5, %v442_v8 }
 0x2e0   :  { %5616 = vmatmul.mubr.msk.f32.vlgmr.msra.gmra.mrb[2].mxu0 %vm264_vm5, %v533_v9 }
 0x3aa   :  { %v5596_v10 = vpop.f32.mrb[2].mxu1 }
 0x3ab   :  { %v622_v12 = vmul.f32 0.35355338, %v5596_v10  ;;  %v5603_v13 = vpop.f32.mrb[0].mxu0  ;;  %v339_v14 = vpop.f32.mrb[3].mxu1 }
 0x3ac   :  { %v624_v16 = vmul.f32 0.35355338, %v5603_v13  ;;  %v621_v17 = vmul.f32 0.35355338, %v339_v14  ;;  %v430_v18 = vpop.f32.mrb[1].mxu0 }
 0x3ad   :  { %v630_v19 = vadd.f32 %v622_v12, %v94_v11  ;;  %v623_v23 = vmul.f32 0.35355338, %v430_v18 }
 0x3ae   :  { %v632_v21 = vadd.f32 %v624_v16, %v96_v15  ;;  %v629_v25 = vadd.f32 %v621_v17, %v93_v20 }
 0x3af   :  { %v641_v22 = vsel %vm637_vm7, %v630_v19, -inf  ;;  %v631_v37 = vadd.f32 %v623_v23, %v95_v26 }
 0x3b0   :  { %v647_v24 = vsel %vm637_vm7, %v632_v21, -inf  ;;  %642 = vmax.xlane.f32.xlu1 %v641_v22  ;;  %v638_v36 = vsel %vm637_vm7, %v629_v25, -inf }
 0x3b1   :  { %648 = vmax.xlane.f32.xlu0 %v647_v24  ;;  %v644_v43 = vsel %vm637_vm7, %v631_v37, -inf }
 0x3b2   :  { %v5610_v27 = vpop.f32.mrb[4].mxu1 }
 0x3b3   :  { %v626_v29 = vmul.f32 0.35355338, %v5610_v27  ;;  %v5617_v30 = vpop.f32.mrb[2].mxu0  ;;  %v521_v31 = vpop.f32.mrb[5].mxu1 }
 0x3b4   :  { %v628_v33 = vmul.f32 0.35355338, %v5617_v30  ;;  %v625_v34 = vmul.f32 0.35355338, %v521_v31  ;;  %v612_v35 = vpop.f32.mrb[3].mxu0 }
 0x3b5   :  { %639 = vmax.xlane.f32.xlu0 %v638_v36  ;;  %v634_v38 = vadd.f32 %v626_v29, %v98_v28  ;;  %v627_v42 = vmul.f32 0.35355338, %v612_v35 }
 0x3b6   :  { %v636_v41 = vadd.f32 %v628_v33, %v100_v32  ;;  %v633_v44 = vadd.f32 %v625_v34, %v97_v39 }
 0x3b7   :  { %v653_v40 = vsel %vm637_vm7, %v634_v38, -inf  ;;  %v635_v49 = vadd.f32 %v627_v42, %v99_v45 }
 0x3b8   :  { %654 = vmax.xlane.f32.xlu1 %v653_v40  ;;  %v659_v46 = vsel %vm637_vm7, %v636_v41, -inf  ;;  %v650_v47 = vsel %vm637_vm7, %v633_v44, -inf }
 0x3b9   :  { %645 = vmax.xlane.f32.xlu0 %v644_v43  ;;  %v656_v50 = vsel %vm637_vm7, %v635_v49, -inf }
 0x3bc   :  { %660 = vmax.xlane.f32.xlu1 %v659_v46 }
 0x3bd   :  { %651 = vmax.xlane.f32.xlu0 %v650_v47 }
 0x3c1   :  { %657 = vmax.xlane.f32.xlu0 %v656_v50 }
 0x43d   :  { %v643_v51 = vpop.xlane.xlu1 %642 }
 0x43e   :  { %v649_v52 = vpop.xlane.xlu0 %648  ;;  %v663_v53 = vsub.f32 %v630_v19, %v643_v51 }
 0x43f   :  { %v665_v54 = vsub.f32 %v632_v21, %v649_v52 }
 0x440   :  { %v672_v56 = vmul.f32 1.442695, %v663_v53 }
 0x441   :  { %v676_v57 = vmul.f32 1.442695, %v665_v54 }
 0x442   :  { %6438 = vpow2.f32 %v672_v56  ;;  %v640_v58 = vpop.xlane.xlu0 %639 }
 0x443   :  { %v662_v59 = vsub.f32 %v629_v25, %v640_v58  ;;  %6440 = vpow2.f32 %v676_v57 }
 0x445   :  { %v670_v60 = vmul.f32 1.442695, %v662_v59  ;;  %v655_v61 = vpop.xlane.xlu1 %654 }
 0x446   :  { %v646_v62 = vpop.xlane.xlu0 %645  ;;  %v667_v63 = vsub.f32 %v634_v38, %v655_v61 }
 0x447   :  { %6442 = vpow2.f32 %v670_v60  ;;  %v664_v2 = vsub.f32 %v631_v37, %v646_v62 }
 0x448   :  { %v680_v3 = vmul.f32 1.442695, %v667_v63 }
 0x449   :  { %v674_v4 = vmul.f32 1.442695, %v664_v2  ;;  %v661_v5 = vpop.xlane.xlu1 %660 }
 0x44a   :  { %6444 = vpow2.f32 %v680_v3  ;;  %v669_v6 = vsub.f32 %v636_v41, %v661_v5  ;;  %v652_v7 = vpop.xlane.xlu0 %651 }
 0x44b   :  { %6446 = vpow2.f32 %v674_v4  ;;  %v666_v8 = vsub.f32 %v633_v44, %v652_v7 }
 0x44c   :  { %v6988_v9 = vpop.eup %6438  ;;  %v684_v10 = vmul.f32 1.442695, %v669_v6 }
 0x44d   :  { %v678_v11 = vmul.f32 1.442695, %v666_v8  ;;  %v689_v12 = vsel %vm637_vm7, %v6988_v9, 0.0  ;;  %v6992_v13 = vpop.eup %6440 }
 0x44e   :  { %6448 = vpow2.f32 %v684_v10  ;;  %v658_v14 = vpop.xlane.xlu0 %657  ;;  %690 = vadd.xlane.f32.xlu1 %v689_v12  ;;  %v695_v18 = vsel %vm637_vm7, %v6992_v13, 0.0  ;;  %v255_v10 = vld [vmem:[%s7730_s7 + $0x8] sm:$0xff]  ;;  %v256_v12 = vld [vmem:[%s7730_s7 + $0x10] sm:$0xff] }
 0x44f   :  { %6450 = vpow2.f32 %v678_v11  ;;  %v668_v15 = vsub.f32 %v635_v49, %v658_v14 }
 0x451   :  { %v6443_v16 = vpop.eup %6442  ;;  %v682_v17 = vmul.f32 1.442695, %v668_v15 }
 0x452   :  { %696 = vadd.xlane.f32.xlu1 %v695_v18  ;;  %v686_v19 = vsel %vm637_vm7, %v6443_v16, 0.0 }
 0x453   :  { %6452 = vpow2.f32 %v682_v17  ;;  %687 = vadd.xlane.f32.xlu0 %v686_v19 }
 0x454   :  { %v6997_v20 = vpop.eup %6444 }
 0x455   :  { %v6999_v21 = vpop.eup %6446  ;;  %v701_v22 = vsel %vm637_vm7, %v6997_v20, 0.0 }
 0x456   :  { %702 = vadd.xlane.f32.xlu1 %v701_v22  ;;  %v692_v23 = vsel %vm637_vm7, %v6999_v21, 0.0 }
 0x457   :  { %693 = vadd.xlane.f32.xlu0 %v692_v23 }
 0x458   :  { %v7005_v24 = vpop.eup %6448 }
 0x459   :  { %v6451_v25 = vpop.eup %6450  ;;  %v707_v26 = vsel %vm637_vm7, %v7005_v24, 0.0 }
 0x45a   :  { %708 = vadd.xlane.f32.xlu1 %v707_v26  ;;  %v698_v27 = vsel %vm637_vm7, %v6451_v25, 0.0 }
 0x45b   :  { %699 = vadd.xlane.f32.xlu0 %v698_v27 }
 0x45d   :  { %v7010_v28 = vpop.eup %6452 }
 0x45e   :  { %v704_v29 = vsel %vm637_vm7, %v7010_v28, 0.0 }
 0x45f   :  { %705 = vadd.xlane.f32.xlu0 %v704_v29 }
 0x46b   :  { %6306 = vrot.lane.b32.xlu1 %v6911_v48, %s7740_s29  ;;  %s7749_s29 = smov 16  }
 0x46f   :  { %6311 = vrot.lane.b32.xlu1 %v6911_v48, %s6739_s15 }
 0x473   :  { %6316 = vrot.lane.b32.xlu1 %v6911_v48, %s7739_s17  ;;  %s7750_s17 = smov 24  }
 0x475   :  { %6301 = vrot.lane.b32.xlu0 %v6911_v48, %s6741_s18 }
 0x4db   :  { %v691_v30 = vpop.xlane.xlu1 %690 }
 0x4df   :  { %v697_v31 = vpop.xlane.xlu1 %696 }
 0x4e0   :  { %v688_v32 = vpop.xlane.xlu0 %687 }
 0x4e1   :  { %6454 = vrcp.f32 %v688_v32 }
 0x4e3   :  { %v703_v33 = vpop.xlane.xlu1 %702 }
 0x4e4   :  { %v694_v34 = vpop.xlane.xlu0 %693  ;;  %6456 = vrcp.f32 %v703_v33 }
 0x4e7   :  { %v709_v35 = vpop.xlane.xlu1 %708 }
 0x4e8   :  { %v700_v36 = vpop.xlane.xlu0 %699 }
 0x4e9   :  { %6458 = vrcp.f32 %v700_v36 }
 0x4ea   :  { %6460 = vrcp.f32 %v691_v30 }
 0x4eb   :  { %v6455_v37 = vpop.eup %6454  ;;  %6462 = vrcp.f32 %v694_v34  ;;  %v6307_v38 = vpop.permute.xlu1 %6306 }
 0x4ec   :  { %v706_v39 = vpop.xlane.xlu0 %705  ;;  %v711_v40 = vmul.f32 %v6455_v37, %v6443_v16  ;;  %6464 = vrcp.f32 %v697_v31  ;;  %v6309_v44 = vunpack.i.h.bf16 %v6307_v38  ;;  %v6308_v45 = vunpack.i.l.bf16 %v6307_v38 }
 0x4ed   :  { %6466 = vrcp.f32 %v706_v39 }
 0x4ee   :  { %5622 = vmatprep.mubr.msk.f32.mxu1 %vm637_vm7, %v711_v40  ;;  %v6457_v49 = vpop.eup %6456  ;;  %6468 = vrcp.f32 %v709_v35  ;;  %v6009_v60 = vpack.c.bf16 %v6309_v44, %v6308_v45 }
 0x4ef   :  { %v6312_v48 = vpop.permute.xlu1 %6311  ;;  %v721_v61 = vmul.f32 %v6457_v49, %v6997_v20  ;;  %v1333_v49 = vld [vmem:[#allocation5] sm:$0xff] }
 0x4f0   :  { %v6314_v41 = vunpack.i.h.bf16 %v6312_v48  ;;  %v6313_v42 = vunpack.i.l.bf16 %v6312_v48  ;;  %v6302_v43 = vpop.permute.xlu0 %6301 }
 0x4f1   :  { %v6304_v46 = vunpack.i.h.bf16 %v6302_v43  ;;  %v6303_v47 = vunpack.i.l.bf16 %v6302_v43 }
 0x4f2   :  { %v6013_v50 = vpack.c.bf16 %v6314_v41, %v6313_v42 }
 0x4f3   :  { %v6459_v51 = vpop.eup %6458  ;;  %v6317_v52 = vpop.permute.xlu1 %6316  ;;  %v6005_v53 = vpack.c.bf16 %v6304_v46, %v6303_v47 }
 0x4f4   :  { %v6461_v54 = vpop.eup %6460  ;;  %6014 = vmatprep.subr.bf16.mxu0 %v6013_v50  ;;  %v719_v56 = vmul.f32 %v6459_v51, %v6451_v25  ;;  %v6319_v58 = vunpack.i.h.bf16 %v6317_v52  ;;  %v6318_v59 = vunpack.i.l.bf16 %v6317_v52  ;;  %v1335_v52 = vld [vmem:[#allocation5 + $0x10] sm:$0xff] }
 0x4f5   :  { %v6463_v57 = vpop.eup %6462  ;;  %6006 = vmatprep.subr.bf16.mxu1 %v6005_v53  ;;  %6016 = vmatpush3.bf16.msra.mxu0 %v6013_v50  ;;  %v713_v62 = vmul.f32 %v6461_v54, %v6988_v9  ;;  %v254_v9 = vld [vmem:[%s7730_s7] sm:$0xff]  ;;  %v1334_v50 = vld [vmem:[#allocation5 + $0x8] sm:$0xff] }
 0x4f6   :  { %6008 = vmatpush3.bf16.msra.mxu1 %v6005_v53  ;;  %5636 = vmatprep.mubr.msk.f32.mxu0 %vm637_vm7, %v719_v56  ;;  %v6465_v63 = vpop.eup %6464  ;;  %v715_v2 = vmul.f32 %v6463_v57, %v6999_v21  ;;  %v6017_v4 = vpack.c.bf16 %v6319_v58, %v6318_v59  ;;  %v6021_v11 = vpack.c.bf16 %v255_v10, %v254_v9  ;;  %v1336_v53 = vld [vmem:[#allocation5 + $0x18] sm:$0xff]  ;;  %v91_v56 = vld [vmem:[#allocation2] sm:$0xff] }
 0x4f7   :  { %6010 = vmatprep.subr.bf16.mxu1 %v6009_v60  ;;  %v6467_v3 = vpop.eup %6466  ;;  %v717_v5 = vmul.f32 %v6465_v63, %v6992_v13  ;;  %v257_v13 = vld [vmem:[%s7730_s7 + $0x18] sm:$0xff]  ;;  %v6037_v51 = vpack.c.bf16 %v1334_v50, %v1333_v49  ;;  %v6041_v54 = vpack.c.bf16 %v1336_v53, %v1335_v52  ;;  %v92_v57 = vld [vmem:[#allocation2 + $0x8] sm:$0xff]  ;;  %v1248_v58 = vld [vmem:[%s7728_s5] sm:$0xff] }
 0x4f8   :  { %5637 = vmatmul.mubr.msk.f32.vlgmr.msra.gmra.mrb[4].mxu0 %vm637_vm7, %v721_v61  ;;  %v6469_v6 = vpop.eup %6468  ;;  %v723_v7 = vmul.f32 %v6467_v3, %v7010_v28  ;;  %6022 = vmatprep.subr.bf16.mxu0 %v6021_v11  ;;  %v6025_v14 = vpack.c.bf16 %v257_v13, %v256_v12  ;;  %v1249_v59 = vld [vmem:[%s7728_s5 + $0x8] sm:$0xff] }
 0x4f9   :  { %5623 = vmatmul.mubr.msk.f32.vlgmr.msra.gmra.mrb[6].mxu1 %vm637_vm7, %v713_v62  ;;  %v725_v8 = vmul.f32 %v6469_v6, %v7005_v24  ;;  %6024 = vmatpush3.bf16.msra.mxu0 %v6021_v11  ;;  %v6029_v61 = vpack.c.bf16 %v1249_v59, %v1248_v58  ;;  %v1251_v62 = vld [vmem:[%s7728_s5 + $0x18] sm:$0xff]  ;;  %v102_v53 = vld [vmem:[%s7726_s3 + $0x8] sm:$0xff] }
 0x4fa   :  { %6012 = vmatpush3.bf16.msra.mxu1 %v6009_v60  ;;  %5629 = vmatprep.mubr.msk.f32.mxu1 %vm637_vm7, %v715_v2  ;;  %v1250_v60 = vld [vmem:[%s7728_s5 + $0x10] sm:$0xff] }
 0x4fb   :  { %6018 = vmatprep.subr.bf16.mxu1 %v6017_v4  ;;  %6026 = vmatprep.subr.bf16.mxu0 %v6025_v14  ;;  %v6033_v63 = vpack.c.bf16 %v1251_v62, %v1250_v60 }
 0x4fd   :  { %5630 = vmatmul.mubr.msk.f32.vlgmr.msra.gmra.mrb[8].mxu1 %vm637_vm7, %v717_v5  ;;  %6028 = vmatpush3.bf16.msra.mxu0 %v6025_v14 }
 0x4fe   :  { %6020 = vmatpush3.bf16.msra.mxu1 %v6017_v4  ;;  %5643 = vmatprep.mubr.msk.f32.mxu1 %vm637_vm7, %v723_v7 }
 0x4ff   :  { %6038 = vmatprep.subr.bf16.mxu0 %v6037_v51  ;;  %6030 = vmatprep.subr.bf16.mxu1 %v6029_v61 }
 0x501   :  { %5644 = vmatmul.mubr.msk.f32.vlgmr.msra.gmra.mrb[10].mxu1 %vm637_vm7, %v725_v8 }
 0x502   :  { %6032 = vmatpush3.bf16.msra.mxu1 %v6029_v61 }
 0x503   :  { %6034 = vmatprep.subr.bf16.mxu1 %v6033_v63 }
 0x506   :  { %6036 = vmatpush3.bf16.msra.mxu1 %v6033_v63 }
 0x5cb   :  { %v5638_v15 = vpop.f32.mrb[4].mxu0 }
 0x5cc   :  { %v5624_v16 = vpop.f32.mrb[6].mxu1  ;;  %v978_v17 = vpop.f32.mrb[5].mxu0 }
 0x5cd   :  { %v804_v18 = vpop.f32.mrb[7].mxu1 }
 0x5d0   :  { %v5631_v19 = vpop.f32.mrb[8].mxu1 }
 0x5d1   :  { %1078 = vrot.lane.b32.xlu1 %v5631_v19, %s6729_s26  ;;  %v891_v20 = vpop.f32.mrb[9].mxu1 }
 0x5d2   :  { %1076 = vrot.lane.b32.xlu0 %v891_v20, %s6729_s26 }
 0x5d4   :  { %v5645_v21 = vpop.f32.mrb[10].mxu1 }
 0x5d5   :  { %1086 = vrot.lane.b32.xlu1 %v5638_v15, %s7743_s19  ;;  %v1065_v22 = vpop.f32.mrb[11].mxu1 }
 0x5d6   :  { %1084 = vrot.lane.b32.xlu0 %v978_v17, %s7743_s19 }
 0x5d9   :  { %1094 = vrot.lane.b32.xlu1 %v5645_v21, %s7741_s25  ;;  %v5208_v21 = vld [vmem:[%s7736_s13 + $0x1] ss:$0 sm:$0xff] }
 0x5da   :  { %1092 = vrot.lane.b32.xlu0 %v1065_v22, %s7741_s25 }
 0x643   :  { %v1079_v23 = vpop.permute.xlu1 %1078 }
 0x644   :  { %v1077_v24 = vpop.permute.xlu0 %1076  ;;  %v1099_v29 = vsel %vm264_vm5, %v5624_v16, %v1079_v23 }
 0x645   :  { %v1098_v27 = vsel %vm264_vm5, %v804_v18, %v1077_v24  ;;  %v5207_v18 = vld [vmem:[%s7735_s12 + $0x1] ss:$0 sm:$0xff] }
 0x647   :  { %v1087_v25 = vpop.permute.xlu1 %1086 }
 0x648   :  { %v1085_v26 = vpop.permute.xlu0 %1084  ;;  %v1101_v32 = vsel %vm637_vm7, %v1099_v29, %v1087_v25 }
 0x649   :  { %v1100_v30 = vsel %vm637_vm7, %v1098_v27, %v1085_v26 }
 0x64b   :  { %v1095_v28 = vpop.permute.xlu1 %1094 }
 0x64c   :  { %v1093_v31 = vpop.permute.xlu0 %1092  ;;  %v1104_v34 = vsel %vm1102_vm8, %v1101_v32, %v1095_v28 }
 0x64d   :  { %v1103_v33 = vsel %vm1102_vm8, %v1100_v30, %v1093_v31 }
 0x64e   :  { %5654 = vmatprep.mubr.msk.f32.mxu0 %vm111_vm0, %v1103_v33 }
 0x64f   :  { %5655 = vmatmul.mubr.msk.f32.vlgmr.msra.gmra.mrb[6].mxu0 %vm111_vm0, %v1104_v34 }
 0x650   :  { %6040 = vmatpush3.bf16.msra.mxu0 %v6037_v51  ;;  %5676 = vmatprep.mubr.msk.f32.mxu0 %vm111_vm0, %v91_v56 }
 0x651   :  { %6042 = vmatprep.subr.bf16.mxu0 %v6041_v54 }
 0x654   :  { %6044 = vmatpush3.bf16.msra.mxu0 %v6041_v54 }
 0x657   :  { %5677 = vmatmul.mubr.msk.f32.vlgmr.msra.gmra.mrb[8].mxu0 %vm111_vm0, %v92_v57  ;;  %v101_v57 = vld [vmem:[%s7726_s3] sm:$0xff] }
 0x722   :  { %v5656_v35 = vpop.f32.mrb[6].mxu0 }
 0x723   :  { %v7063_v36 = vadd.f32 %v5656_v35, %v6880_v1  ;;  %v1177_v37 = vpop.f32.mrb[7].mxu0 }
 0x724   :  { %v7066_v38 = vadd.f32 %v1177_v37, %v6875_v0 }
 0x725   :  { %v1195_v39 = vsel %vm111_vm0, %v7063_v36, 0.0 }
 0x726   :  { %1196 = vadd.xlane.f32.xlu1 %v1195_v39  ;;  %v1192_v40 = vsel %vm111_vm0, %v7066_v38, 0.0 }
 0x727   :  { %1193 = vadd.xlane.f32.xlu0 %v1192_v40 }
 0x72a   :  { %v5678_v28 = vpop.f32.mrb[8].mxu0 }
 0x72b   :  { %v1409_v29 = vpop.f32.mrb[9].mxu0 }
 0x72c   :  { %v7098_v30 = vpack.i.bf16 %v5678_v28, %v1409_v29  ;;  %v6045_v31 = vpack.c.bf16 %v5678_v28, %v1409_v29 }
 0x72e   :  { %6047 = vmatprep.subr.msk.bf16.mxu1 %vm6929_vm6, %v6045_v31 }
 0x737   :  { %6326 = vrot.lane.b32.xlu1 %v7098_v30, %s6736_s30 }
 0x73b   :  { %6331 = vrot.lane.b32.xlu1 %v7098_v30, %s6737_s0 }
 0x7b3   :  { %v1197_v48 = vpop.xlane.xlu1 %1196 }
 0x7b4   :  { %v1199_v41 = vmul.f32 0.03125, %v1197_v48  ;;  %v1194_v42 = vpop.xlane.xlu0 %1193 }
 0x7b5   :  { %v1198_v43 = vmul.f32 0.03125, %v1194_v42 }
 0x7b6   :  { %v1201_v44 = vsub.f32 %v7063_v36, %v1199_v41 }
 0x7b7   :  { %v1200_v1 = vsub.f32 %v7066_v38, %v1198_v43  ;;  %v6327_v32 = vpop.permute.xlu1 %6326 }
 0x7b8   :  { %v1203_v46 = vmul.f32 %v1201_v44, %v1201_v44  ;;  %v1219_v23 = vmul.f32 %v5207_v18, %v1201_v44  ;;  %v6329_v34 = vunpack.i.h.bf16 %v6327_v32  ;;  %v6328_v35 = vunpack.i.l.bf16 %v6327_v32 }
 0x7b9   :  { %v1202_v45 = vmul.f32 %v1200_v1, %v1200_v1  ;;  %v1218_v19 = vmul.f32 %v5207_v18, %v1200_v1 }
 0x7ba   :  { %v1207_v47 = vsel %vm111_vm0, %v1203_v46, 0.0  ;;  %v6057_v40 = vpack.c.bf16 %v6329_v34, %v6328_v35 }
 0x7bb   :  { %v1204_v0 = vsel %vm111_vm0, %v1202_v45, 0.0  ;;  %v6332_v41 = vpop.permute.xlu1 %6331 }
 0x7bc   :  { %1205 = vadd.xlane.f32.xlu0 %v1204_v0  ;;  %v6334_v42 = vunpack.i.h.bf16 %v6332_v41  ;;  %v6333_v43 = vunpack.i.l.bf16 %v6332_v41 }
 0x7be   :  { %v6063_v44 = vpack.c.bf16 %v6334_v42, %v6333_v43 }
 0x7c0   :  { %1208 = vadd.xlane.f32.xlu0 %v1207_v47 }
 0x7d6   :  { %6321 = vrot.lane.b32.xlu0 %v7098_v30, %s6734_s22 }
 0x849   :  { %v1206_v2 = vpop.xlane.xlu0 %1205 }
 0x84a   :  { %v1210_v3 = vmul.f32 0.032258064, %v1206_v2  ;;  %v104_v2 = vld [vmem:[%s7726_s3 + $0x18] sm:$0xff] }
 0x84c   :  { %6470 = vrsqrt.f32 %v1210_v3  ;;  %vm1222_vm9 = vcmp.eq.f32.partialorder %v1210_v3, inf  ;;  %v1225_v8 = vand.u32 2147483648, %v1210_v3  ;;  %vm1224_vm10 = vcmp.eq.f32.partialorder %v1210_v3, 0.0 }
 0x84d   :  { %v1209_v4 = vpop.xlane.xlu0 %1208 }
 0x84e   :  { %v1211_v5 = vmul.f32 0.032258064, %v1209_v4 }
 0x850   :  { %6472 = vrsqrt.f32 %v1211_v5  ;;  %vm1229_vm11 = vcmp.eq.f32.partialorder %v1211_v5, inf  ;;  %v1232_v14 = vand.u32 2147483648, %v1211_v5  ;;  %vm1231_vm12 = vcmp.eq.f32.partialorder %v1211_v5, 0.0 }
 0x851   :  { %v6322_v33 = vpop.permute.xlu0 %6321 }
 0x852   :  { %v6324_v37 = vunpack.i.h.bf16 %v6322_v33  ;;  %v6323_v39 = vunpack.i.l.bf16 %v6322_v33 }
 0x854   :  { %v6051_v48 = vpack.c.bf16 %v6324_v37, %v6323_v39 }
 0x856   :  { %v6471_v6 = vpop.eup %6470  ;;  %6053 = vmatprep.subr.msk.bf16.mxu0 %vm6929_vm6, %v6051_v48 }
 0x857   :  { %v1221_v7 = vmul.f32 %v6471_v6, %v1210_v3  ;;  %6056 = vmatpush3.bf16.xpose.msk.msra.mxu0 %vm6929_vm6, %v6051_v48  ;;  %v103_v6 = vld [vmem:[%s7726_s3 + $0x10] sm:$0xff] }
 0x858   :  { %6065 = vmatprep.subr.msk.bf16.mxu0 %vm6929_vm6, %v6063_v44 }
 0x859   :  { %v1223_v9 = vsel %vm1222_vm9, %v1210_v3, %v1221_v7 }
 0x85a   :  { %v6473_v10 = vpop.eup %6472  ;;  %v1226_v11 = vsel %vm1224_vm10, %v1225_v8, %v1223_v9 }
 0x85b   :  { %v1228_v12 = vmul.f32 %v6473_v10, %v1211_v5  ;;  %v1234_v13 = vadd.f32 1e-06, %v1226_v11 }
 0x85d   :  { %v1230_v15 = vsel %vm1229_vm11, %v1211_v5, %v1228_v12  ;;  %6474 = vrcp.f32 %v1234_v13  ;;  %v105_v13 = vld [vmem:[%s7726_s3 + $0x20] sm:$0xff] }
 0x85e   :  { %v1233_v16 = vsel %vm1231_vm12, %v1232_v14, %v1230_v15  ;;  %v106_v15 = vld [vmem:[%s7726_s3 + $0x28] sm:$0xff] }
 0x85f   :  { %v1235_v17 = vadd.f32 1e-06, %v1233_v16 }
 0x861   :  { %6476 = vrcp.f32 %v1235_v17 }
 0x867   :  { %v6475_v20 = vpop.eup %6474 }
 0x868   :  { %v1237_v22 = vmul.f32 %v6475_v20, %v1218_v19 }
 0x86a   :  { %v1246_v24 = vadd.f32 %v5208_v21, %v1237_v22  ;;  %v107_v22 = vld [vmem:[%s7726_s3 + $0x30] sm:$0xff] }
 0x86b   :  { %v6477_v25 = vpop.eup %6476 }
 0x86c   :  { %v1239_v26 = vmul.f32 %v6477_v25, %v1219_v23  ;;  %5665 = vmatprep.mubr.msk.f32.mxu1 %vm111_vm0, %v1246_v24  ;;  %v108_v25 = vld [vmem:[%s7726_s3 + $0x38] sm:$0xff] }
 0x86e   :  { %v1247_v27 = vadd.f32 %v5208_v21, %v1239_v26 }
 0x870   :  { %5666 = vmatmul.mubr.msk.f32.vlgmr.msra.gmra.mrb[12].mxu1 %vm111_vm0, %v1247_v27 }
 0x871   :  { %6050 = vmatpush3.bf16.xpose.msk.msra.mxu1 %vm6929_vm6, %v6045_v31 }
 0x872   :  { %6059 = vmatprep.subr.msk.bf16.mxu1 %vm6929_vm6, %v6057_v40 }
 0x943   :  { %v5667_v1 = vpop.f32.mrb[12].mxu1 }
 0x944   :  { %1512 = vrot.lane.b32.xlu0 %v5667_v1, %s6734_s22  ;;  %v1324_v45 = vpop.f32.mrb[13].mxu1 }
 0x945   :  { %1510 = vrot.lane.b32.xlu1 %v1324_v45, %s6734_s22  ;;  %5683 = vmatprep.mubr.msk.f32.mxu1 %vm264_vm5, %v1324_v45 }
 0x946   :  { %5684 = vmatmul.mubr.msk.f32.vlgmr.msra.gmra.mrb[14].mxu1 %vm264_vm5, %v5667_v1 }
 0x947   :  { %6062 = vmatpush3.bf16.xpose.msk.msra.mxu1 %vm6929_vm6, %v6057_v40 }
 0x948   :  { %1603 = vrot.lane.b32.xlu0 %v5667_v1, %s6736_s30 }
 0x949   :  { %1601 = vrot.lane.b32.xlu1 %v1324_v45, %s6736_s30 }
 0x94c   :  { %1694 = vrot.lane.b32.xlu0 %v5667_v1, %s6737_s0 }
 0x94d   :  { %1692 = vrot.lane.b32.xlu1 %v1324_v45, %s6737_s0 }
 0x9b6   :  { %v1513_v0 = vpop.permute.xlu0 %1512 }
 0x9b7   :  { %v1511_v46 = vpop.permute.xlu1 %1510 }
 0x9b8   :  { %5690 = vmatprep.mubr.msk.f32.mxu0 %vm264_vm5, %v1511_v46 }
 0x9b9   :  { %5691 = vmatmul.mubr.msk.f32.vlgmr.msra.gmra.mrb[10].mxu0 %vm264_vm5, %v1513_v0 }
 0x9ba   :  { %6068 = vmatpush3.bf16.xpose.msk.msra.mxu0 %vm6929_vm6, %v6063_v44  ;;  %v1604_v47 = vpop.permute.xlu0 %1603 }
 0x9bb   :  { %v1602_v49 = vpop.permute.xlu1 %1601 }
 0x9bc   :  { %5697 = vmatprep.mubr.msk.f32.mxu1 %vm264_vm5, %v1602_v49 }
 0x9bd   :  { %5698 = vmatmul.mubr.msk.f32.vlgmr.msra.gmra.mrb[16].mxu1 %vm264_vm5, %v1604_v47 }
 0x9be   :  { %v1695_v51 = vpop.permute.xlu0 %1694 }
 0x9bf   :  { %v1693_v50 = vpop.permute.xlu1 %1692 }
 0x9c0   :  { %5704 = vmatprep.mubr.msk.f32.mxu0 %vm264_vm5, %v1693_v50 }
 0x9c1   :  { %5705 = vmatmul.mubr.msk.f32.vlgmr.msra.gmra.mrb[12].mxu0 %vm264_vm5, %v1695_v51 }
 0xa19   :  { %v5685_v52 = vpop.f32.mrb[14].mxu1 }
 0xa1a   :  { %v1784_v54 = vmul.f32 0.35355338, %v5685_v52  ;;  %v1501_v56 = vpop.f32.mrb[15].mxu1 }
 0xa1b   :  { %v1783_v58 = vmul.f32 0.35355338, %v1501_v56 }
 0xa1c   :  { %v1792_v59 = vadd.f32 %v1784_v54, %v102_v53 }
 0xa1d   :  { %v1791_v60 = vadd.f32 %v1783_v58, %v101_v57 }
 0xa1e   :  { %v1802_v61 = vsel %vm637_vm7, %v1792_v59, -inf }
 0xa1f   :  { %1803 = vmax.xlane.f32.xlu0 %v1802_v61  ;;  %v1799_v62 = vsel %vm637_vm7, %v1791_v60, -inf }
 0xa20   :  { %1800 = vmax.xlane.f32.xlu1 %v1799_v62 }
 0xa8c   :  { %v5692_v63 = vpop.f32.mrb[10].mxu0 }
 0xa8d   :  { %v1786_v3 = vmul.f32 0.35355338, %v5692_v63  ;;  %v1592_v4 = vpop.f32.mrb[11].mxu0 }
 0xa8e   :  { %v1785_v5 = vmul.f32 0.35355338, %v1592_v4 }
 0xa8f   :  { %v1794_v7 = vadd.f32 %v1786_v3, %v104_v2 }
 0xa90   :  { %v5699_v8 = vpop.f32.mrb[16].mxu1  ;;  %v1793_v12 = vadd.f32 %v1785_v5, %v103_v6 }
 0xa91   :  { %v1788_v9 = vmul.f32 0.35355338, %v5699_v8  ;;  %v1683_v10 = vpop.f32.mrb[17].mxu1  ;;  %v1808_v11 = vsel %vm637_vm7, %v1794_v7, -inf }
 0xa92   :  { %v1787_v14 = vmul.f32 0.35355338, %v1683_v10  ;;  %1809 = vmax.xlane.f32.xlu0 %v1808_v11  ;;  %v1805_v20 = vsel %vm637_vm7, %v1793_v12, -inf }
 0xa93   :  { %v1796_v21 = vadd.f32 %v1788_v9, %v106_v15 }
 0xa94   :  { %v5706_v16 = vpop.f32.mrb[12].mxu0  ;;  %v1795_v17 = vadd.f32 %v1787_v14, %v105_v13 }
 0xa95   :  { %v1790_v18 = vmul.f32 0.35355338, %v5706_v16  ;;  %v1774_v19 = vpop.f32.mrb[13].mxu0  ;;  %v1814_v27 = vsel %vm637_vm7, %v1796_v21, -inf }
 0xa96   :  { %v1789_v23 = vmul.f32 0.35355338, %v1774_v19  ;;  %1806 = vmax.xlane.f32.xlu0 %v1805_v20  ;;  %v1811_v24 = vsel %vm637_vm7, %v1795_v17, -inf }
 0xa97   :  { %1812 = vmax.xlane.f32.xlu1 %v1811_v24  ;;  %v1798_v28 = vadd.f32 %v1790_v18, %v108_v25 }
 0xa98   :  { %v7165_v26 = vadd.f32 %v1789_v23, %v107_v22 }
 0xa99   :  { %v1820_v31 = vsel %vm637_vm7, %v1798_v28, -inf }
 0xa9a   :  { %1815 = vmax.xlane.f32.xlu0 %v1814_v27  ;;  %v1817_v29 = vsel %vm637_vm7, %v7165_v26, -inf }
 0xa9b   :  { %1818 = vmax.xlane.f32.xlu1 %v1817_v29 }
 0xa9e   :  { %1821 = vmax.xlane.f32.xlu0 %v1820_v31 }
 0xaac   :  { %v1804_v32 = vpop.xlane.xlu0 %1803  ;;  %6336 = vrot.lane.b32.xlu1 %v7098_v30, %s6732_s16 }
 0xaad   :  { %v1824_v33 = vsub.f32 %v1792_v59, %v1804_v32  ;;  %v1801_v35 = vpop.xlane.xlu1 %1800 }
 0xaae   :  { %v1823_v37 = vsub.f32 %v1791_v60, %v1801_v35 }
 0xaaf   :  { %v1833_v34 = vmul.f32 1.442695, %v1824_v33 }
 0xab0   :  { %v1831_v48 = vmul.f32 1.442695, %v1823_v37 }
 0xab1   :  { %6478 = vpow2.f32 %v1833_v34 }
 0xab2   :  { %6480 = vpow2.f32 %v1831_v48 }
 0xabb   :  { %v7173_v39 = vpop.eup %6478 }
 0xabc   :  { %v1850_v40 = vsel %vm637_vm7, %v7173_v39, 0.0  ;;  %v6481_v41 = vpop.eup %6480 }
 0xabd   :  { %1851 = vadd.xlane.f32.xlu0 %v1850_v40  ;;  %v1847_v42 = vsel %vm637_vm7, %v6481_v41, 0.0 }
 0xad0   :  { %1848 = vadd.xlane.f32.xlu1 %v1847_v42 }
 0xb1f   :  { %v1810_v43 = vpop.xlane.xlu0 %1809 }
 0xb20   :  { %v1826_v44 = vsub.f32 %v1794_v7, %v1810_v43 }
 0xb22   :  { %v1837_v1 = vmul.f32 1.442695, %v1826_v44 }
 0xb23   :  { %v1807_v45 = vpop.xlane.xlu0 %1806 }
 0xb24   :  { %6482 = vpow2.f32 %v1837_v1  ;;  %v1825_v0 = vsub.f32 %v1793_v12, %v1807_v45  ;;  %v1813_v46 = vpop.xlane.xlu1 %1812 }
 0xb25   :  { %v1827_v47 = vsub.f32 %v1795_v17, %v1813_v46 }
 0xb26   :  { %v1835_v49 = vmul.f32 1.442695, %v1825_v0 }
 0xb27   :  { %v1839_v50 = vmul.f32 1.442695, %v1827_v47  ;;  %v1816_v51 = vpop.xlane.xlu0 %1815 }
 0xb28   :  { %6484 = vpow2.f32 %v1835_v49  ;;  %v1828_v52 = vsub.f32 %v1796_v21, %v1816_v51  ;;  %v1819_v53 = vpop.xlane.xlu1 %1818 }
 0xb29   :  { %6486 = vpow2.f32 %v1839_v50  ;;  %v1829_v11 = vsub.f32 %v7165_v26, %v1819_v53  ;;  %v5213_v53 = vld [vmem:[%s7730_s7 + $0x40] sm:$0xff] }
 0xb2a   :  { %v1841_v54 = vmul.f32 1.442695, %v1828_v52 }
 0xb2b   :  { %v1822_v56 = vpop.xlane.xlu0 %1821  ;;  %v1843_v13 = vmul.f32 1.442695, %v1829_v11 }
 0xb2c   :  { %6488 = vpow2.f32 %v1841_v54  ;;  %v1830_v57 = vsub.f32 %v1798_v28, %v1822_v56  ;;  %v6337_v58 = vpop.permute.xlu1 %6336  ;;  %v5214_v54 = vld [vmem:[%s7730_s7 + $0x48] sm:$0xff]  ;;  %v5215_v56 = vld [vmem:[%s7730_s7 + $0x50] sm:$0xff] }
 0xb2d   :  { %v6339_v59 = vunpack.i.h.bf16 %v6337_v58  ;;  %v6338_v60 = vunpack.i.l.bf16 %v6337_v58  ;;  %v5216_v58 = vld [vmem:[%s7730_s7 + $0x58] sm:$0xff] }
 0xb2e   :  { %v7178_v61 = vpop.eup %6482  ;;  %v1845_v62 = vmul.f32 1.442695, %v1830_v57  ;;  %v6085_v57 = vpack.c.bf16 %v5214_v54, %v5213_v53 }
 0xb2f   :  { %v1856_v63 = vsel %vm637_vm7, %v7178_v61, 0.0  ;;  %v6069_v2 = vpack.c.bf16 %v6339_v59, %v6338_v60  ;;  %v6089_v59 = vpack.c.bf16 %v5216_v58, %v5215_v56 }
 0xb30   :  { %6490 = vpow2.f32 %v1845_v62  ;;  %1857 = vadd.xlane.f32.xlu0 %v1856_v63 }
 0xb31   :  { %6070 = vmatprep.subr.bf16.mxu1 %v6069_v2 }
 0xb32   :  { %v6485_v3 = vpop.eup %6484  ;;  %6072 = vmatpush3.bf16.msra.mxu1 %v6069_v2 }
 0xb33   :  { %v1853_v4 = vsel %vm637_vm7, %v6485_v3, 0.0  ;;  %v6487_v5 = vpop.eup %6486 }
 0xb34   :  { %1854 = vadd.xlane.f32.xlu1 %v1853_v4  ;;  %v1859_v8 = vsel %vm637_vm7, %v6487_v5, 0.0 }
 0xb36   :  { %v6489_v6 = vpop.eup %6488 }
 0xb37   :  { %v1862_v7 = vsel %vm637_vm7, %v6489_v6, 0.0 }
 0xb38   :  { %1863 = vadd.xlane.f32.xlu0 %v1862_v7  ;;  %1860 = vadd.xlane.f32.xlu1 %v1859_v8 }
 0xb3a   :  { %v7185_v9 = vpop.eup %6490 }
 0xb3b   :  { %v1868_v10 = vsel %vm637_vm7, %v7185_v9, 0.0 }
 0xb3c   :  { %1869 = vadd.xlane.f32.xlu0 %v1868_v10 }
 0xb49   :  { %6346 = vrot.lane.b32.xlu1 %v7098_v30, %s6733_s21 }
 0xb4a   :  { %v1852_v12 = vpop.xlane.xlu0 %1851 }
 0xb4b   :  { %6492 = vrcp.f32 %v1852_v12 }
 0xb52   :  { %6341 = vrot.lane.b32.xlu0 %v7098_v30, %s6731_s1 }
 0xb55   :  { %v6493_v15 = vpop.eup %6492 }
 0xb56   :  { %v1874_v19 = vmul.f32 %v6493_v15, %v7173_v39 }
 0xb5d   :  { %v1849_v14 = vpop.xlane.xlu1 %1848 }
 0xb5e   :  { %6494 = vrcp.f32 %v1849_v14 }
 0xb5f   :  { %6496 = vpow2.f32 %v1843_v13 }
 0xb68   :  { %v6495_v16 = vpop.eup %6494 }
 0xb69   :  { %v6497_v17 = vpop.eup %6496  ;;  %v1872_v18 = vmul.f32 %v6495_v16, %v6481_v41 }
 0xb6a   :  { %v1865_v20 = vsel %vm637_vm7, %v6497_v17, 0.0 }
 0xb6b   :  { %5711 = vmatprep.mubr.msk.f32.mxu1 %vm637_vm7, %v1872_v18 }
 0xb6c   :  { %5712 = vmatmul.mubr.msk.f32.vlgmr.msra.gmra.mrb[18].mxu1 %vm637_vm7, %v1874_v19 }
 0xb6d   :  { %1866 = vadd.xlane.f32.xlu1 %v1865_v20 }
 0xb7e   :  { %6351 = vrot.lane.b32.xlu1 %v7098_v30, %s6735_s6 }
 0xbbd   :  { %v1858_v21 = vpop.xlane.xlu0 %1857 }
 0xbc1   :  { %v1855_v22 = vpop.xlane.xlu1 %1854 }
 0xbc2   :  { %6498 = vrcp.f32 %v1855_v22 }
 0xbc3   :  { %6500 = vrcp.f32 %v1858_v21 }
 0xbc5   :  { %v1864_v23 = vpop.xlane.xlu0 %1863  ;;  %v1861_v24 = vpop.xlane.xlu1 %1860 }
 0xbc6   :  { %6502 = vrcp.f32 %v1864_v23 }
 0xbc7   :  { %6504 = vrcp.f32 %v1861_v24 }
 0xbc9   :  { %v1870_v25 = vpop.xlane.xlu0 %1869  ;;  %v6347_v26 = vpop.permute.xlu1 %6346 }
 0xbca   :  { %v6349_v27 = vunpack.i.h.bf16 %v6347_v26  ;;  %v6348_v28 = vunpack.i.l.bf16 %v6347_v26  ;;  %6506 = vrcp.f32 %v1870_v25 }
 0xbcc   :  { %v6499_v29 = vpop.eup %6498  ;;  %v6077_v31 = vpack.c.bf16 %v6349_v27, %v6348_v28 }
 0xbcd   :  { %v6342_v32 = vpop.permute.xlu0 %6341  ;;  %v1876_v33 = vmul.f32 %v6499_v29, %v6485_v3  ;;  %v6501_v30 = vpop.eup %6500 }
 0xbce   :  { %v6344_v34 = vunpack.i.h.bf16 %v6342_v32  ;;  %v6343_v35 = vunpack.i.l.bf16 %v6342_v32  ;;  %6078 = vmatprep.subr.bf16.mxu0 %v6077_v31  ;;  %v1878_v42 = vmul.f32 %v6501_v30, %v7178_v61  ;;  %v2409_v32 = vld [vmem:[#allocation7 + $0x8] sm:$0xff] }
 0xbcf   :  { %5718 = vmatprep.mubr.msk.f32.mxu1 %vm637_vm7, %v1876_v33  ;;  %6080 = vmatpush3.bf16.msra.mxu0 %v6077_v31  ;;  %v2408_v31 = vld [vmem:[#allocation7] sm:$0xff]  ;;  %v2410_v33 = vld [vmem:[#allocation7 + $0x10] sm:$0xff] }
 0xbd0   :  { %v6503_v37 = vpop.eup %6502  ;;  %v6073_v39 = vpack.c.bf16 %v6344_v34, %v6343_v35  ;;  %6086 = vmatprep.subr.bf16.mxu0 %v6085_v57  ;;  %v6093_v34 = vpack.c.bf16 %v2409_v32, %v2408_v31  ;;  %v2411_v35 = vld [vmem:[#allocation7 + $0x18] sm:$0xff] }
 0xbd1   :  { %v6505_v40 = vpop.eup %6504  ;;  %v1882_v48 = vmul.f32 %v6503_v37, %v6489_v6  ;;  %v6097_v30 = vpack.c.bf16 %v2411_v35, %v2410_v33  ;;  %v2502_v37 = vld [vmem:[%s7732_s9] sm:$0xff] }
 0xbd2   :  { %6074 = vmatprep.subr.bf16.mxu1 %v6073_v39  ;;  %v1880_v41 = vmul.f32 %v6505_v40, %v6487_v5  ;;  %v2504_v40 = vld [vmem:[%s7732_s9 + $0x10] sm:$0xff] }
 0xbd3   :  { %6076 = vmatpush3.bf16.msra.mxu1 %v6073_v39  ;;  %v2503_v39 = vld [vmem:[%s7732_s9 + $0x8] sm:$0xff] }
 0xbd4   :  { %5725 = vmatprep.mubr.msk.f32.mxu0 %vm637_vm7, %v1880_v41  ;;  %v6507_v46 = vpop.eup %6506  ;;  %v2505_v41 = vld [vmem:[%s7732_s9 + $0x18] sm:$0xff] }
 0xbd5   :  { %5726 = vmatmul.mubr.msk.f32.vlgmr.msra.gmra.mrb[14].mxu0 %vm637_vm7, %v1882_v48  ;;  %v1886_v50 = vmul.f32 %v6507_v46, %v7185_v9  ;;  %v6101_v48 = vpack.c.bf16 %v2503_v39, %v2502_v37  ;;  %v5257_v39 = vld [vmem:[%s7727_s4 + $0x20] sm:$0xff] }
 0xbd6   :  { %5719 = vmatmul.mubr.msk.f32.vlgmr.msra.gmra.mrb[20].mxu1 %vm637_vm7, %v1878_v42  ;;  %6088 = vmatpush3.bf16.msra.mxu0 %v6085_v57  ;;  %v6105_v42 = vpack.c.bf16 %v2505_v41, %v2504_v40  ;;  %v5258_v40 = vld [vmem:[%s7727_s4 + $0x28] sm:$0xff] }
 0xbd7   :  { %6090 = vmatprep.subr.bf16.mxu0 %v6089_v59  ;;  %v6117_v41 = vpack.c.bf16 %v5258_v40, %v5257_v39 }
 0xbda   :  { %6092 = vmatpush3.bf16.msra.mxu0 %v6089_v59 }
 0xbdb   :  { %6102 = vmatprep.subr.bf16.mxu0 %v6101_v48 }
 0xbfa   :  { %v1867_v43 = vpop.xlane.xlu1 %1866 }
 0xbfb   :  { %6508 = vrcp.f32 %v1867_v43  ;;  %v2506_v43 = vld [vmem:[%s7732_s9 + $0x20] sm:$0xff] }
 0xbfe   :  { %v6352_v44 = vpop.permute.xlu1 %6351 }
 0xbff   :  { %v6354_v1 = vunpack.i.h.bf16 %v6352_v44  ;;  %v6353_v45 = vunpack.i.l.bf16 %v6352_v44  ;;  %v2507_v44 = vld [vmem:[%s7732_s9 + $0x28] sm:$0xff] }
 0xc01   :  { %v6081_v0 = vpack.c.bf16 %v6354_v1, %v6353_v45  ;;  %v6109_v1 = vpack.c.bf16 %v2507_v44, %v2506_v43 }
 0xc03   :  { %6082 = vmatprep.subr.bf16.mxu1 %v6081_v0 }
 0xc04   :  { %6084 = vmatpush3.bf16.msra.mxu1 %v6081_v0 }
 0xc05   :  { %v6509_v47 = vpop.eup %6508  ;;  %6094 = vmatprep.subr.bf16.mxu1 %v6093_v34 }
 0xc06   :  { %v1884_v49 = vmul.f32 %v6509_v47, %v6497_v17 }
 0xc08   :  { %5732 = vmatprep.mubr.msk.f32.mxu1 %vm637_vm7, %v1884_v49 }
 0xc09   :  { %5733 = vmatmul.mubr.msk.f32.vlgmr.msra.gmra.mrb[22].mxu1 %vm637_vm7, %v1886_v50 }
 0xc0a   :  { %6096 = vmatpush3.bf16.msra.mxu1 %v6093_v34 }
 0xc0b   :  { %6098 = vmatprep.subr.bf16.mxu1 %v6097_v30 }
 0xc0e   :  { %6100 = vmatpush3.bf16.msra.mxu1 %v6097_v30 }
 0xc0f   :  { %6118 = vmatprep.subr.bf16.mxu1 %v6117_v41 }
 0xc3f   :  { %v5713_v51 = vpop.f32.mrb[18].mxu1 }
 0xc40   :  { %v1965_v52 = vpop.f32.mrb[19].mxu1 }
 0xca8   :  { %v5727_v60 = vpop.f32.mrb[14].mxu0 }
 0xca9   :  { %v2139_v61 = vpop.f32.mrb[15].mxu0  ;;  %v5720_v62 = vpop.f32.mrb[20].mxu1 }
 0xcaa   :  { %2239 = vrot.lane.b32.xlu0 %v5720_v62, %s6729_s26  ;;  %v2052_v63 = vpop.f32.mrb[21].mxu1  ;;  %v5245_v62 = vld [vmem:[%s7735_s12 + $0x2] ss:$0 sm:$0xff] }
 0xcab   :  { %2237 = vrot.lane.b32.xlu1 %v2052_v63, %s6729_s26 }
 0xcae   :  { %2247 = vrot.lane.b32.xlu0 %v5727_v60, %s7743_s19 }
 0xcaf   :  { %2245 = vrot.lane.b32.xlu1 %v2139_v61, %s7743_s19 }
 0xcdc   :  { %v5734_v2 = vpop.f32.mrb[22].mxu1 }
 0xcdd   :  { %2255 = vrot.lane.b32.xlu0 %v5734_v2, %s7741_s25  ;;  %v2226_v3 = vpop.f32.mrb[23].mxu1 }
 0xcde   :  { %2253 = vrot.lane.b32.xlu1 %v2226_v3, %s7741_s25  ;;  %v5246_v3 = vld [vmem:[%s7736_s13 + $0x2] ss:$0 sm:$0xff] }
 0xd1c   :  { %v2240_v4 = vpop.permute.xlu0 %2239 }
 0xd1d   :  { %v2238_v5 = vpop.permute.xlu1 %2237  ;;  %v2260_v10 = vsel %vm264_vm5, %v5713_v51, %v2240_v4 }
 0xd1e   :  { %v2259_v8 = vsel %vm264_vm5, %v1965_v52, %v2238_v5 }
 0xd20   :  { %v2248_v6 = vpop.permute.xlu0 %2247 }
 0xd21   :  { %v2246_v7 = vpop.permute.xlu1 %2245  ;;  %v2262_v13 = vsel %vm637_vm7, %v2260_v10, %v2248_v6  ;;  %v2508_v10 = vld [vmem:[%s7732_s9 + $0x30] sm:$0xff] }
 0xd22   :  { %v2261_v11 = vsel %vm637_vm7, %v2259_v8, %v2246_v7 }
 0xd4f   :  { %v2256_v9 = vpop.permute.xlu0 %2255 }
 0xd50   :  { %v2254_v12 = vpop.permute.xlu1 %2253  ;;  %v2264_v15 = vsel %vm1102_vm8, %v2262_v13, %v2256_v9  ;;  %v5247_v13 = vld [vmem:[%s7733_s10] ss:$0 sm:$0xff] }
 0xd51   :  { %v2263_v14 = vsel %vm1102_vm8, %v2261_v11, %v2254_v12  ;;  %v2509_v11 = vld [vmem:[%s7732_s9 + $0x38] sm:$0xff] }
 0xd52   :  { %5743 = vmatprep.mubr.msk.f32.mxu0 %vm111_vm0, %v2263_v14  ;;  %v6113_v12 = vpack.c.bf16 %v2509_v11, %v2508_v10 }
 0xd53   :  { %5744 = vmatmul.mubr.msk.f32.vlgmr.msra.gmra.mrb[16].mxu0 %vm111_vm0, %v2264_v15 }
 0xd54   :  { %6104 = vmatpush3.bf16.msra.mxu0 %v6101_v48  ;;  %v5259_v48 = vld [vmem:[%s7727_s4 + $0x30] sm:$0xff] }
 0xd55   :  { %6106 = vmatprep.subr.bf16.mxu0 %v6105_v42 }
 0xd58   :  { %6108 = vmatpush3.bf16.msra.mxu0 %v6105_v42  ;;  %v5260_v42 = vld [vmem:[%s7727_s4 + $0x38] sm:$0xff] }
 0xd59   :  { %6110 = vmatprep.subr.bf16.mxu0 %v6109_v1  ;;  %v6121_v43 = vpack.c.bf16 %v5260_v42, %v5259_v48 }
 0xd5c   :  { %6112 = vmatpush3.bf16.msra.mxu0 %v6109_v1 }
 0xd5d   :  { %6114 = vmatprep.subr.bf16.mxu0 %v6113_v12 }
 0xd60   :  { %6116 = vmatpush3.bf16.msra.mxu0 %v6113_v12 }
 0xe26   :  { %v5745_v16 = vpop.f32.mrb[16].mxu0 }
 0xe27   :  { %v7235_v17 = vadd.f32 %v5745_v16, %v7063_v36  ;;  %v2337_v18 = vpop.f32.mrb[17].mxu0 }
 0xe28   :  { %v7238_v19 = vadd.f32 %v2337_v18, %v7066_v38 }
 0xe29   :  { %v2355_v20 = vsel %vm111_vm0, %v7235_v17, 0.0 }
 0xe2a   :  { %2356 = vadd.xlane.f32.xlu0 %v2355_v20  ;;  %v2352_v21 = vsel %vm111_vm0, %v7238_v19, 0.0 }
 0xe2b   :  { %2353 = vadd.xlane.f32.xlu1 %v2352_v21 }
 0xeb7   :  { %v2357_v22 = vpop.xlane.xlu0 %2356 }
 0xeb8   :  { %v2359_v23 = vmul.f32 0.03125, %v2357_v22  ;;  %v2354_v24 = vpop.xlane.xlu1 %2353 }
 0xeb9   :  { %v2358_v25 = vmul.f32 0.03125, %v2354_v24 }
 0xeba   :  { %v2361_v26 = vsub.f32 %v7235_v17, %v2359_v23  ;;  %v5252_v23 = vld [vmem:[%s7734_s11] ss:$0 sm:$0xff] }
 0xebb   :  { %v2360_v36 = vsub.f32 %v7238_v19, %v2358_v25 }
 0xebc   :  { %v2363_v28 = vmul.f32 %v2361_v26, %v2361_v26  ;;  %v2379_v5 = vmul.f32 %v5245_v62, %v2361_v26 }
 0xebd   :  { %v2362_v27 = vmul.f32 %v2360_v36, %v2360_v36  ;;  %v2378_v63 = vmul.f32 %v5245_v62, %v2360_v36 }
 0xebe   :  { %v2367_v29 = vsel %vm111_vm0, %v2363_v28, 0.0 }
 0xebf   :  { %v2364_v38 = vsel %vm111_vm0, %v2362_v27, 0.0 }
 0xec0   :  { %2365 = vadd.xlane.f32.xlu0 %v2364_v38 }
 0xec4   :  { %2368 = vadd.xlane.f32.xlu0 %v2367_v29 }
 0xf4d   :  { %v2366_v45 = vpop.xlane.xlu0 %2365 }
 0xf4e   :  { %v2370_v0 = vmul.f32 0.032258064, %v2366_v45 }
 0xf50   :  { %6510 = vrsqrt.f32 %v2370_v0  ;;  %vm2382_vm13 = vcmp.eq.f32.partialorder %v2370_v0, inf  ;;  %v2385_v51 = vand.u32 2147483648, %v2370_v0  ;;  %vm2384_vm14 = vcmp.eq.f32.partialorder %v2370_v0, 0.0 }
 0xf51   :  { %v2369_v46 = vpop.xlane.xlu0 %2368 }
 0xf52   :  { %v2371_v47 = vmul.f32 0.032258064, %v2369_v46 }
 0xf54   :  { %6512 = vrsqrt.f32 %v2371_v47  ;;  %vm2389_vm15 = vcmp.eq.f32.partialorder %v2371_v47, inf  ;;  %v2392_v58 = vand.u32 2147483648, %v2371_v47  ;;  %vm2391_vm1 = vcmp.eq.f32.partialorder %v2371_v47, 0.0 }
 0xf5a   :  { %v6511_v49 = vpop.eup %6510 }
 0xf5b   :  { %v2381_v50 = vmul.f32 %v6511_v49, %v2370_v0 }
 0xf5d   :  { %v2383_v52 = vsel %vm2382_vm13, %v2370_v0, %v2381_v50 }
 0xf5e   :  { %v6513_v53 = vpop.eup %6512  ;;  %v2386_v54 = vsel %vm2384_vm14, %v2385_v51, %v2383_v52 }
 0xf5f   :  { %v2388_v56 = vmul.f32 %v6513_v53, %v2371_v47  ;;  %v2394_v57 = vadd.f32 1e-06, %v2386_v54 }
 0xf61   :  { %v2390_v59 = vsel %vm2389_vm15, %v2371_v47, %v2388_v56  ;;  %6514 = vrcp.f32 %v2394_v57 }
 0xf62   :  { %v2393_v60 = vsel %vm2391_vm1, %v2392_v58, %v2390_v59 }
 0xf63   :  { %v2395_v61 = vadd.f32 1e-06, %v2393_v60  ;;  %v5255_v60 = vld [vmem:[%s7735_s12 + $0x3] ss:$0 sm:$0xff] }
 0xf65   :  { %6516 = vrcp.f32 %v2395_v61 }
 0xf6b   :  { %v6515_v2 = vpop.eup %6514 }
 0xf6c   :  { %v2397_v4 = vmul.f32 %v6515_v2, %v2378_v63 }
 0xf6e   :  { %v2406_v6 = vadd.f32 %v5246_v3, %v2397_v4 }
 0xf6f   :  { %v6517_v7 = vpop.eup %6516 }
 0xf70   :  { %v2399_v8 = vmul.f32 %v6517_v7, %v2379_v5  ;;  %5754 = vmatprep.mubr.msk.f32.mxu1 %vm111_vm0, %v2406_v6 }
 0xf72   :  { %v2407_v9 = vadd.f32 %v5246_v3, %v2399_v8  ;;  %v5256_v3 = vld [vmem:[%s7736_s13 + $0x3] ss:$0 sm:$0xff] }
 0xf74   :  { %5755 = vmatmul.mubr.msk.f32.vlgmr.msra.gmra.mrb[24].mxu1 %vm111_vm0, %v2407_v9 }
 0xf75   :  { %6120 = vmatpush3.bf16.msra.mxu1 %v6117_v41  ;;  %v6614_v41 = vld [vmem:[%s7725_s2 + $0x8] sm:$0xff] }
 0xf76   :  { %6122 = vmatprep.subr.bf16.mxu1 %v6121_v43 }
 0xf79   :  { %6124 = vmatpush3.bf16.msra.mxu1 %v6121_v43  ;;  %v6615_v43 = vld [vmem:[%s7725_s2] sm:$0xff] }
0x1047   :  { %v5756_v14 = vpop.f32.mrb[24].mxu1 }
0x1048   :  { %v2497_v15 = vadd.f32 %v5756_v14, %v5247_v13  ;;  %v2491_v16 = vpop.f32.mrb[25].mxu1 }
0x1049   :  { %v2492_v18 = vadd.f32 %v5247_v13, %v2491_v16 }
0x104a   :  { %v2501_v21 = vmax.f32 %v2497_v15, 0.0 }
0x104b   :  { %v2500_v20 = vmax.f32 %v2492_v18, 0.0 }
0x104d   :  { %5773 = vmatprep.mubr.msk.f32.mxu0 %vm2510_vm2, %v2500_v20 }
0x104e   :  { %5774 = vmatmul.mubr.msk.f32.vlgmr.msra.gmra.mrb[18].mxu0 %vm2510_vm2, %v2501_v21 }
0x1121   :  { %v5775_v22 = vpop.f32.mrb[18].mxu0 }
0x1122   :  { %v2593_v24 = vadd.f32 %v5775_v22, %v7235_v17  ;;  %v2583_v25 = vpop.f32.mrb[19].mxu0 }
0x1123   :  { %v2592_v26 = vadd.f32 %v2583_v25, %v7238_v19 }
0x1124   :  { %v7290_v36 = vadd.f32 %v5252_v23, %v2593_v24 }
0x1125   :  { %v7292_v27 = vadd.f32 %v5252_v23, %v2592_v26 }
0x1126   :  { %v2610_v38 = vsel %vm111_vm0, %v7290_v36, 0.0 }
0x1127   :  { %2611 = vadd.xlane.f32.xlu0 %v2610_v38  ;;  %v2607_v28 = vsel %vm111_vm0, %v7292_v27, 0.0 }
0x1128   :  { %2608 = vadd.xlane.f32.xlu1 %v2607_v28 }
0x11b4   :  { %v2612_v29 = vpop.xlane.xlu0 %2611 }
0x11b5   :  { %v2614_v31 = vmul.f32 0.03125, %v2612_v29  ;;  %v2609_v32 = vpop.xlane.xlu1 %2608 }
0x11b6   :  { %v2613_v33 = vmul.f32 0.03125, %v2609_v32 }
0x11b7   :  { %v2616_v17 = vsub.f32 %v7290_v36, %v2614_v31 }
0x11b8   :  { %v2615_v19 = vsub.f32 %v7292_v27, %v2613_v33 }
0x11b9   :  { %v2618_v34 = vmul.f32 %v2616_v17, %v2616_v17  ;;  %v2634_v61 = vmul.f32 %v5255_v60, %v2616_v17 }
0x11ba   :  { %v2617_v35 = vmul.f32 %v2615_v19, %v2615_v19  ;;  %v2633_v63 = vmul.f32 %v5255_v60, %v2615_v19  ;;  %v6618_v60 = vld [vmem:[%s7725_s2 + $0x28] sm:$0xff] }
0x11bb   :  { %v2622_v30 = vsel %vm111_vm0, %v2618_v34, 0.0 }
0x11bc   :  { %2623 = vadd.xlane.f32.xlu0 %v2622_v30  ;;  %v2619_v37 = vsel %vm111_vm0, %v2617_v35, 0.0 }
0x11bd   :  { %2620 = vadd.xlane.f32.xlu1 %v2619_v37 }
0x1249   :  { %v2624_v44 = vpop.xlane.xlu0 %2623 }
0x124a   :  { %v2626_v1 = vmul.f32 0.032258064, %v2624_v44  ;;  %v2621_v45 = vpop.xlane.xlu1 %2620 }
0x124b   :  { %v2625_v0 = vmul.f32 0.032258064, %v2621_v45 }
0x124c   :  { %6518 = vrsqrt.f32 %v2626_v1  ;;  %vm2644_vm3 = vcmp.eq.f32.partialorder %v2626_v1, inf  ;;  %v2647_v50 = vand.u32 2147483648, %v2626_v1  ;;  %vm2646_vm4 = vcmp.eq.f32.partialorder %v2626_v1, 0.0 }
0x124d   :  { %6520 = vrsqrt.f32 %v2625_v0  ;;  %vm2637_vm9 = vcmp.eq.f32.partialorder %v2625_v0, inf  ;;  %v2640_v53 = vand.u32 2147483648, %v2625_v0  ;;  %vm2639_vm10 = vcmp.eq.f32.partialorder %v2625_v0, 0.0 }
0x1256   :  { %v6519_v46 = vpop.eup %6518 }
0x1257   :  { %v6521_v47 = vpop.eup %6520  ;;  %v2643_v49 = vmul.f32 %v6519_v46, %v2626_v1 }
0x1258   :  { %v2636_v51 = vmul.f32 %v6521_v47, %v2625_v0 }
0x1259   :  { %v2645_v52 = vsel %vm2644_vm3, %v2626_v1, %v2643_v49  ;;  %v6616_v1 = vld [vmem:[%s7725_s2 + $0x18] sm:$0xff]  ;;  %v6617_v49 = vld [vmem:[%s7725_s2 + $0x10] sm:$0xff] }
0x125a   :  { %v2648_v54 = vsel %vm2646_vm4, %v2647_v50, %v2645_v52  ;;  %v2638_v56 = vsel %vm2637_vm9, %v2625_v0, %v2636_v51 }
0x125b   :  { %v2650_v57 = vadd.f32 1e-06, %v2648_v54  ;;  %v2641_v58 = vsel %vm2639_vm10, %v2640_v53, %v2638_v56 }
0x125c   :  { %v2649_v59 = vadd.f32 1e-06, %v2641_v58 }
0x125d   :  { %6522 = vrcp.f32 %v2650_v57 }
0x125e   :  { %6524 = vrcp.f32 %v2649_v59 }
0x1267   :  { %v6523_v62 = vpop.eup %6522 }
0x1268   :  { %v6525_v2 = vpop.eup %6524  ;;  %v2654_v4 = vmul.f32 %v6523_v62, %v2634_v61  ;;  %v6619_v62 = vld [vmem:[%s7725_s2 + $0x20] sm:$0xff] }
0x1269   :  { %v2652_v5 = vmul.f32 %v6525_v2, %v2633_v63 }
0x126a   :  { %v2662_v7 = vadd.f32 %v5256_v3, %v2654_v4  ;;  %v6620_v4 = vld [vmem:[%s7725_s2 + $0x30] sm:$0xff] }
0x126b   :  { %v2661_v6 = vadd.f32 %v5256_v3, %v2652_v5 }
0x126d   :  { %5784 = vmatprep.mubr.msk.f32.mxu1 %vm111_vm0, %v2661_v6 }
0x126e   :  { %5785 = vmatmul.mubr.msk.f32.vlgmr.msra.gmra.mrb[26].mxu1 %vm111_vm0, %v2662_v7  ;;  %v6621_v7 = vld [vmem:[%s7725_s2 + $0x38] sm:$0xff]  ;;  %s7747_s2 = smov 56  }
0x1341   :  { %v5786_v8 = vpop.f32.mrb[26].mxu1 }
0x1342   :  { %v2740_v9 = vpop.f32.mrb[27].mxu1 }
0x1343   :  { %5791 = vmatprep.mubr.msk.f32.mxu1 %vm264_vm5, %v2740_v9  ;;  %v7323_v10 = vpack.i.bf16 %v5786_v8, %v2740_v9 }
0x1345   :  { %6361 = vrot.lane.b32.xlu0 %v7323_v10, %s6731_s1  ;;  %6356 = vrot.lane.b32.xlu1 %v7323_v10, %s6732_s16 }
0x1349   :  { %2845 = vrot.lane.b32.xlu0 %v5786_v8, %s6734_s22  ;;  %6366 = vrot.lane.b32.xlu1 %v7323_v10, %s6733_s21 }
0x134d   :  { %2936 = vrot.lane.b32.xlu0 %v5786_v8, %s6736_s30  ;;  %6371 = vrot.lane.b32.xlu1 %v7323_v10, %s6735_s6 }
0x1351   :  { %3027 = vrot.lane.b32.xlu0 %v5786_v8, %s6737_s0  ;;  %2843 = vrot.lane.b32.xlu1 %v2740_v9, %s6734_s22 }
0x1355   :  { %2934 = vrot.lane.b32.xlu1 %v2740_v9, %s6736_s30 }
0x1359   :  { %3025 = vrot.lane.b32.xlu1 %v2740_v9, %s6737_s0 }
0x13b7   :  { %v6362_v11 = vpop.permute.xlu0 %6361  ;;  %v6357_v12 = vpop.permute.xlu1 %6356 }
0x13b8   :  { %v6364_v13 = vunpack.i.h.bf16 %v6362_v11  ;;  %v6363_v14 = vunpack.i.l.bf16 %v6362_v11  ;;  %v6359_v15 = vunpack.i.h.bf16 %v6357_v12  ;;  %v6358_v16 = vunpack.i.l.bf16 %v6357_v12 }
0x13ba   :  { %v6131_v18 = vpack.c.bf16 %v6364_v13, %v6363_v14  ;;  %v6125_v20 = vpack.c.bf16 %v6359_v15, %v6358_v16 }
0x13bb   :  { %v6367_v21 = vpop.permute.xlu1 %6366  ;;  %v2846_v26 = vpop.permute.xlu0 %2845 }
0x13bc   :  { %v6369_v22 = vunpack.i.h.bf16 %v6367_v21  ;;  %v6368_v23 = vunpack.i.l.bf16 %v6367_v21  ;;  %6127 = vmatprep.subr.msk.bf16.mxu1 %vm6929_vm6, %v6125_v20  ;;  %6133 = vmatprep.subr.msk.bf16.mxu0 %vm6929_vm6, %v6131_v18 }
0x13bd   :  { %6130 = vmatpush3.bf16.xpose.msk.msra.mxu1 %vm6929_vm6, %v6125_v20  ;;  %6136 = vmatpush3.bf16.xpose.msk.msra.mxu0 %vm6929_vm6, %v6131_v18 }
0x13be   :  { %v6137_v24 = vpack.c.bf16 %v6369_v22, %v6368_v23 }
0x13bf   :  { %v6372_v25 = vpop.permute.xlu1 %6371  ;;  %v2937_v32 = vpop.permute.xlu0 %2936 }
0x13c0   :  { %v6374_v38 = vunpack.i.h.bf16 %v6372_v25  ;;  %v6373_v28 = vunpack.i.l.bf16 %v6372_v25  ;;  %6139 = vmatprep.subr.msk.bf16.mxu1 %vm6929_vm6, %v6137_v24 }
0x13c2   :  { %v6143_v29 = vpack.c.bf16 %v6374_v38, %v6373_v28 }
0x13c3   :  { %v2844_v31 = vpop.permute.xlu1 %2843  ;;  %v3028_v19 = vpop.permute.xlu0 %3027 }
0x13c4   :  { %5792 = vmatmul.mubr.msk.f32.vlgmr.msra.gmra.mrb[28].mxu1 %vm264_vm5, %v5786_v8  ;;  %5798 = vmatprep.mubr.msk.f32.mxu0 %vm264_vm5, %v2844_v31 }
0x13c5   :  { %6145 = vmatprep.subr.msk.bf16.mxu0 %vm6929_vm6, %v6143_v29  ;;  %5799 = vmatmul.mubr.msk.f32.vlgmr.msra.gmra.mrb[20].mxu0 %vm264_vm5, %v2846_v26 }
0x13c6   :  { %6142 = vmatpush3.bf16.xpose.msk.msra.mxu1 %vm6929_vm6, %v6137_v24  ;;  %6148 = vmatpush3.bf16.xpose.msk.msra.mxu0 %vm6929_vm6, %v6143_v29 }
0x13c7   :  { %v2935_v33 = vpop.permute.xlu1 %2934 }
0x13c8   :  { %5805 = vmatprep.mubr.msk.f32.mxu1 %vm264_vm5, %v2935_v33 }
0x13cb   :  { %v3026_v17 = vpop.permute.xlu1 %3025 }
0x13cc   :  { %5812 = vmatprep.mubr.msk.f32.mxu0 %vm264_vm5, %v3026_v17 }
0x13cd   :  { %5806 = vmatmul.mubr.msk.f32.vlgmr.msra.gmra.mrb[30].mxu1 %vm264_vm5, %v2937_v32  ;;  %5813 = vmatmul.mubr.msk.f32.vlgmr.msra.gmra.mrb[22].mxu0 %vm264_vm5, %v3028_v19 }
0x1497   :  { %v5793_v34 = vpop.f32.mrb[28].mxu1 }
0x1498   :  { %v3117_v35 = vmul.f32 0.35355338, %v5793_v34  ;;  %v2834_v30 = vpop.f32.mrb[29].mxu1  ;;  %v5800_v37 = vpop.f32.mrb[20].mxu0 }
0x1499   :  { %v3116_v39 = vmul.f32 0.35355338, %v2834_v30  ;;  %v3119_v40 = vmul.f32 0.35355338, %v5800_v37  ;;  %v2925_v48 = vpop.f32.mrb[21].mxu0 }
0x149a   :  { %v3125_v42 = vadd.f32 %v6614_v41, %v3117_v35  ;;  %v3118_v0 = vmul.f32 0.35355338, %v2925_v48 }
0x149b   :  { %v3124_v44 = vadd.f32 %v6615_v43, %v3116_v39  ;;  %v3127_v45 = vadd.f32 %v6616_v1, %v3119_v40 }
0x149c   :  { %v3135_v46 = vsel %vm637_vm7, %v3125_v42, -inf  ;;  %v3126_v50 = vadd.f32 %v6617_v49, %v3118_v0 }
0x149d   :  { %3136 = vmax.xlane.f32.xlu0 %v3135_v46  ;;  %v3132_v47 = vsel %vm637_vm7, %v3124_v44, -inf  ;;  %v3141_v53 = vsel %vm637_vm7, %v3127_v45, -inf }
0x149e   :  { %3133 = vmax.xlane.f32.xlu1 %v3132_v47  ;;  %v3138_v3 = vsel %vm637_vm7, %v3126_v50, -inf }
0x14a0   :  { %v5807_v51 = vpop.f32.mrb[30].mxu1  ;;  %v5814_v52 = vpop.f32.mrb[22].mxu0 }
0x14a1   :  { %v3121_v54 = vmul.f32 0.35355338, %v5807_v51  ;;  %v3016_v56 = vpop.f32.mrb[31].mxu1  ;;  %v3107_v57 = vpop.f32.mrb[23].mxu0  ;;  %3142 = vmax.xlane.f32.xlu0 %v3141_v53  ;;  %v3123_v2 = vmul.f32 0.35355338, %v5814_v52 }
0x14a2   :  { %v3120_v58 = vmul.f32 0.35355338, %v3016_v56  ;;  %v3122_v59 = vmul.f32 0.35355338, %v3107_v57 }
0x14a3   :  { %v3129_v61 = vadd.f32 %v6618_v60, %v3121_v54  ;;  %v3131_v8 = vadd.f32 %v6621_v7, %v3123_v2 }
0x14a4   :  { %v7383_v63 = vadd.f32 %v6619_v62, %v3120_v58  ;;  %v7389_v5 = vadd.f32 %v6620_v4, %v3122_v59 }
0x14a5   :  { %3139 = vmax.xlane.f32.xlu0 %v3138_v3  ;;  %v3147_v9 = vsel %vm637_vm7, %v3129_v61, -inf  ;;  %v3153_v12 = vsel %vm637_vm7, %v3131_v8, -inf }
0x14a6   :  { %v3144_v6 = vsel %vm637_vm7, %v7383_v63, -inf  ;;  %v3150_v11 = vsel %vm637_vm7, %v7389_v5, -inf }
0x14a7   :  { %3145 = vmax.xlane.f32.xlu1 %v3144_v6 }
0x14a9   :  { %3148 = vmax.xlane.f32.xlu0 %v3147_v9 }
0x14ab   :  { %3151 = vmax.xlane.f32.xlu1 %v3150_v11 }
0x14ad   :  { %3154 = vmax.xlane.f32.xlu0 %v3153_v12 }
0x14bc   :  { %6376 = vrot.lane.b32.xlu1 %v7323_v10, %s6741_s18 }
0x152a   :  { %v3137_v13 = vpop.xlane.xlu0 %3136 }
0x152b   :  { %v3157_v14 = vsub.f32 %v3125_v42, %v3137_v13  ;;  %v3134_v15 = vpop.xlane.xlu1 %3133 }
0x152c   :  { %v3156_v16 = vsub.f32 %v3124_v44, %v3134_v15 }
0x152d   :  { %v3166_v18 = vmul.f32 1.442695, %v3157_v14 }
0x152e   :  { %v3164_v20 = vmul.f32 1.442695, %v3156_v16  ;;  %v3143_v21 = vpop.xlane.xlu0 %3142 }
0x152f   :  { %6526 = vpow2.f32 %v3166_v18  ;;  %v3159_v22 = vsub.f32 %v3127_v45, %v3143_v21 }
0x1530   :  { %6528 = vpow2.f32 %v3164_v20 }
0x1531   :  { %v3170_v23 = vmul.f32 1.442695, %v3159_v22 }
0x1532   :  { %v3140_v24 = vpop.xlane.xlu0 %3139 }
0x1533   :  { %6530 = vpow2.f32 %v3170_v23  ;;  %v3158_v25 = vsub.f32 %v3126_v50, %v3140_v24 }
0x1534   :  { %v3146_v26 = vpop.xlane.xlu1 %3145 }
0x1535   :  { %v3168_v38 = vmul.f32 1.442695, %v3158_v25  ;;  %v3160_v49 = vsub.f32 %v7383_v63, %v3146_v26 }
0x1536   :  { %v3149_v28 = vpop.xlane.xlu0 %3148 }
0x1537   :  { %6532 = vpow2.f32 %v3168_v38  ;;  %v3161_v29 = vsub.f32 %v3129_v61, %v3149_v28  ;;  %v3172_v50 = vmul.f32 1.442695, %v3160_v49 }
0x1538   :  { %v3152_v31 = vpop.xlane.xlu1 %3151 }
0x1539   :  { %v6527_v32 = vpop.eup %6526  ;;  %v3174_v33 = vmul.f32 1.442695, %v3161_v29  ;;  %v3162_v51 = vsub.f32 %v7389_v5, %v3152_v31 }
0x153a   :  { %v6529_v17 = vpop.eup %6528  ;;  %v3155_v19 = vpop.xlane.xlu0 %3154  ;;  %v3183_v34 = vsel %vm637_vm7, %v6527_v32, 0.0 }
0x153b   :  { %6534 = vpow2.f32 %v3174_v33  ;;  %v3163_v35 = vsub.f32 %v3131_v8, %v3155_v19  ;;  %3184 = vadd.xlane.f32.xlu0 %v3183_v34  ;;  %v3180_v30 = vsel %vm637_vm7, %v6529_v17, 0.0  ;;  %v3176_v52 = vmul.f32 1.442695, %v3162_v51 }
0x153c   :  { %v6377_v37 = vpop.permute.xlu1 %6376  ;;  %3181 = vadd.xlane.f32.xlu1 %v3180_v30  ;;  %v5264_v30 = vld [vmem:[%s7730_s7 + $0x28] sm:$0xff] }
0x153d   :  { %v7404_v39 = vpop.eup %6530  ;;  %v3178_v40 = vmul.f32 1.442695, %v3163_v35  ;;  %v6379_v48 = vunpack.i.h.bf16 %v6377_v37  ;;  %v6378_v41 = vunpack.i.l.bf16 %v6377_v37  ;;  %v5263_v35 = vld [vmem:[%s7730_s7 + $0x20] sm:$0xff] }
0x153e   :  { %v3189_v42 = vsel %vm637_vm7, %v7404_v39, 0.0  ;;  %v6165_v37 = vpack.c.bf16 %v5264_v30, %v5263_v35 }
0x153f   :  { %6536 = vpow2.f32 %v3178_v40  ;;  %v6149_v43 = vpack.c.bf16 %v6379_v48, %v6378_v41  ;;  %3190 = vadd.xlane.f32.xlu0 %v3189_v42  ;;  %v5265_v48 = vld [vmem:[%s7730_s7 + $0x30] sm:$0xff]  ;;  %v5266_v41 = vld [vmem:[%s7730_s7 + $0x38] sm:$0xff] }
0x1540   :  { %6538 = vpow2.f32 %v3172_v50  ;;  %v6169_v42 = vpack.c.bf16 %v5266_v41, %v5265_v48 }
0x1541   :  { %v6533_v44 = vpop.eup %6532  ;;  %6150 = vmatprep.subr.bf16.mxu1 %v6149_v43  ;;  %6540 = vpow2.f32 %v3176_v52 }
0x1542   :  { %6152 = vmatpush3.bf16.msra.mxu1 %v6149_v43  ;;  %v3186_v1 = vsel %vm637_vm7, %v6533_v44, 0.0 }
0x1543   :  { %3187 = vadd.xlane.f32.xlu1 %v3186_v1 }
0x1545   :  { %v7409_v45 = vpop.eup %6534 }
0x1546   :  { %v3195_v0 = vsel %vm637_vm7, %v7409_v45, 0.0 }
0x1547   :  { %3196 = vadd.xlane.f32.xlu0 %v3195_v0 }
0x1549   :  { %v7413_v46 = vpop.eup %6536 }
0x154a   :  { %v3201_v47 = vsel %vm637_vm7, %v7413_v46, 0.0  ;;  %v6539_v53 = vpop.eup %6538 }
0x154b   :  { %3202 = vadd.xlane.f32.xlu0 %v3201_v47  ;;  %v3192_v54 = vsel %vm637_vm7, %v6539_v53, 0.0  ;;  %v6541_v56 = vpop.eup %6540 }
0x154c   :  { %v3198_v57 = vsel %vm637_vm7, %v6541_v56, 0.0 }
0x1554   :  { %6386 = vrot.lane.b32.xlu1 %v7323_v10, %s6739_s15  ;;  %s7748_s15 = smov 40  }
0x1561   :  { %6381 = vrot.lane.b32.xlu0 %v7323_v10, %s7747_s2 }
0x1578   :  { %3193 = vadd.xlane.f32.xlu1 %v3192_v54 }
0x157c   :  { %3199 = vadd.xlane.f32.xlu1 %v3198_v57 }
0x158d   :  { %6391 = vrot.lane.b32.xlu1 %v7323_v10, %s7748_s15 }
0x15c8   :  { %v3185_v58 = vpop.xlane.xlu0 %3184 }
0x15c9   :  { %6542 = vrcp.f32 %v3185_v58  ;;  %v3182_v59 = vpop.xlane.xlu1 %3181 }
0x15ca   :  { %6544 = vrcp.f32 %v3182_v59  ;;  %v6622_v59 = vld [vmem:[#allocation2] sm:$0xff] }
0x15cc   :  { %v3191_v60 = vpop.xlane.xlu0 %3190 }
0x15d0   :  { %v3188_v61 = vpop.xlane.xlu1 %3187 }
0x15d1   :  { %6546 = vrcp.f32 %v3188_v61 }
0x15d2   :  { %6548 = vrcp.f32 %v3191_v60 }
0x15d3   :  { %v6543_v62 = vpop.eup %6542 }
0x15d4   :  { %v6545_v63 = vpop.eup %6544  ;;  %v3197_v2 = vpop.xlane.xlu0 %3196  ;;  %v3207_v7 = vmul.f32 %v6543_v62, %v6527_v32 }
0x15d5   :  { %v6387_v3 = vpop.permute.xlu1 %6386  ;;  %v3205_v6 = vmul.f32 %v6545_v63, %v6529_v17  ;;  %6550 = vrcp.f32 %v3197_v2 }
0x15d6   :  { %v6389_v4 = vunpack.i.h.bf16 %v6387_v3  ;;  %v6388_v5 = vunpack.i.l.bf16 %v6387_v3 }
0x15d7   :  { %5819 = vmatprep.mubr.msk.f32.mxu1 %vm637_vm7, %v3205_v6 }
0x15d8   :  { %v6157_v8 = vpack.c.bf16 %v6389_v4, %v6388_v5  ;;  %v3203_v10 = vpop.xlane.xlu0 %3202  ;;  %5820 = vmatmul.mubr.msk.f32.vlgmr.msra.gmra.mrb[32].mxu1 %vm637_vm7, %v3207_v7 }
0x15da   :  { %6158 = vmatprep.subr.bf16.mxu0 %v6157_v8 }
0x15db   :  { %6160 = vmatpush3.bf16.msra.mxu0 %v6157_v8  ;;  %v6547_v9 = vpop.eup %6546 }
0x15dc   :  { %v6382_v11 = vpop.permute.xlu0 %6381  ;;  %v3209_v12 = vmul.f32 %v6547_v9, %v6533_v44  ;;  %v6549_v16 = vpop.eup %6548  ;;  %6166 = vmatprep.subr.bf16.mxu0 %v6165_v37 }
0x15dd   :  { %v6384_v13 = vunpack.i.h.bf16 %v6382_v11  ;;  %v6383_v14 = vunpack.i.l.bf16 %v6382_v11  ;;  %v3211_v18 = vmul.f32 %v6549_v16, %v7404_v39  ;;  %v3831_v16 = vld [vmem:[#allocation5 + $0x38] sm:$0xff] }
0x15de   :  { %5826 = vmatprep.mubr.msk.f32.mxu1 %vm637_vm7, %v3209_v12  ;;  %v3828_v12 = vld [vmem:[#allocation5 + $0x20] sm:$0xff] }
0x15df   :  { %v6153_v15 = vpack.c.bf16 %v6384_v13, %v6383_v14  ;;  %v6551_v25 = vpop.eup %6550  ;;  %v3829_v13 = vld [vmem:[#allocation5 + $0x28] sm:$0xff] }
0x15e0   :  { %v3215_v29 = vmul.f32 %v6551_v25, %v7409_v45  ;;  %v6181_v14 = vpack.c.bf16 %v3829_v13, %v3828_v12  ;;  %v5300_v25 = vld [vmem:[%s7728_s5 + $0x38] sm:$0xff] }
0x15e1   :  { %6154 = vmatprep.subr.bf16.mxu1 %v6153_v15 }
0x15e2   :  { %6156 = vmatpush3.bf16.msra.mxu1 %v6153_v15  ;;  %v3830_v15 = vld [vmem:[#allocation5 + $0x30] sm:$0xff] }
0x15e5   :  { %5827 = vmatmul.mubr.msk.f32.vlgmr.msra.gmra.mrb[34].mxu1 %vm637_vm7, %v3211_v18  ;;  %v6185_v18 = vpack.c.bf16 %v3831_v16, %v3830_v15 }
0x1605   :  { %v3194_v20 = vpop.xlane.xlu1 %3193 }
0x1606   :  { %6552 = vrcp.f32 %v3194_v20  ;;  %v6623_v20 = vld [vmem:[#allocation2 + $0x8] sm:$0xff] }
0x1607   :  { %6554 = vrcp.f32 %v3203_v10 }
0x1609   :  { %v3200_v21 = vpop.xlane.xlu1 %3199 }
0x160a   :  { %6556 = vrcp.f32 %v3200_v21  ;;  %v5297_v21 = vld [vmem:[%s7728_s5 + $0x20] sm:$0xff] }
0x160d   :  { %v6392_v22 = vpop.permute.xlu1 %6391 }
0x160e   :  { %v6394_v23 = vunpack.i.h.bf16 %v6392_v22  ;;  %v6393_v24 = vunpack.i.l.bf16 %v6392_v22  ;;  %v5298_v22 = vld [vmem:[%s7728_s5 + $0x28] sm:$0xff] }
0x1610   :  { %v6553_v26 = vpop.eup %6552  ;;  %v6161_v38 = vpack.c.bf16 %v6394_v23, %v6393_v24  ;;  %v5299_v23 = vld [vmem:[%s7728_s5 + $0x30] sm:$0xff]  ;;  %v6173_v24 = vpack.c.bf16 %v5298_v22, %v5297_v21 }
0x1611   :  { %v3213_v28 = vmul.f32 %v6553_v26, %v6539_v53  ;;  %v6555_v31 = vpop.eup %6554  ;;  %v6177_v26 = vpack.c.bf16 %v5300_v25, %v5299_v23 }
0x1612   :  { %6162 = vmatprep.subr.bf16.mxu1 %v6161_v38  ;;  %v3219_v17 = vmul.f32 %v6555_v31, %v7413_v46 }
0x1613   :  { %5833 = vmatprep.mubr.msk.f32.mxu0 %vm637_vm7, %v3213_v28  ;;  %6164 = vmatpush3.bf16.msra.mxu1 %v6161_v38 }
0x1614   :  { %v6557_v32 = vpop.eup %6556  ;;  %5834 = vmatmul.mubr.msk.f32.vlgmr.msra.gmra.mrb[24].mxu0 %vm637_vm7, %v3215_v29  ;;  %6174 = vmatprep.subr.bf16.mxu1 %v6173_v24 }
0x1615   :  { %v3217_v33 = vmul.f32 %v6557_v32, %v6541_v56  ;;  %6168 = vmatpush3.bf16.msra.mxu0 %v6165_v37 }
0x1616   :  { %6170 = vmatprep.subr.bf16.mxu0 %v6169_v42 }
0x1617   :  { %5840 = vmatprep.mubr.msk.f32.mxu1 %vm637_vm7, %v3217_v33 }
0x1618   :  { %5841 = vmatmul.mubr.msk.f32.vlgmr.msra.gmra.mrb[36].mxu1 %vm637_vm7, %v3219_v17 }
0x1619   :  { %6172 = vmatpush3.bf16.msra.mxu0 %v6169_v42  ;;  %6176 = vmatpush3.bf16.msra.mxu1 %v6173_v24  ;;  %v5295_v42 = vld [vmem:[%s7735_s12 + $0x4] ss:$0 sm:$0xff] }
0x161a   :  { %6182 = vmatprep.subr.bf16.mxu0 %v6181_v14  ;;  %6178 = vmatprep.subr.bf16.mxu1 %v6177_v26 }
0x161d   :  { %6180 = vmatpush3.bf16.msra.mxu1 %v6177_v26 }
0x16ab   :  { %v5821_v19 = vpop.f32.mrb[32].mxu1 }
0x16ac   :  { %v3298_v34 = vpop.f32.mrb[33].mxu1 }
0x16b8   :  { %v5828_v39 = vpop.f32.mrb[34].mxu1 }
0x16b9   :  { %3572 = vrot.lane.b32.xlu0 %v5828_v39, %s6729_s26  ;;  %v3385_v40 = vpop.f32.mrb[35].mxu1 }
0x16ba   :  { %3570 = vrot.lane.b32.xlu1 %v3385_v40, %s6729_s26 }
0x16e7   :  { %v5835_v43 = vpop.f32.mrb[24].mxu0 }
0x16e8   :  { %v3472_v44 = vpop.f32.mrb[25].mxu0  ;;  %3580 = vrot.lane.b32.xlu0 %v5835_v43, %s7749_s29 }
0x16e9   :  { %3578 = vrot.lane.b32.xlu1 %v3472_v44, %s7749_s29 }
0x16eb   :  { %v5842_v1 = vpop.f32.mrb[36].mxu1 }
0x16ec   :  { %3588 = vrot.lane.b32.xlu0 %v5842_v1, %s7750_s17  ;;  %v3559_v45 = vpop.f32.mrb[37].mxu1  ;;  %v5296_v1 = vld [vmem:[%s7736_s13 + $0x4] ss:$0 sm:$0xff] }
0x16ed   :  { %3586 = vrot.lane.b32.xlu1 %v3559_v45, %s7750_s17 }
0x172b   :  { %v3573_v0 = vpop.permute.xlu0 %3572 }
0x172c   :  { %v3571_v46 = vpop.permute.xlu1 %3570  ;;  %v3593_v52 = vsel %vm264_vm5, %v5821_v19, %v3573_v0 }
0x172d   :  { %v3592_v50 = vsel %vm264_vm5, %v3298_v34, %v3571_v46 }
0x175a   :  { %v3581_v47 = vpop.permute.xlu0 %3580 }
0x175b   :  { %v3579_v49 = vpop.permute.xlu1 %3578  ;;  %v3595_v56 = vsel %vm637_vm7, %v3593_v52, %v3581_v47 }
0x175c   :  { %v3594_v53 = vsel %vm637_vm7, %v3592_v50, %v3579_v49 }
0x175e   :  { %v3589_v51 = vpop.permute.xlu0 %3588 }
0x175f   :  { %v3587_v54 = vpop.permute.xlu1 %3586  ;;  %v3597_v58 = vsel %vm1102_vm8, %v3595_v56, %v3589_v51 }
0x1760   :  { %v3596_v57 = vsel %vm1102_vm8, %v3594_v53, %v3587_v54 }
0x1761   :  { %5851 = vmatprep.mubr.msk.f32.mxu0 %vm111_vm0, %v3596_v57 }
0x1762   :  { %5852 = vmatmul.mubr.msk.f32.vlgmr.msra.gmra.mrb[26].mxu0 %vm111_vm0, %v3597_v58 }
0x1763   :  { %5873 = vmatprep.mubr.msk.f32.mxu0 %vm111_vm0, %v6622_v59  ;;  %6184 = vmatpush3.bf16.msra.mxu0 %v6181_v14 }
0x1764   :  { %6186 = vmatprep.subr.bf16.mxu0 %v6185_v18 }
0x1767   :  { %6188 = vmatpush3.bf16.msra.mxu0 %v6185_v18 }
0x176a   :  { %5874 = vmatmul.mubr.msk.f32.vlgmr.msra.gmra.mrb[28].mxu0 %vm111_vm0, %v6623_v20  ;;  %v6624_v20 = vld [vmem:[%s7726_s3 + $0x8] sm:$0xff] }
0x1835   :  { %v5853_v60 = vpop.f32.mrb[26].mxu0 }
0x1836   :  { %v7466_v61 = vadd.f32 %v5853_v60, %v7290_v36  ;;  %v3670_v62 = vpop.f32.mrb[27].mxu0 }
0x1837   :  { %v7469_v63 = vadd.f32 %v3670_v62, %v7292_v27 }
0x1838   :  { %v3688_v2 = vsel %vm111_vm0, %v7466_v61, 0.0 }
0x1839   :  { %3689 = vadd.xlane.f32.xlu0 %v3688_v2  ;;  %v3685_v3 = vsel %vm111_vm0, %v7469_v63, 0.0 }
0x183a   :  { %3686 = vadd.xlane.f32.xlu1 %v3685_v3 }
0x183d   :  { %v5875_v51 = vpop.f32.mrb[28].mxu0 }
0x183e   :  { %v3898_v52 = vpop.f32.mrb[29].mxu0 }
0x183f   :  { %v7500_v53 = vpack.i.bf16 %v5875_v51, %v3898_v52  ;;  %v6189_v54 = vpack.c.bf16 %v5875_v51, %v3898_v52 }
0x1841   :  { %6191 = vmatprep.subr.msk.bf16.mxu1 %vm6929_vm6, %v6189_v54 }
0x184b   :  { %6396 = vrot.lane.b32.xlu1 %v7500_v53, %s6734_s22 }
0x184f   :  { %6406 = vrot.lane.b32.xlu1 %v7500_v53, %s6737_s0 }
0x18c6   :  { %v3690_v4 = vpop.xlane.xlu0 %3689 }
0x18c7   :  { %v3692_v5 = vmul.f32 0.03125, %v3690_v4  ;;  %v3687_v6 = vpop.xlane.xlu1 %3686 }
0x18c8   :  { %v3691_v7 = vmul.f32 0.03125, %v3687_v6 }
0x18c9   :  { %v3694_v8 = vsub.f32 %v7466_v61, %v3692_v5 }
0x18ca   :  { %v3693_v36 = vsub.f32 %v7469_v63, %v3691_v7 }
0x18cb   :  { %v3696_v9 = vmul.f32 %v3694_v8, %v3694_v8  ;;  %v3712_v0 = vmul.f32 %v5295_v42, %v3694_v8  ;;  %v6397_v56 = vpop.permute.xlu1 %6396 }
0x18cc   :  { %v3695_v10 = vmul.f32 %v3693_v36, %v3693_v36  ;;  %v3711_v43 = vmul.f32 %v5295_v42, %v3693_v36  ;;  %v6399_v57 = vunpack.i.h.bf16 %v6397_v56  ;;  %v6398_v58 = vunpack.i.l.bf16 %v6397_v56 }
0x18cd   :  { %v3700_v11 = vsel %vm111_vm0, %v3696_v9, 0.0 }
0x18ce   :  { %v3697_v27 = vsel %vm111_vm0, %v3695_v10, 0.0  ;;  %v6195_v2 = vpack.c.bf16 %v6399_v57, %v6398_v58 }
0x18cf   :  { %3698 = vadd.xlane.f32.xlu0 %v3697_v27  ;;  %v6407_v4 = vpop.permute.xlu1 %6406 }
0x18d0   :  { %v6409_v5 = vunpack.i.h.bf16 %v6407_v4  ;;  %v6408_v6 = vunpack.i.l.bf16 %v6407_v4  ;;  %6197 = vmatprep.subr.msk.bf16.mxu0 %vm6929_vm6, %v6195_v2 }
0x18d1   :  { %6200 = vmatpush3.bf16.xpose.msk.msra.mxu0 %vm6929_vm6, %v6195_v2 }
0x18d2   :  { %v6207_v7 = vpack.c.bf16 %v6409_v5, %v6408_v6 }
0x18d3   :  { %3701 = vadd.xlane.f32.xlu0 %v3700_v11 }
0x18d4   :  { %6209 = vmatprep.subr.msk.bf16.mxu0 %vm6929_vm6, %v6207_v7 }
0x18e9   :  { %6401 = vrot.lane.b32.xlu0 %v7500_v53, %s6736_s30 }
0x195c   :  { %v3699_v38 = vpop.xlane.xlu0 %3698 }
0x195d   :  { %v3703_v28 = vmul.f32 0.032258064, %v3699_v38 }
0x195f   :  { %6558 = vrsqrt.f32 %v3703_v28  ;;  %vm3715_vm11 = vcmp.eq.f32.partialorder %v3703_v28, inf  ;;  %v3718_v17 = vand.u32 2147483648, %v3703_v28  ;;  %vm3717_vm12 = vcmp.eq.f32.partialorder %v3703_v28, 0.0 }
0x1960   :  { %v3702_v29 = vpop.xlane.xlu0 %3701 }
0x1961   :  { %v3704_v31 = vmul.f32 0.032258064, %v3702_v29  ;;  %v6626_v29 = vld [vmem:[%s7726_s3 + $0x18] sm:$0xff] }
0x1963   :  { %6560 = vrsqrt.f32 %v3704_v31  ;;  %vm3722_vm13 = vcmp.eq.f32.partialorder %v3704_v31, inf  ;;  %v3725_v39 = vand.u32 2147483648, %v3704_v31  ;;  %vm3724_vm14 = vcmp.eq.f32.partialorder %v3704_v31, 0.0 }
0x1964   :  { %v6402_v59 = vpop.permute.xlu0 %6401 }
0x1965   :  { %v6404_v60 = vunpack.i.h.bf16 %v6402_v59  ;;  %v6403_v62 = vunpack.i.l.bf16 %v6402_v59 }
0x1967   :  { %v6201_v3 = vpack.c.bf16 %v6404_v60, %v6403_v62 }
0x1969   :  { %v6559_v32 = vpop.eup %6558 }
0x196a   :  { %v3714_v33 = vmul.f32 %v6559_v32, %v3703_v28 }
0x196c   :  { %v3716_v19 = vsel %vm3715_vm11, %v3703_v28, %v3714_v33 }
0x196d   :  { %v6561_v34 = vpop.eup %6560  ;;  %v3719_v35 = vsel %vm3717_vm12, %v3718_v17, %v3716_v19  ;;  %v6627_v19 = vld [vmem:[%s7726_s3 + $0x10] sm:$0xff] }
0x196e   :  { %v3721_v30 = vmul.f32 %v6561_v34, %v3704_v31  ;;  %v3727_v37 = vadd.f32 1e-06, %v3719_v35 }
0x1970   :  { %v3723_v40 = vsel %vm3722_vm13, %v3704_v31, %v3721_v30  ;;  %6562 = vrcp.f32 %v3727_v37  ;;  %v6628_v37 = vld [vmem:[%s7726_s3 + $0x28] sm:$0xff] }
0x1971   :  { %v3726_v48 = vsel %vm3724_vm14, %v3725_v39, %v3723_v40 }
0x1972   :  { %v3728_v41 = vadd.f32 1e-06, %v3726_v48 }
0x1974   :  { %6564 = vrcp.f32 %v3728_v41  ;;  %v6629_v41 = vld [vmem:[%s7726_s3 + $0x20] sm:$0xff] }
0x197a   :  { %v6563_v44 = vpop.eup %6562 }
0x197b   :  { %v3730_v45 = vmul.f32 %v6563_v44, %v3711_v43 }
0x197d   :  { %v3739_v46 = vadd.f32 %v5296_v1, %v3730_v45 }
0x197e   :  { %v6565_v47 = vpop.eup %6564 }
0x197f   :  { %v3732_v49 = vmul.f32 %v6565_v47, %v3712_v0  ;;  %5862 = vmatprep.mubr.msk.f32.mxu1 %vm111_vm0, %v3739_v46  ;;  %v6630_v0 = vld [vmem:[%s7726_s3 + $0x38] sm:$0xff]  ;;  %v6631_v47 = vld [vmem:[%s7726_s3 + $0x30] sm:$0xff] }
0x1981   :  { %v3740_v50 = vadd.f32 %v5296_v1, %v3732_v49 }
0x1983   :  { %5863 = vmatmul.mubr.msk.f32.vlgmr.msra.gmra.mrb[38].mxu1 %vm111_vm0, %v3740_v50 }
0x1984   :  { %6194 = vmatpush3.bf16.xpose.msk.msra.mxu1 %vm6929_vm6, %v6189_v54 }
0x1985   :  { %6203 = vmatprep.subr.msk.bf16.mxu1 %vm6929_vm6, %v6201_v3 }
0x1a56   :  { %v5864_v8 = vpop.f32.mrb[38].mxu1 }
0x1a57   :  { %4001 = vrot.lane.b32.xlu1 %v5864_v8, %s6734_s22  ;;  %v3818_v36 = vpop.f32.mrb[39].mxu1 }
0x1a58   :  { %4090 = vrot.lane.b32.xlu0 %v3818_v36, %s6736_s30  ;;  %5880 = vmatprep.mubr.msk.f32.mxu1 %vm264_vm5, %v3818_v36 }
0x1a59   :  { %5881 = vmatmul.mubr.msk.f32.vlgmr.msra.gmra.mrb[40].mxu1 %vm264_vm5, %v5864_v8 }
0x1a5a   :  { %6206 = vmatpush3.bf16.xpose.msk.msra.mxu1 %vm6929_vm6, %v6201_v3 }
0x1a5b   :  { %3999 = vrot.lane.b32.xlu1 %v3818_v36, %s6734_s22 }
0x1a5c   :  { %4181 = vrot.lane.b32.xlu0 %v3818_v36, %s6737_s0 }
0x1a5f   :  { %4092 = vrot.lane.b32.xlu1 %v5864_v8, %s6736_s30 }
0x1a63   :  { %4183 = vrot.lane.b32.xlu1 %v5864_v8, %s6737_s0 }
0x1ac9   :  { %v4002_v10 = vpop.permute.xlu1 %4001 }
0x1aca   :  { %v4091_v27 = vpop.permute.xlu0 %4090 }
0x1acb   :  { %5894 = vmatprep.mubr.msk.f32.mxu1 %vm264_vm5, %v4091_v27 }
0x1acd   :  { %v4000_v9 = vpop.permute.xlu1 %3999 }
0x1ace   :  { %v4182_v11 = vpop.permute.xlu0 %4181  ;;  %5887 = vmatprep.mubr.msk.f32.mxu0 %vm264_vm5, %v4000_v9 }
0x1acf   :  { %5888 = vmatmul.mubr.msk.f32.vlgmr.msra.gmra.mrb[30].mxu0 %vm264_vm5, %v4002_v10 }
0x1ad0   :  { %6212 = vmatpush3.bf16.xpose.msk.msra.mxu0 %vm6929_vm6, %v6207_v7  ;;  %5901 = vmatprep.mubr.msk.f32.mxu0 %vm264_vm5, %v4182_v11 }
0x1ad1   :  { %v4093_v12 = vpop.permute.xlu1 %4092 }
0x1ad2   :  { %5895 = vmatmul.mubr.msk.f32.vlgmr.msra.gmra.mrb[42].mxu1 %vm264_vm5, %v4093_v12 }
0x1ad5   :  { %v4184_v13 = vpop.permute.xlu1 %4183 }
0x1ad7   :  { %5902 = vmatmul.mubr.msk.f32.vlgmr.msra.gmra.mrb[32].mxu0 %vm264_vm5, %v4184_v13 }
0x1b2c   :  { %v5882_v14 = vpop.f32.mrb[40].mxu1 }
0x1b2d   :  { %v4273_v15 = vmul.f32 0.35355338, %v5882_v14  ;;  %v3990_v16 = vpop.f32.mrb[41].mxu1 }
0x1b2e   :  { %v4272_v18 = vmul.f32 0.35355338, %v3990_v16 }
0x1b2f   :  { %v4281_v21 = vadd.f32 %v6624_v20, %v4273_v15 }
0x1b30   :  { %v4280_v22 = vadd.f32 %v6625_v55, %v4272_v18 }
0x1b31   :  { %v4291_v23 = vsel %vm637_vm7, %v4281_v21, -inf }
0x1b32   :  { %4292 = vmax.xlane.f32.xlu1 %v4291_v23  ;;  %v4288_v24 = vsel %vm637_vm7, %v4280_v22, -inf }
0x1b33   :  { %4289 = vmax.xlane.f32.xlu0 %v4288_v24 }
0x1ba2   :  { %v5889_v25 = vpop.f32.mrb[30].mxu0 }
0x1ba3   :  { %v4275_v26 = vmul.f32 0.35355338, %v5889_v25  ;;  %v4081_v38 = vpop.f32.mrb[31].mxu0 }
0x1ba4   :  { %v4274_v28 = vmul.f32 0.35355338, %v4081_v38 }
0x1ba5   :  { %v4283_v31 = vadd.f32 %v6626_v29, %v4275_v26  ;;  %v5896_v32 = vpop.f32.mrb[42].mxu1 }
0x1ba6   :  { %v4277_v33 = vmul.f32 0.35355338, %v5896_v32  ;;  %v4172_v17 = vpop.f32.mrb[43].mxu1  ;;  %v4282_v34 = vadd.f32 %v6627_v19, %v4274_v28 }
0x1ba7   :  { %v4276_v35 = vmul.f32 0.35355338, %v4172_v17  ;;  %v4297_v30 = vsel %vm637_vm7, %v4283_v31, -inf }
0x1ba8   :  { %v4285_v39 = vadd.f32 %v6628_v37, %v4277_v33  ;;  %4298 = vmax.xlane.f32.xlu0 %v4297_v30  ;;  %v4294_v1 = vsel %vm637_vm7, %v4282_v34, -inf }
0x1ba9   :  { %v4284_v42 = vadd.f32 %v6629_v41, %v4276_v35 }
0x1baa   :  { %v5903_v40 = vpop.f32.mrb[32].mxu0  ;;  %v4303_v48 = vsel %vm637_vm7, %v4285_v39, -inf }
0x1bab   :  { %v4279_v43 = vmul.f32 0.35355338, %v5903_v40  ;;  %v4263_v44 = vpop.f32.mrb[33].mxu0  ;;  %4304 = vmax.xlane.f32.xlu1 %v4303_v48  ;;  %v4300_v51 = vsel %vm637_vm7, %v4284_v42, -inf }
0x1bac   :  { %v4278_v45 = vmul.f32 0.35355338, %v4263_v44  ;;  %4295 = vmax.xlane.f32.xlu0 %v4294_v1 }
0x1bad   :  { %v4287_v46 = vadd.f32 %v6630_v0, %v4279_v43 }
0x1bae   :  { %v4286_v49 = vadd.f32 %v6631_v47, %v4278_v45 }
0x1baf   :  { %v4309_v50 = vsel %vm637_vm7, %v4287_v46, -inf }
0x1bb0   :  { %4310 = vmax.xlane.f32.xlu1 %v4309_v50  ;;  %4301 = vmax.xlane.f32.xlu0 %v4300_v51  ;;  %v4306_v52 = vsel %vm637_vm7, %v4286_v49, -inf }
0x1bb4   :  { %4307 = vmax.xlane.f32.xlu0 %v4306_v52 }
0x1bbf   :  { %v4293_v54 = vpop.xlane.xlu1 %4292 }
0x1bc0   :  { %v4313_v56 = vsub.f32 %v4281_v21, %v4293_v54  ;;  %v4290_v57 = vpop.xlane.xlu0 %4289 }
0x1bc1   :  { %v4312_v58 = vsub.f32 %v4280_v22, %v4290_v57 }
0x1bc2   :  { %v4322_v59 = vmul.f32 1.442695, %v4313_v56 }
0x1bc3   :  { %v4320_v60 = vmul.f32 1.442695, %v4312_v58 }
0x1bc4   :  { %6566 = vpow2.f32 %v4322_v59 }
0x1bc5   :  { %6568 = vpow2.f32 %v4320_v60 }
0x1bce   :  { %v7570_v62 = vpop.eup %6566 }
0x1bcf   :  { %v6569_v2 = vpop.eup %6568  ;;  %v4339_v3 = vsel %vm637_vm7, %v7570_v62, 0.0 }
0x1bd0   :  { %4340 = vadd.xlane.f32.xlu1 %v4339_v3  ;;  %v4336_v4 = vsel %vm637_vm7, %v6569_v2, 0.0 }
0x1bd1   :  { %4337 = vadd.xlane.f32.xlu0 %v4336_v4 }
0x1c35   :  { %v4299_v5 = vpop.xlane.xlu0 %4298 }
0x1c36   :  { %v4315_v6 = vsub.f32 %v4283_v31, %v4299_v5 }
0x1c38   :  { %v4326_v7 = vmul.f32 1.442695, %v4315_v6  ;;  %v4305_v8 = vpop.xlane.xlu1 %4304 }
0x1c39   :  { %v4317_v36 = vsub.f32 %v4285_v39, %v4305_v8  ;;  %v4296_v10 = vpop.xlane.xlu0 %4295 }
0x1c3a   :  { %6570 = vpow2.f32 %v4326_v7  ;;  %v4314_v27 = vsub.f32 %v4282_v34, %v4296_v10 }
0x1c3b   :  { %v4330_v9 = vmul.f32 1.442695, %v4317_v36 }
0x1c3c   :  { %v4324_v11 = vmul.f32 1.442695, %v4314_v27 }
0x1c3d   :  { %6572 = vpow2.f32 %v4330_v9  ;;  %v4311_v12 = vpop.xlane.xlu1 %4310  ;;  %v4302_v13 = vpop.xlane.xlu0 %4301 }
0x1c3e   :  { %6574 = vpow2.f32 %v4324_v11  ;;  %v4319_v14 = vsub.f32 %v4287_v46, %v4311_v12  ;;  %v4316_v15 = vsub.f32 %v4284_v42, %v4302_v13  ;;  %v5305_v11 = vld [vmem:[%s7730_s7 + $0x60] sm:$0xff]  ;;  %v5306_v12 = vld [vmem:[%s7730_s7 + $0x68] sm:$0xff] }
0x1c3f   :  { %v6229_v13 = vpack.c.bf16 %v5306_v12, %v5305_v11 }
0x1c40   :  { %v4334_v16 = vmul.f32 1.442695, %v4319_v14  ;;  %v4328_v18 = vmul.f32 1.442695, %v4316_v15  ;;  %v5307_v14 = vld [vmem:[%s7730_s7 + $0x70] sm:$0xff]  ;;  %v5308_v15 = vld [vmem:[%s7730_s7 + $0x78] sm:$0xff] }
0x1c41   :  { %v4308_v20 = vpop.xlane.xlu0 %4307 }
0x1c42   :  { %6576 = vpow2.f32 %v4334_v16  ;;  %v4318_v21 = vsub.f32 %v4286_v49, %v4308_v20  ;;  %v6233_v16 = vpack.c.bf16 %v5308_v15, %v5307_v14 }
0x1c43   :  { %6578 = vpow2.f32 %v4328_v18 }
0x1c44   :  { %v7575_v55 = vpop.eup %6570  ;;  %v4332_v22 = vmul.f32 1.442695, %v4318_v21 }
0x1c45   :  { %v4345_v23 = vsel %vm637_vm7, %v7575_v55, 0.0 }
0x1c46   :  { %6580 = vpow2.f32 %v4332_v22  ;;  %4346 = vadd.xlane.f32.xlu1 %v4345_v23 }
0x1c47   :  { %v6573_v24 = vpop.eup %6572 }
0x1c48   :  { %v7579_v25 = vpop.eup %6574  ;;  %v4351_v26 = vsel %vm637_vm7, %v6573_v24, 0.0 }
0x1c49   :  { %v4342_v38 = vsel %vm637_vm7, %v7579_v25, 0.0 }
0x1c4a   :  { %4352 = vadd.xlane.f32.xlu1 %v4351_v26  ;;  %4343 = vadd.xlane.f32.xlu0 %v4342_v38 }
0x1c4c   :  { %v7584_v28 = vpop.eup %6576 }
0x1c4d   :  { %v6579_v29 = vpop.eup %6578  ;;  %v4357_v31 = vsel %vm637_vm7, %v7584_v28, 0.0 }
0x1c4e   :  { %4358 = vadd.xlane.f32.xlu1 %v4357_v31  ;;  %v4348_v32 = vsel %vm637_vm7, %v6579_v29, 0.0 }
0x1c4f   :  { %4349 = vadd.xlane.f32.xlu0 %v4348_v32 }
0x1c50   :  { %v7589_v33 = vpop.eup %6580 }
0x1c51   :  { %v4354_v17 = vsel %vm637_vm7, %v7589_v33, 0.0 }
0x1c53   :  { %4355 = vadd.xlane.f32.xlu0 %v4354_v17 }
0x1c5d   :  { %v4341_v30 = vpop.xlane.xlu1 %4340 }
0x1c5e   :  { %v4338_v19 = vpop.xlane.xlu0 %4337 }
0x1c5f   :  { %6582 = vrcp.f32 %v4338_v19  ;;  %6416 = vrot.lane.b32.xlu1 %v7500_v53, %s6731_s1 }
0x1c63   :  { %6421 = vrot.lane.b32.xlu1 %v7500_v53, %s6733_s21 }
0x1c67   :  { %6426 = vrot.lane.b32.xlu1 %v7500_v53, %s6735_s6 }
0x1c69   :  { %v6583_v34 = vpop.eup %6582  ;;  %6411 = vrot.lane.b32.xlu0 %v7500_v53, %s6732_s16 }
0x1c6a   :  { %v4361_v35 = vmul.f32 %v6583_v34, %v6569_v2 }
0x1c6c   :  { %5908 = vmatprep.mubr.msk.f32.mxu1 %vm637_vm7, %v4361_v35 }
0x1cd3   :  { %v4347_v37 = vpop.xlane.xlu1 %4346 }
0x1cd7   :  { %v4353_v39 = vpop.xlane.xlu1 %4352  ;;  %v4344_v40 = vpop.xlane.xlu0 %4343 }
0x1cd8   :  { %6584 = vrcp.f32 %v4353_v39 }
0x1cdb   :  { %v4359_v48 = vpop.xlane.xlu1 %4358 }
0x1cdc   :  { %v4350_v41 = vpop.xlane.xlu0 %4349 }
0x1cdd   :  { %6586 = vrcp.f32 %v4350_v41 }
0x1cde   :  { %6588 = vrcp.f32 %v4341_v30 }
0x1cdf   :  { %6590 = vrcp.f32 %v4344_v40  ;;  %v6417_v42 = vpop.permute.xlu1 %6416 }
0x1ce0   :  { %v4356_v43 = vpop.xlane.xlu0 %4355  ;;  %6592 = vrcp.f32 %v4347_v37  ;;  %v6419_v0 = vunpack.i.h.bf16 %v6417_v42  ;;  %v6418_v46 = vunpack.i.l.bf16 %v6417_v42 }
0x1ce1   :  { %6594 = vrcp.f32 %v4356_v43 }
0x1ce2   :  { %v6585_v50 = vpop.eup %6584  ;;  %6596 = vrcp.f32 %v4359_v48  ;;  %v6217_v60 = vpack.c.bf16 %v6419_v0, %v6418_v46 }
0x1ce3   :  { %v6422_v44 = vpop.permute.xlu1 %6421  ;;  %v4371_v4 = vmul.f32 %v6585_v50, %v6573_v24  ;;  %v4899_v50 = vld [vmem:[#allocation7 + $0x28] sm:$0xff] }
0x1ce4   :  { %v6424_v1 = vunpack.i.h.bf16 %v6422_v44  ;;  %v6423_v53 = vunpack.i.l.bf16 %v6422_v44  ;;  %v6412_v45 = vpop.permute.xlu0 %6411 }
0x1ce5   :  { %v6414_v47 = vunpack.i.h.bf16 %v6412_v45  ;;  %v6413_v49 = vunpack.i.l.bf16 %v6412_v45 }
0x1ce6   :  { %v6221_v51 = vpack.c.bf16 %v6424_v1, %v6423_v53 }
0x1ce7   :  { %v6587_v52 = vpop.eup %6586  ;;  %v6213_v54 = vpack.c.bf16 %v6414_v47, %v6413_v49  ;;  %v6427_v56 = vpop.permute.xlu1 %6426  ;;  %v4898_v49 = vld [vmem:[#allocation7 + $0x20] sm:$0xff] }
0x1ce8   :  { %v6589_v57 = vpop.eup %6588  ;;  %6222 = vmatprep.subr.bf16.mxu0 %v6221_v51  ;;  %v4369_v58 = vmul.f32 %v6587_v52, %v6579_v29  ;;  %v6429_v2 = vunpack.i.h.bf16 %v6427_v56  ;;  %v6428_v3 = vunpack.i.l.bf16 %v6427_v56  ;;  %v6237_v52 = vpack.c.bf16 %v4899_v50, %v4898_v49 }
0x1ce9   :  { %v6591_v59 = vpop.eup %6590  ;;  %6214 = vmatprep.subr.bf16.mxu1 %v6213_v54  ;;  %6224 = vmatpush3.bf16.msra.mxu0 %v6221_v51  ;;  %v4363_v5 = vmul.f32 %v6589_v57, %v7570_v62  ;;  %v4900_v51 = vld [vmem:[#allocation7 + $0x30] sm:$0xff] }
0x1cea   :  { %6216 = vmatpush3.bf16.msra.mxu1 %v6213_v54  ;;  %5922 = vmatprep.mubr.msk.f32.mxu0 %vm637_vm7, %v4369_v58  ;;  %v6593_v6 = vpop.eup %6592  ;;  %v4365_v7 = vmul.f32 %v6591_v59, %v7579_v25  ;;  %v6225_v36 = vpack.c.bf16 %v6429_v2, %v6428_v3  ;;  %v4901_v54 = vld [vmem:[#allocation7 + $0x38] sm:$0xff]  ;;  %v5343_v57 = vld [vmem:[%s7732_s9 + $0x40] sm:$0xff]  ;;  %v5345_v59 = vld [vmem:[%s7732_s9 + $0x50] sm:$0xff] }
0x1ceb   :  { %6218 = vmatprep.subr.bf16.mxu1 %v6217_v60  ;;  %v6595_v8 = vpop.eup %6594  ;;  %v4367_v10 = vmul.f32 %v6593_v6, %v7575_v55  ;;  %6230 = vmatprep.subr.bf16.mxu0 %v6229_v13  ;;  %v6241_v56 = vpack.c.bf16 %v4901_v54, %v4900_v51  ;;  %v5344_v58 = vld [vmem:[%s7732_s9 + $0x48] sm:$0xff]  ;;  %v5346_v2 = vld [vmem:[%s7732_s9 + $0x58] sm:$0xff] }
0x1cec   :  { %5923 = vmatmul.mubr.msk.f32.vlgmr.msra.gmra.mrb[34].mxu0 %vm637_vm7, %v4371_v4  ;;  %v6597_v27 = vpop.eup %6596  ;;  %v4373_v9 = vmul.f32 %v6595_v8, %v7589_v33  ;;  %v6249_v3 = vpack.c.bf16 %v5346_v2, %v5345_v59  ;;  %v5347_v4 = vld [vmem:[%s7732_s9 + $0x60] sm:$0xff] }
0x1ced   :  { %5909 = vmatmul.mubr.msk.f32.vlgmr.msra.gmra.mrb[44].mxu1 %vm637_vm7, %v4363_v5  ;;  %v4375_v62 = vmul.f32 %v6597_v27, %v7584_v28  ;;  %6232 = vmatpush3.bf16.msra.mxu0 %v6229_v13  ;;  %v5348_v5 = vld [vmem:[%s7732_s9 + $0x68] sm:$0xff] }
0x1cee   :  { %6220 = vmatpush3.bf16.msra.mxu1 %v6217_v60  ;;  %5915 = vmatprep.mubr.msk.f32.mxu1 %vm637_vm7, %v4365_v7  ;;  %v6245_v60 = vpack.c.bf16 %v5344_v58, %v5343_v57  ;;  %v6253_v6 = vpack.c.bf16 %v5348_v5, %v5347_v4 }
0x1cef   :  { %6226 = vmatprep.subr.bf16.mxu1 %v6225_v36  ;;  %6234 = vmatprep.subr.bf16.mxu0 %v6233_v16 }
0x1cf1   :  { %5916 = vmatmul.mubr.msk.f32.vlgmr.msra.gmra.mrb[46].mxu1 %vm637_vm7, %v4367_v10  ;;  %6236 = vmatpush3.bf16.msra.mxu0 %v6233_v16 }
0x1cf2   :  { %6228 = vmatpush3.bf16.msra.mxu1 %v6225_v36  ;;  %5929 = vmatprep.mubr.msk.f32.mxu1 %vm637_vm7, %v4373_v9 }
0x1cf3   :  { %6238 = vmatprep.subr.bf16.mxu1 %v6237_v52  ;;  %6246 = vmatprep.subr.bf16.mxu0 %v6245_v60 }
0x1cf5   :  { %5930 = vmatmul.mubr.msk.f32.vlgmr.msra.gmra.mrb[48].mxu1 %vm637_vm7, %v4375_v62 }
0x1cf6   :  { %6240 = vmatpush3.bf16.msra.mxu1 %v6237_v52 }
0x1cf7   :  { %6242 = vmatprep.subr.bf16.mxu1 %v6241_v56 }
0x1cfa   :  { %6244 = vmatpush3.bf16.msra.mxu1 %v6241_v56 }
0x1dbf   :  { %v5924_v18 = vpop.f32.mrb[34].mxu0 }
0x1dc0   :  { %v5910_v20 = vpop.f32.mrb[44].mxu1  ;;  %v4628_v21 = vpop.f32.mrb[35].mxu0 }
0x1dc1   :  { %v4454_v55 = vpop.f32.mrb[45].mxu1 }
0x1dc4   :  { %v5917_v22 = vpop.f32.mrb[46].mxu1 }
0x1dc5   :  { %4728 = vrot.lane.b32.xlu1 %v5917_v22, %s6729_s26  ;;  %v4541_v23 = vpop.f32.mrb[47].mxu1 }
0x1dc6   :  { %4726 = vrot.lane.b32.xlu0 %v4541_v23, %s6729_s26 }
0x1dc8   :  { %v5931_v24 = vpop.f32.mrb[48].mxu1 }
0x1dc9   :  { %4736 = vrot.lane.b32.xlu1 %v5924_v18, %s7749_s29  ;;  %v4715_v25 = vpop.f32.mrb[49].mxu1 }
0x1dca   :  { %4734 = vrot.lane.b32.xlu0 %v4628_v21, %s7749_s29  ;;  %s6744_s29 = smov [#allocation8]  }
0x1dcd   :  { %4744 = vrot.lane.b32.xlu1 %v5931_v24, %s7750_s17  ;;  %v5338_v24 = vld [vmem:[%s7736_s13 + $0x5] ss:$0 sm:$0xff] }
0x1dce   :  { %4742 = vrot.lane.b32.xlu0 %v4715_v25, %s7750_s17  ;;  %s5162_s17 = sshll.u32 %s6744_s29, 4  ;;  %s5163_s17 = int_to_ptr.vmem [resolvable:$true] %s5162_s17 }
0x1dcf   :  { %p6703_p11 = scmp.lt.s32.totalorder %s5163_s17, %s5163_s17 }
0x1e37   :  { %v4729_v26 = vpop.permute.xlu1 %4728 }
0x1e38   :  { %v4727_v38 = vpop.permute.xlu0 %4726  ;;  %v4749_v33 = vsel %vm264_vm5, %v5910_v20, %v4729_v26 }
0x1e39   :  { %v4748_v31 = vsel %vm264_vm5, %v4454_v55, %v4727_v38  ;;  %v5337_v55 = vld [vmem:[%s7735_s12 + $0x5] ss:$0 sm:$0xff] }
0x1e3b   :  { %v4737_v28 = vpop.permute.xlu1 %4736 }
0x1e3c   :  { %v4735_v29 = vpop.permute.xlu0 %4734  ;;  %v4751_v34 = vsel %vm637_vm7, %v4749_v33, %v4737_v28  ;;  %v5350_v33 = vld [vmem:[%s7732_s9 + $0x78] sm:$0xff] }
0x1e3d   :  { %v4750_v17 = vsel %vm637_vm7, %v4748_v31, %v4735_v29 }
0x1e3f   :  { %v4745_v32 = vpop.permute.xlu1 %4744 }
0x1e40   :  { %v4743_v19 = vpop.permute.xlu0 %4742  ;;  %v4753_v30 = vsel %vm1102_vm8, %v4751_v34, %v4745_v32  ;;  %v5349_v32 = vld [vmem:[%s7732_s9 + $0x70] sm:$0xff] }
0x1e41   :  { %v4752_v35 = vsel %vm1102_vm8, %v4750_v17, %v4743_v19  ;;  %v6257_v17 = vpack.c.bf16 %v5350_v33, %v5349_v32  ;;  %v5340_v19 = vld [vmem:[%s7733_s10 + $0x1] ss:$0 sm:$0xff] }
0x1e42   :  { %5940 = vmatprep.mubr.msk.f32.mxu0 %vm111_vm0, %v4752_v35 }
0x1e43   :  { %5941 = vmatmul.mubr.msk.f32.vlgmr.msra.gmra.mrb[36].mxu0 %vm111_vm0, %v4753_v30 }
0x1e44   :  { %6248 = vmatpush3.bf16.msra.mxu0 %v6245_v60 }
0x1e45   :  { %6250 = vmatprep.subr.bf16.mxu0 %v6249_v3 }
0x1e48   :  { %6252 = vmatpush3.bf16.msra.mxu0 %v6249_v3 }
0x1e49   :  { %6254 = vmatprep.subr.bf16.mxu0 %v6253_v6 }
0x1e4c   :  { %6256 = vmatpush3.bf16.msra.mxu0 %v6253_v6 }
0x1e4d   :  { %6258 = vmatprep.subr.bf16.mxu0 %v6257_v17 }
0x1e50   :  { %6260 = vmatpush3.bf16.msra.mxu0 %v6257_v17 }
0x1f16   :  { %v5942_v37 = vpop.f32.mrb[36].mxu0 }
0x1f17   :  { %v7641_v39 = vadd.f32 %v5942_v37, %v7466_v61  ;;  %v4826_v40 = vpop.f32.mrb[37].mxu0 }
0x1f18   :  { %v7644_v48 = vadd.f32 %v4826_v40, %v7469_v63 }
0x1f19   :  { %v4844_v41 = vsel %vm111_vm0, %v7641_v39, 0.0 }
0x1f1a   :  { %4845 = vadd.xlane.f32.xlu1 %v4844_v41  ;;  %v4841_v42 = vsel %vm111_vm0, %v7644_v48, 0.0 }
0x1f1b   :  { %4842 = vadd.xlane.f32.xlu0 %v4841_v42 }
0x1fa7   :  { %v4846_v43 = vpop.xlane.xlu1 %4845 }
0x1fa8   :  { %v4848_v44 = vmul.f32 0.03125, %v4846_v43  ;;  %v4843_v1 = vpop.xlane.xlu0 %4842  ;;  %v5354_v43 = vld [vmem:[%s7734_s11 + $0x1] ss:$0 sm:$0xff] }
0x1fa9   :  { %v4847_v53 = vmul.f32 0.03125, %v4843_v1 }
0x1faa   :  { %v4850_v45 = vsub.f32 %v7641_v39, %v4848_v44 }
0x1fab   :  { %v4849_v61 = vsub.f32 %v7644_v48, %v4847_v53 }
0x1fac   :  { %v4852_v46 = vmul.f32 %v4850_v45, %v4850_v45  ;;  %v4868_v26 = vmul.f32 %v5337_v55, %v4850_v45 }
0x1fad   :  { %v4851_v0 = vmul.f32 %v4849_v61, %v4849_v61  ;;  %v4867_v22 = vmul.f32 %v5337_v55, %v4849_v61 }
0x1fae   :  { %v4856_v47 = vsel %vm111_vm0, %v4852_v46, 0.0 }
0x1faf   :  { %v4853_v63 = vsel %vm111_vm0, %v4851_v0, 0.0 }
0x1fb0   :  { %4854 = vadd.xlane.f32.xlu0 %v4853_v63 }
0x1fb4   :  { %4857 = vadd.xlane.f32.xlu0 %v4856_v47 }
0x203d   :  { %v4855_v7 = vpop.xlane.xlu0 %4854 }
0x203e   :  { %v4859_v8 = vmul.f32 0.032258064, %v4855_v7 }
0x2040   :  { %6598 = vrsqrt.f32 %v4859_v8  ;;  %vm4871_vm5 = vcmp.eq.f32.partialorder %v4859_v8, inf  ;;  %v4874_v62 = vand.u32 2147483648, %v4859_v8  ;;  %vm4873_vm6 = vcmp.eq.f32.partialorder %v4859_v8, 0.0 }
0x2041   :  { %v4858_v36 = vpop.xlane.xlu0 %4857 }
0x2042   :  { %v4860_v10 = vmul.f32 0.032258064, %v4858_v36 }
0x2044   :  { %6600 = vrsqrt.f32 %v4860_v10  ;;  %vm4878_vm7 = vcmp.eq.f32.partialorder %v4860_v10, inf  ;;  %v4881_v16 = vand.u32 2147483648, %v4860_v10  ;;  %vm4880_vm8 = vcmp.eq.f32.partialorder %v4860_v10, 0.0 }
0x204a   :  { %v6599_v27 = vpop.eup %6598 }
0x204b   :  { %v4870_v9 = vmul.f32 %v6599_v27, %v4859_v8 }
0x204d   :  { %v4872_v11 = vsel %vm4871_vm5, %v4859_v8, %v4870_v9 }
0x204e   :  { %v6601_v12 = vpop.eup %6600  ;;  %v4875_v13 = vsel %vm4873_vm6, %v4874_v62, %v4872_v11  ;;  %v5357_v11 = vld [vmem:[%s7735_s12 + $0x6] ss:$0 sm:$0xff]  ;;  %s6698_s12 = scalar_lea.vmem %s5163_s17, 256 }
0x204f   :  { %v4877_v14 = vmul.f32 %v6601_v12, %v4860_v10  ;;  %v4883_v15 = vadd.f32 1e-06, %v4875_v13  ;;  %p6699_p10 = scmp.ne.s32.totalorder %s5163_s17, %s6698_s12  ;;  %p6704_p12 = scmp.lt.s32.totalorder %s6698_s12, %s6698_s12 }
0x2051   :  { %v4879_v18 = vsel %vm4878_vm7, %v4860_v10, %v4877_v14  ;;  %6602 = vrcp.f32 %v4883_v15  ;;  %v5358_v15 = vld [vmem:[%s7736_s13 + $0x6] ss:$0 sm:$0xff]  ;;  %p6705_p13 = por %p6704_p12, %p6703_p11 }
0x2052   :  { %v4882_v20 = vsel %vm4880_vm8, %v4881_v16, %v4879_v18 }
0x2053   :  { %v4884_v21 = vadd.f32 1e-06, %v4882_v20  ;;  %p6706_p0 = pnand %p6705_p13, %p6699_p10 }
0x2055   :  { %6604 = vrcp.f32 %v4884_v21 }
0x205b   :  { %v6603_v23 = vpop.eup %6602 }
0x205c   :  { %v4886_v25 = vmul.f32 %v6603_v23, %v4867_v22 }
0x205e   :  { %v4895_v38 = vadd.f32 %v5338_v24, %v4886_v25 }
0x205f   :  { %v6605_v28 = vpop.eup %6604 }
0x2060   :  { %v4888_v29 = vmul.f32 %v6605_v28, %v4868_v26  ;;  %5951 = vmatprep.mubr.msk.f32.mxu1 %vm111_vm0, %v4895_v38 }
0x2062   :  { %v4896_v31 = vadd.f32 %v5338_v24, %v4888_v29 }
0x2064   :  { %5952 = vmatmul.mubr.msk.f32.vlgmr.msra.gmra.mrb[50].mxu1 %vm111_vm0, %v4896_v31 }
0x2137   :  { %v5953_v34 = vpop.f32.mrb[50].mxu1 }
0x2138   :  { %v4988_v35 = vadd.f32 %v5953_v34, %v5340_v19  ;;  %v4982_v30 = vpop.f32.mrb[51].mxu1 }
0x2139   :  { %v4983_v37 = vadd.f32 %v5340_v19, %v4982_v30 }
0x213a   :  { %v4992_v41 = vmax.f32 %v4988_v35, 0.0 }
0x213b   :  { %v4991_v40 = vmax.f32 %v4983_v37, 0.0 }
0x213d   :  { %5970 = vmatprep.mubr.msk.f32.mxu0 %vm2510_vm2, %v4991_v40 }
0x213e   :  { %5971 = vmatmul.mubr.msk.f32.vlgmr.msra.gmra.mrb[38].mxu0 %vm2510_vm2, %v4992_v41 }
0x2211   :  { %v5972_v42 = vpop.f32.mrb[38].mxu0 }
0x2212   :  { %v5084_v44 = vadd.f32 %v5972_v42, %v7641_v39  ;;  %v5074_v1 = vpop.f32.mrb[39].mxu0 }
0x2213   :  { %v5083_v53 = vadd.f32 %v5074_v1, %v7644_v48 }
0x2214   :  { %v5094_v45 = vadd.f32 %v5354_v43, %v5084_v44 }
0x2215   :  { %v5093_v61 = vadd.f32 %v5354_v43, %v5083_v53 }
0x2216   :  { %v5102_v0 = vsel %vm111_vm0, %v5094_v45, 0.0 }
0x2217   :  { %5103 = vadd.xlane.f32.xlu1 %v5102_v0  ;;  %v5099_v63 = vsel %vm111_vm0, %v5093_v61, 0.0 }
0x2218   :  { %5100 = vadd.xlane.f32.xlu0 %v5099_v63 }
0x22a4   :  { %v5104_v46 = vpop.xlane.xlu1 %5103 }
0x22a5   :  { %v5106_v47 = vmul.f32 0.03125, %v5104_v46  ;;  %v5101_v49 = vpop.xlane.xlu0 %5100 }
0x22a6   :  { %v5105_v50 = vmul.f32 0.03125, %v5101_v49 }
0x22a7   :  { %v5108_v51 = vsub.f32 %v5094_v45, %v5106_v47 }
0x22a8   :  { %v5107_v52 = vsub.f32 %v5093_v61, %v5105_v50 }
0x22a9   :  { %v5110_v54 = vmul.f32 %v5108_v51, %v5108_v51  ;;  %v5126_v12 = vmul.f32 %v5357_v11, %v5108_v51 }
0x22aa   :  { %v5109_v56 = vmul.f32 %v5107_v52, %v5107_v52  ;;  %v5125_v14 = vmul.f32 %v5357_v11, %v5107_v52 }
0x22ab   :  { %v5114_v39 = vsel %vm111_vm0, %v5110_v54, 0.0 }
0x22ac   :  { %5115 = vadd.xlane.f32.xlu1 %v5114_v39  ;;  %v5111_v48 = vsel %vm111_vm0, %v5109_v56, 0.0 }
0x22ad   :  { %5112 = vadd.xlane.f32.xlu0 %v5111_v48 }
0x2339   :  { %v5116_v57 = vpop.xlane.xlu1 %5115 }
0x233a   :  { %v5118_v58 = vmul.f32 0.032258064, %v5116_v57  ;;  %v5113_v59 = vpop.xlane.xlu0 %5112 }
0x233b   :  { %v5117_v60 = vmul.f32 0.032258064, %v5113_v59 }
0x233c   :  { %6606 = vrsqrt.f32 %v5118_v58  ;;  %vm5136_vm15 = vcmp.eq.f32.partialorder %v5118_v58, inf  ;;  %v5139_v5 = vand.u32 2147483648, %v5118_v58  ;;  %vm5138_vm1 = vcmp.eq.f32.partialorder %v5118_v58, 0.0 }
0x233d   :  { %6608 = vrsqrt.f32 %v5117_v60  ;;  %vm5129_vm2 = vcmp.eq.f32.partialorder %v5117_v60, inf  ;;  %v5132_v8 = vand.u32 2147483648, %v5117_v60  ;;  %vm5131_vm3 = vcmp.eq.f32.partialorder %v5117_v60, 0.0 }
0x2346   :  { %v6607_v2 = vpop.eup %6606 }
0x2347   :  { %v6609_v3 = vpop.eup %6608  ;;  %v5135_v4 = vmul.f32 %v6607_v2, %v5118_v58 }
0x2348   :  { %v5128_v6 = vmul.f32 %v6609_v3, %v5117_v60 }
0x2349   :  { %v5137_v7 = vsel %vm5136_vm15, %v5118_v58, %v5135_v4 }
0x234a   :  { %v5140_v36 = vsel %vm5138_vm1, %v5139_v5, %v5137_v7  ;;  %v5130_v10 = vsel %vm5129_vm2, %v5117_v60, %v5128_v6 }
0x234b   :  { %v5142_v27 = vadd.f32 1e-06, %v5140_v36  ;;  %v5133_v9 = vsel %vm5131_vm3, %v5132_v8, %v5130_v10 }
0x234c   :  { %v5141_v62 = vadd.f32 1e-06, %v5133_v9 }
0x234d   :  { %6610 = vrcp.f32 %v5142_v27 }
0x234e   :  { %6612 = vrcp.f32 %v5141_v62 }
0x2357   :  { %v6611_v13 = vpop.eup %6610 }
0x2358   :  { %v6613_v16 = vpop.eup %6612  ;;  %v5146_v18 = vmul.f32 %v6611_v13, %v5126_v12 }
0x2359   :  { %v5144_v20 = vmul.f32 %v6613_v16, %v5125_v14 }
0x235a   :  { %v5154_v21 = vadd.f32 %v5358_v15, %v5146_v18 }
0x235b   :  { %v5153_v55 = vadd.f32 %v5358_v15, %v5144_v20 }
0x235c   :  { %5156 = vst.msk [vmem:[#allocation8 + $0x8] sm:$0xff] %vm111_vm0, %v5154_v21 }
0x235d   :  { %5155 = vst.msk [vmem:[#allocation8] sm:$0xff] %vm111_vm0, %v5153_v55 }
0x235e   :  { %6709 = shalt.err (!%p6706_p0)
}
0x235f   :  { %s6710_s20 = scalar_lea.hbm %s7737_s14, 256 }
0x2360   :  { %p6711_p1 = scmp.ne.s32.totalorder %s7737_s14, %s6710_s20  ;;  %p6714_p2 = scmp.lt.u32.totalorder %s6710_s20, %s7737_s14 }
0x2362   :  { %p6716_p3 = pnand %p6714_p2, %p6711_p1 }
0x2364   :  { %6719 = shalt.err (!%p6716_p3)
}
0x2365   :  { %s7751_s23 = smov 128  }
0x2366   :  { %5168 = dma.vmem_to_hbm [thread:$0]  %s5163_s17, 256, %s7737_s14, [#allocation4], %s7751_s23, %s7751_s23, %s6729_s26  }
0x2367   :  { %6724 = dma.done.wait [#allocation4], 256  }
0x2368   :  { %6725 = vsyncadd [#allocation4], 4294967040 }
0x2369   :  { %5172 = vsyncpa [#allocation3], 1 }
0x236a   :  { %5173 = vsyncpa [#allocation6], 1 }
0x236b   :  { %5174 = vsyncpa [#allocation4], 1 }

</bundles_post_ra>
